<compile_context>
chip_gen: v7x
topology: tpu7x:2x2x1
jax: 0.10.0
libtpu: 0.0.40
codegen_flags: <defaults>
</compile_context>

<pallas_src>
import functools

import jax
import jax.numpy as jnp
from jax.experimental import pallas as pl
from jax.experimental.pallas import tpu as pltpu

EPS = 1e-5
LANES = 128
COMPUTE_DTYPE = jnp.bfloat16   # MXU operand dtype (accumulation stays f32)


def _round_up(x, m):
    return (x + m - 1) // m * m


# ---------------------------------------------------------------------------
# Pass A: conv (single folded-tap matmul) + bias, plus per-channel partial stats
# ---------------------------------------------------------------------------
def _conv_stats_kernel(p_ref, w_ref, b_ref, y_ref, stats_ref, *, true_m, tile_m):
    """p_ref: (TM, 9*Cp) bf16 patches; w_ref: (9*Cp, Cp) bf16; b_ref: (1, Cp) f32.
    y_ref: (TM, Cp) f32 pre-BN conv output; stats_ref: (2, Cp) f32 [sum; sum_sq]."""
    i = pl.program_id(0)

    acc = jnp.dot(p_ref[...], w_ref[...], preferred_element_type=jnp.float32)
    acc = acc + b_ref[...]
    y_ref[...] = acc

    @pl.when(i == 0)
    def _():
        stats_ref[...] = jnp.zeros_like(stats_ref)

    # Mask rows that are only M-padding so global BN statistics stay exact.
    row = i * tile_m + jax.lax.broadcasted_iota(jnp.int32, (tile_m, 1), 0)
    acc_m = jnp.where(row < true_m, acc, 0.0)
    partial = jnp.concatenate(
        [jnp.sum(acc_m, axis=0, keepdims=True),
         jnp.sum(acc_m * acc_m, axis=0, keepdims=True)],
        axis=0,
    )
    stats_ref[...] = stats_ref[...] + partial


# ---------------------------------------------------------------------------
# Pass B: apply BatchNorm (from global stats) + PReLU  /  + residual add
# ---------------------------------------------------------------------------
def _bn_scale_shift(stats, g, beta, true_m):
    inv_m = 1.0 / true_m
    mean = stats[0:1, :] * inv_m
    var = jnp.maximum(stats[1:2, :] * inv_m - mean * mean, 0.0)
    scale = g * jax.lax.rsqrt(var + EPS)
    shift = beta - mean * scale
    return scale, shift


def _bn_prelu_kernel(y_ref, stats_ref, g_ref, beta_ref, a_ref, o_ref, *, true_m):
    scale, shift = _bn_scale_shift(stats_ref[...], g_ref[...], beta_ref[...], true_m)
    y = y_ref[...] * scale + shift
    a = a_ref[0]                       # shared PReLU slope (SMEM scalar)
    o_ref[...] = jnp.where(y > 0.0, y, a * y)


def _bn_residual_kernel(y_ref, stats_ref, g_ref, beta_ref, res_ref, o_ref, *, true_m):
    scale, shift = _bn_scale_shift(stats_ref[...], g_ref[...], beta_ref[...], true_m)
    o_ref[...] = y_ref[...] * scale + shift + res_ref[...]


# ---------------------------------------------------------------------------
# pallas_call wrappers
# ---------------------------------------------------------------------------
def _conv_stats(patches, w, b, true_m, tile_m):
    mp, k = patches.shape
    cp = w.shape[1]
    grid = (mp // tile_m,)
    y, stats = pl.pallas_call(
        functools.partial(_conv_stats_kernel, true_m=true_m, tile_m=tile_m),
        grid=grid,
        in_specs=[
            pl.BlockSpec((tile_m, k), lambda i: (i, 0)),   # patch tile
            pl.BlockSpec((k, cp), lambda i: (0, 0)),       # folded-tap weights
            pl.BlockSpec((1, cp), lambda i: (0, 0)),       # conv bias
        ],
        out_specs=(
            pl.BlockSpec((tile_m, cp), lambda i: (i, 0)),  # pre-BN activations
            pl.BlockSpec((2, cp), lambda i: (0, 0)),       # resident stats accumulator
        ),
        out_shape=(
            jax.ShapeDtypeStruct((mp, cp), jnp.float32),
            jax.ShapeDtypeStruct((2, cp), jnp.float32),
        ),
        compiler_params=pltpu.CompilerParams(dimension_semantics=("arbitrary",)),
    )(patches, w, b)
    return y, stats


def _bn_prelu(y, stats, g, beta, a, true_m, tile_m):
    mp, cp = y.shape
    return pl.pallas_call(
        functools.partial(_bn_prelu_kernel, true_m=true_m),
        grid=(mp // tile_m,),
        in_specs=[
            pl.BlockSpec((tile_m, cp), lambda i: (i, 0)),
            pl.BlockSpec((2, cp), lambda i: (0, 0)),
            pl.BlockSpec((1, cp), lambda i: (0, 0)),
            pl.BlockSpec((1, cp), lambda i: (0, 0)),
            pl.BlockSpec(memory_space=pltpu.MemorySpace.SMEM),   # PReLU slope
        ],
        out_specs=pl.BlockSpec((tile_m, cp), lambda i: (i, 0)),
        out_shape=jax.ShapeDtypeStruct((mp, cp), jnp.float32),
        compiler_params=pltpu.CompilerParams(dimension_semantics=("parallel",)),
    )(y, stats, g, beta, a)


def _bn_residual(y, stats, g, beta, res, true_m, tile_m):
    mp, cp = y.shape
    return pl.pallas_call(
        functools.partial(_bn_residual_kernel, true_m=true_m),
        grid=(mp // tile_m,),
        in_specs=[
            pl.BlockSpec((tile_m, cp), lambda i: (i, 0)),
            pl.BlockSpec((2, cp), lambda i: (0, 0)),
            pl.BlockSpec((1, cp), lambda i: (0, 0)),
            pl.BlockSpec((1, cp), lambda i: (0, 0)),
            pl.BlockSpec((tile_m, cp), lambda i: (i, 0)),
        ],
        out_specs=pl.BlockSpec((tile_m, cp), lambda i: (i, 0)),
        out_shape=jax.ShapeDtypeStruct((mp, cp), jnp.float32),
        compiler_params=pltpu.CompilerParams(dimension_semantics=("parallel",)),
    )(y, stats, g, beta, res)


# ---------------------------------------------------------------------------
# Forward pass
# ---------------------------------------------------------------------------
def block_forward(x_nchw, params, *, tile_m=256):
    """Pallas implementation of Block.forward.  x_nchw: (N, C, H, W) float32.

    tile_m (rows of N*H*W per grid step) can be raised to 512-2048 on real shapes;
    256 keeps double-buffered tiles tiny (< 4 MiB) on every TPU generation.
    """
    N, C, H, W = x_nchw.shape
    Cp = _round_up(max(C, LANES), LANES)        # lane-dense channel padding
    M = N * H * W
    Mp = _round_up(M, tile_m)
    pad_m, pad_c = Mp - M, Cp - C

    x = jnp.transpose(x_nchw, (0, 2, 3, 1)).astype(jnp.float32)      # NCHW -> NHWC
    xc = jnp.pad(x, ((0, 0), (0, 0), (0, 0), (0, pad_c)))

    def pad_vec(v):                                   # (1, C) -> (1, Cp)
        return jnp.pad(v, ((0, 0), (0, pad_c))).astype(jnp.float32)

    def pad_w(w):                                     # (9, C, C) -> (9*Cp, Cp) bf16
        wp = jnp.pad(w, ((0, 0), (0, pad_c), (0, pad_c)))
        return wp.reshape(9 * Cp, Cp).astype(COMPUTE_DTYPE)

    w1, b1 = pad_w(params["w1"]), pad_vec(params["b1"])
    g1, beta1 = pad_vec(params["g1"]), pad_vec(params["beta1"])
    w2, b2 = pad_w(params["w2"]), pad_vec(params["b2"])
    g2, beta2 = pad_vec(params["g2"]), pad_vec(params["beta2"])
    a = params["a"].reshape(1).astype(jnp.float32)

    def im2col(img):  # (N, H, W, Cp) -> (Mp, 9*Cp) bf16, zero-padded rows
        xp = jnp.pad(img, ((0, 0), (1, 1), (1, 1), (0, 0)))
        taps = [xp[:, kh:kh + H, kw:kw + W, :].reshape(M, Cp)
                for kh in range(3) for kw in range(3)]
        p = jnp.stack(taps, axis=1).reshape(M, 9 * Cp).astype(COMPUTE_DTYPE)
        return jnp.pad(p, ((0, pad_m), (0, 0)))

    # conv1 -> bn1 -> prelu
    p1 = im2col(xc)
    y1, stats1 = _conv_stats(p1, w1, b1, M, tile_m)
    z1 = _bn_prelu(y1, stats1, g1, beta1, a, M, tile_m)

    # conv2 -> bn2 -> + residual
    p2 = im2col(z1[:M].reshape(N, H, W, Cp))
    y2, stats2 = _conv_stats(p2, w2, b2, M, tile_m)
    res = jnp.pad(xc.reshape(M, Cp), ((0, pad_m), (0, 0)))
    out = _bn_residual(y2, stats2, g2, beta2, res, M, tile_m)

    out = out[:M, :C].reshape(N, H, W, C)
    return jnp.transpose(out, (0, 3, 1, 2))            # NHWC -> NCHW


# ---------------------------------------------------------------------------
# Pure-JAX reference (same math / same bf16 operand rounding, no Pallas)
# ---------------------------------------------------------------------------
def _reference(x_nchw, params):
    N, C, H, W = x_nchw.shape
    M = N * H * W
    x = jnp.transpose(x_nchw, (0, 2, 3, 1)).astype(jnp.float32)

    def conv(img, w, b):
        xp = jnp.pad(img, ((0, 0), (1, 1), (1, 1), (0, 0)))
        taps = [xp[:, kh:kh + H, kw:kw + W, :].reshape(M, C)
                for kh in range(3) for kw in range(3)]
        p = jnp.stack(taps, axis=1).reshape(M, 9 * C).astype(COMPUTE_DTYPE)
        wr = w.reshape(9 * C, C).astype(COMPUTE_DTYPE)
        return jnp.dot(p, wr, preferred_element_type=jnp.float32) + b

    def bn(v, g, beta):
        mean = jnp.mean(v, axis=0, keepdims=True)
        var = jnp.mean((v - mean) ** 2, axis=0, keepdims=True)
        return (v - mean) * jax.lax.rsqrt(var + EPS) * g + beta

    o = conv(x, params["w1"], params["b1"])
    o = bn(o, params["g1"], params["beta1"])
    a = params["a"].reshape(())
    o = jnp.where(o > 0, o, a * o)
    o = conv(o.reshape(N, H, W, C), params["w2"], params["b2"])
    o = bn(o, params["g2"], params["beta2"])
    o = o + x.reshape(M, C)
    return jnp.transpose(o.reshape(N, H, W, C), (0, 3, 1, 2))


# ---------------------------------------------------------------------------
def init_params(key, channels):
    """Deterministic synthetic parameters (shapes mirror Conv2d / BatchNorm2d / PReLU).
    Conv weights are stored per-tap as (9, Cin, Cout); a torch weight (Cout,Cin,3,3)
    maps via w.permute(2,3,1,0).reshape(9, Cin, Cout)."""
    k1, k2, k3, k4 = jax.random.split(key, 4)
    w1 = jax.random.normal(k1, (9, channels, channels), jnp.float32) * 0.1
    b1 = jax.random.normal(k2, (1, channels), jnp.float32) * 0.05
    w2 = jax.random.normal(k3, (9, channels, channels), jnp.float32) * 0.1
    b2 = jax.random.normal(k4, (1, channels), jnp.float32) * 0.05
    return dict(
        w1=w1, b1=b1,
        g1=jnp.ones((1, channels), jnp.float32),
        beta1=jnp.zeros((1, channels), jnp.float32),
        a=jnp.full((1,), 0.25, jnp.float32),            # PReLU default init
        w2=w2, b2=b2,
        g2=jnp.ones((1, channels), jnp.float32),
        beta2=jnp.zeros((1, channels), jnp.float32),
    )


if __name__ == "__main__":
    N, C, H, W = 2, 8, 16, 16   # residual add requires in_channels == out_channels
    key = jax.random.PRNGKey(0)
    kx, kp = jax.random.split(key)
    x = jax.random.normal(kx, (N, C, H, W), jnp.float32)
    params = init_params(kp, C)

    out = jax.jit(block_forward)(x, params)   # M = 512 -> grid of 2 tiles of 256
    out = jax.block_until_ready(out)

    ref = _reference(x, params)
    assert out.shape == (N, C, H, W)
    max_err = float(jnp.max(jnp.abs(out - ref)))
    assert jnp.allclose(out, ref, atol=2e-2, rtol=2e-2), max_err

    print("KERNEL_OK")
</pallas_src>

<mosaic_0001>
module attributes {stable_mosaic.version = 11 : i64} {
  func.func @_conv_stats_kernel(%arg0: i32, %arg1: memref<256x1152xbf16, #tpu.memory_space<vmem>>, %arg2: memref<1152x128xbf16, #tpu.memory_space<vmem>>, %arg3: memref<1x128xf32, #tpu.memory_space<vmem>>, %arg4: memref<256x128xf32, #tpu.memory_space<vmem>>, %arg5: memref<2x128xf32, #tpu.memory_space<vmem>>) attributes {dimension_semantics = [#tpu.dimension_semantics<arbitrary>], iteration_bounds = array<i64: 2>, scalar_prefetch = 0 : i64, scratch_operands = 0 : i64, tpu.core_type = #tpu.core_type<tc>, window_params = [{transform_indices = @transform_0, window_bounds = array<i64: 256, 1152>}, {pipeline_mode = #tpu.pipeline_mode<synchronous>, transform_indices = @transform_1, window_bounds = array<i64: 1152, 128>}, {pipeline_mode = #tpu.pipeline_mode<synchronous>, transform_indices = @transform_2, window_bounds = array<i64: 1, 128>}, {transform_indices = @transform_3, window_bounds = array<i64: 256, 128>}, {pipeline_mode = #tpu.pipeline_mode<synchronous>, transform_indices = @transform_4, window_bounds = array<i64: 2, 128>}]} {
    %c0 = arith.constant 0 : index
    %c0_0 = arith.constant 0 : index
    %0 = vector.load %arg1[%c0, %c0_0] : memref<256x1152xbf16, #tpu.memory_space<vmem>>, vector<256x1152xbf16>
    %c0_1 = arith.constant 0 : index
    %c0_2 = arith.constant 0 : index
    %1 = vector.load %arg2[%c0_1, %c0_2] : memref<1152x128xbf16, #tpu.memory_space<vmem>>, vector<1152x128xbf16>
    %cst = arith.constant dense<0.000000e+00> : vector<256x128xf32>
    %2 = tpu.matmul %0, %1, %cst {dimension_numbers = #tpu.dot_dimension_numbers<[1], [0], [0], [1], [0, 0, 1, 1], [], []>} : vector<256x1152xbf16>, vector<1152x128xbf16>, vector<256x128xf32> -> vector<256x128xf32>
    %c0_3 = arith.constant 0 : index
    %c0_4 = arith.constant 0 : index
    %3 = vector.load %arg3[%c0_3, %c0_4] : memref<1x128xf32, #tpu.memory_space<vmem>>, vector<1x128xf32>
    %4 = vector.broadcast %3 : vector<1x128xf32> to vector<256x128xf32>
    %5 = arith.addf %2, %4 : vector<256x128xf32>
    %c0_5 = arith.constant 0 : index
    %c0_6 = arith.constant 0 : index
    %6 = vector.load %arg4[%c0_5, %c0_6] : memref<256x128xf32, #tpu.memory_space<vmem>>, vector<256x128xf32>
    tpu.vector_store %arg4[%c0_5, %c0_6], %5 {strides = array<i32>} : memref<256x128xf32, #tpu.memory_space<vmem>>, vector<256x128xf32>,
    %c0_i32 = arith.constant 0 : i32
    %7 = arith.cmpi eq, %arg0, %c0_i32 : i32
    %8 = arith.extui %7 : i1 to i32
    %c0_i32_7 = arith.constant 0 : i32
    %9 = arith.cmpi ne, %8, %c0_i32_7 : i32
    scf.if %9 {
      %cst_15 = arith.constant 0.000000e+00 : f32
      %29 = vector.broadcast %cst_15 : f32 to vector<2x128xf32>
      %c0_16 = arith.constant 0 : index
      %c0_17 = arith.constant 0 : index
      %30 = vector.load %arg5[%c0_16, %c0_17] : memref<2x128xf32, #tpu.memory_space<vmem>>, vector<2x128xf32>
      tpu.vector_store %arg5[%c0_16, %c0_17], %29 {strides = array<i32>} : memref<2x128xf32, #tpu.memory_space<vmem>>, vector<2x128xf32>,
    } else {
    }
    %c256_i32 = arith.constant 256 : i32
    %10 = arith.muli %arg0, %c256_i32 : i32
    %11 = tpu.iota {dimensions = array<i32: 0>} : vector<256x1xi32>
    %12 = vector.broadcast %10 : i32 to vector<256x1xi32>
    %13 = arith.addi %12, %11 : vector<256x1xi32>
    %c512_i32 = arith.constant 512 : i32
    %14 = vector.broadcast %c512_i32 : i32 to vector<256x1xi32>
    %15 = arith.cmpi slt, %13, %14 : vector<256x1xi32>
    %cst_8 = arith.constant 0.000000e+00 : f32
    %16 = vector.shape_cast %15 : vector<256x1xi1> to vector<256x1xi1>
    %17 = vector.broadcast %16 : vector<256x1xi1> to vector<256x128xi1>
    %18 = vector.broadcast %cst_8 : f32 to vector<256x128xf32>
    %19 = arith.select %17, %5, %18 : vector<256x128xi1>, vector<256x128xf32>
    %cst_9 = arith.constant dense<0.000000e+00> : vector<128xf32>
    %20 = vector.multi_reduction <add>, %19, %cst_9 [0] : vector<256x128xf32> to vector<128xf32>
    %21 = vector.shape_cast %20 : vector<128xf32> to vector<1x128xf32>
    %22 = arith.mulf %19, %19 : vector<256x128xf32>
    %cst_10 = arith.constant dense<0.000000e+00> : vector<128xf32>
    %23 = vector.multi_reduction <add>, %22, %cst_10 [0] : vector<256x128xf32> to vector<128xf32>
    %24 = vector.shape_cast %23 : vector<128xf32> to vector<1x128xf32>
    %25 = tpu.concatenate %21, %24 in 0 : vector<1x128xf32>, vector<1x128xf32> -> vector<2x128xf32>
    %c0_11 = arith.constant 0 : index
    %c0_12 = arith.constant 0 : index
    %26 = vector.load %arg5[%c0_11, %c0_12] : memref<2x128xf32, #tpu.memory_space<vmem>>, vector<2x128xf32>
    %27 = arith.addf %26, %25 : vector<2x128xf32>
    %c0_13 = arith.constant 0 : index
    %c0_14 = arith.constant 0 : index
    %28 = vector.load %arg5[%c0_13, %c0_14] : memref<2x128xf32, #tpu.memory_space<vmem>>, vector<2x128xf32>
    tpu.vector_store %arg5[%c0_13, %c0_14], %27 {strides = array<i32>} : memref<2x128xf32, #tpu.memory_space<vmem>>, vector<2x128xf32>,
    return
  }
  func.func @transform_0(%arg0: i32) -> (i32, i32) {
    %c0_i32 = arith.constant 0 : i32
    %c0_i32_0 = arith.constant 0 : i32
    return %arg0, %c0_i32 : i32, i32
  }
  func.func @transform_1(%arg0: i32) -> (i32, i32) {
    %c0_i32 = arith.constant 0 : i32
    %c0_i32_0 = arith.constant 0 : i32
    %c0_i32_1 = arith.constant 0 : i32
    return %c0_i32, %c0_i32_0 : i32, i32
  }
  func.func @transform_2(%arg0: i32) -> (i32, i32) {
    %c0_i32 = arith.constant 0 : i32
    %c0_i32_0 = arith.constant 0 : i32
    %c0_i32_1 = arith.constant 0 : i32
    return %c0_i32, %c0_i32_0 : i32, i32
  }
  func.func @transform_3(%arg0: i32) -> (i32, i32) {
    %c0_i32 = arith.constant 0 : i32
    %c0_i32_0 = arith.constant 0 : i32
    return %arg0, %c0_i32 : i32, i32
  }
  func.func @transform_4(%arg0: i32) -> (i32, i32) {
    %c0_i32 = arith.constant 0 : i32
    %c0_i32_0 = arith.constant 0 : i32
    %c0_i32_1 = arith.constant 0 : i32
    return %c0_i32, %c0_i32_0 : i32, i32
  }
}

module attributes {stable_mosaic.version = 11 : i64} {
  func.func @_bn_prelu_kernel(%arg0: i32, %arg1: memref<256x128xf32, #tpu.memory_space<vmem>>, %arg2: memref<2x128xf32, #tpu.memory_space<vmem>>, %arg3: memref<1x128xf32, #tpu.memory_space<vmem>>, %arg4: memref<1x128xf32, #tpu.memory_space<vmem>>, %arg5: memref<1xf32, #tpu.memory_space<smem>>, %arg6: memref<256x128xf32, #tpu.memory_space<vmem>>) attributes {dimension_semantics = [#tpu.dimension_semantics<parallel>], iteration_bounds = array<i64: 2>, scalar_prefetch = 0 : i64, scratch_operands = 0 : i64, tpu.core_type = #tpu.core_type<tc>, window_params = [{transform_indices = @transform_0, window_bounds = array<i64: 256, 128>}, {pipeline_mode = #tpu.pipeline_mode<synchronous>, transform_indices = @transform_1, window_bounds = array<i64: 2, 128>}, {pipeline_mode = #tpu.pipeline_mode<synchronous>, transform_indices = @transform_2, window_bounds = array<i64: 1, 128>}, {pipeline_mode = #tpu.pipeline_mode<synchronous>, transform_indices = @transform_3, window_bounds = array<i64: 1, 128>}, {transform_indices = @transform_4, window_bounds = array<i64: 1>}, {transform_indices = @transform_5, window_bounds = array<i64: 256, 128>}]} {
    %c0 = arith.constant 0 : index
    %c0_0 = arith.constant 0 : index
    %0 = vector.load %arg2[%c0, %c0_0] : memref<2x128xf32, #tpu.memory_space<vmem>>, vector<2x128xf32>
    %c0_1 = arith.constant 0 : index
    %c0_2 = arith.constant 0 : index
    %1 = vector.load %arg3[%c0_1, %c0_2] : memref<1x128xf32, #tpu.memory_space<vmem>>, vector<1x128xf32>
    %c0_3 = arith.constant 0 : index
    %c0_4 = arith.constant 0 : index
    %2 = vector.load %arg4[%c0_3, %c0_4] : memref<1x128xf32, #tpu.memory_space<vmem>>, vector<1x128xf32>
    %3 = vector.extract_strided_slice %0 {offsets = [0, 0], sizes = [1, 128], strides = [1, 1]} : vector<2x128xf32> to vector<1x128xf32>
    %cst = arith.constant 0.001953125 : f32
    %4 = vector.broadcast %cst : f32 to vector<1x128xf32>
    %5 = arith.mulf %3, %4 : vector<1x128xf32>
    %6 = vector.extract_strided_slice %0 {offsets = [1, 0], sizes = [1, 128], strides = [1, 1]} : vector<2x128xf32> to vector<1x128xf32>
    %cst_5 = arith.constant 0.001953125 : f32
    %7 = vector.broadcast %cst_5 : f32 to vector<1x128xf32>
    %8 = arith.mulf %6, %7 : vector<1x128xf32>
    %9 = arith.mulf %5, %5 : vector<1x128xf32>
    %10 = arith.subf %8, %9 : vector<1x128xf32>
    %cst_6 = arith.constant 0.000000e+00 : f32
    %11 = vector.broadcast %cst_6 : f32 to vector<1x128xf32>
    %12 = arith.maximumf %10, %11 : vector<1x128xf32>
    %cst_7 = arith.constant 9.99999974E-6 : f32
    %13 = vector.broadcast %cst_7 : f32 to vector<1x128xf32>
    %14 = arith.addf %12, %13 : vector<1x128xf32>
    %15 = math.rsqrt %14 : vector<1x128xf32>
    %16 = arith.mulf %1, %15 : vector<1x128xf32>
    %17 = arith.mulf %5, %16 : vector<1x128xf32>
    %18 = arith.subf %2, %17 : vector<1x128xf32>
    %c0_8 = arith.constant 0 : index
    %c0_9 = arith.constant 0 : index
    %19 = vector.load %arg1[%c0_8, %c0_9] : memref<256x128xf32, #tpu.memory_space<vmem>>, vector<256x128xf32>
    %20 = vector.broadcast %16 : vector<1x128xf32> to vector<256x128xf32>
    %21 = arith.mulf %19, %20 : vector<256x128xf32>
    %22 = vector.broadcast %18 : vector<1x128xf32> to vector<256x128xf32>
    %23 = arith.addf %21, %22 : vector<256x128xf32>
    %c0_10 = arith.constant 0 : index
    %24 = memref.load %arg5[%c0_10] : memref<1xf32, #tpu.memory_space<smem>>
    %cst_11 = arith.constant 0.000000e+00 : f32
    %25 = vector.broadcast %cst_11 : f32 to vector<256x128xf32>
    %26 = arith.cmpf ogt, %23, %25 : vector<256x128xf32>
    %27 = vector.broadcast %24 : f32 to vector<256x128xf32>
    %28 = arith.mulf %27, %23 : vector<256x128xf32>
    %29 = arith.select %26, %23, %28 : vector<256x128xi1>, vector<256x128xf32>
    %c0_12 = arith.constant 0 : index
    %c0_13 = arith.constant 0 : index
    %30 = vector.load %arg6[%c0_12, %c0_13] : memref<256x128xf32, #tpu.memory_space<vmem>>, vector<256x128xf32>
    tpu.vector_store %arg6[%c0_12, %c0_13], %29 {strides = array<i32>} : memref<256x128xf32, #tpu.memory_space<vmem>>, vector<256x128xf32>,
    return
  }
  func.func @transform_0(%arg0: i32) -> (i32, i32) {
    %c0_i32 = arith.constant 0 : i32
    %c0_i32_0 = arith.constant 0 : i32
    return %arg0, %c0_i32 : i32, i32
  }
  func.func @transform_1(%arg0: i32) -> (i32, i32) {
    %c0_i32 = arith.constant 0 : i32
    %c0_i32_0 = arith.constant 0 : i32
    %c0_i32_1 = arith.constant 0 : i32
    return %c0_i32, %c0_i32_0 : i32, i32
  }
  func.func @transform_2(%arg0: i32) -> (i32, i32) {
    %c0_i32 = arith.constant 0 : i32
    %c0_i32_0 = arith.constant 0 : i32
    %c0_i32_1 = arith.constant 0 : i32
    return %c0_i32, %c0_i32_0 : i32, i32
  }
  func.func @transform_3(%arg0: i32) -> (i32, i32) {
    %c0_i32 = arith.constant 0 : i32
    %c0_i32_0 = arith.constant 0 : i32
    %c0_i32_1 = arith.constant 0 : i32
    return %c0_i32, %c0_i32_0 : i32, i32
  }
  func.func @transform_4(%arg0: i32) -> i32 {
    %c0_i32 = arith.constant 0 : i32
    %c0_i32_0 = arith.constant 0 : i32
    return %c0_i32 : i32
  }
  func.func @transform_5(%arg0: i32) -> (i32, i32) {
    %c0_i32 = arith.constant 0 : i32
    %c0_i32_0 = arith.constant 0 : i32
    return %arg0, %c0_i32 : i32, i32
  }
}

module attributes {stable_mosaic.version = 11 : i64} {
  func.func @_bn_residual_kernel(%arg0: i32, %arg1: memref<256x128xf32, #tpu.memory_space<vmem>>, %arg2: memref<2x128xf32, #tpu.memory_space<vmem>>, %arg3: memref<1x128xf32, #tpu.memory_space<vmem>>, %arg4: memref<1x128xf32, #tpu.memory_space<vmem>>, %arg5: memref<256x128xf32, #tpu.memory_space<vmem>>, %arg6: memref<256x128xf32, #tpu.memory_space<vmem>>) attributes {dimension_semantics = [#tpu.dimension_semantics<parallel>], iteration_bounds = array<i64: 2>, scalar_prefetch = 0 : i64, scratch_operands = 0 : i64, tpu.core_type = #tpu.core_type<tc>, window_params = [{transform_indices = @transform_0, window_bounds = array<i64: 256, 128>}, {pipeline_mode = #tpu.pipeline_mode<synchronous>, transform_indices = @transform_1, window_bounds = array<i64: 2, 128>}, {pipeline_mode = #tpu.pipeline_mode<synchronous>, transform_indices = @transform_2, window_bounds = array<i64: 1, 128>}, {pipeline_mode = #tpu.pipeline_mode<synchronous>, transform_indices = @transform_3, window_bounds = array<i64: 1, 128>}, {transform_indices = @transform_4, window_bounds = array<i64: 256, 128>}, {transform_indices = @transform_5, window_bounds = array<i64: 256, 128>}]} {
    %c0 = arith.constant 0 : index
    %c0_0 = arith.constant 0 : index
    %0 = vector.load %arg2[%c0, %c0_0] : memref<2x128xf32, #tpu.memory_space<vmem>>, vector<2x128xf32>
    %c0_1 = arith.constant 0 : index
    %c0_2 = arith.constant 0 : index
    %1 = vector.load %arg3[%c0_1, %c0_2] : memref<1x128xf32, #tpu.memory_space<vmem>>, vector<1x128xf32>
    %c0_3 = arith.constant 0 : index
    %c0_4 = arith.constant 0 : index
    %2 = vector.load %arg4[%c0_3, %c0_4] : memref<1x128xf32, #tpu.memory_space<vmem>>, vector<1x128xf32>
    %3 = vector.extract_strided_slice %0 {offsets = [0, 0], sizes = [1, 128], strides = [1, 1]} : vector<2x128xf32> to vector<1x128xf32>
    %cst = arith.constant 0.001953125 : f32
    %4 = vector.broadcast %cst : f32 to vector<1x128xf32>
    %5 = arith.mulf %3, %4 : vector<1x128xf32>
    %6 = vector.extract_strided_slice %0 {offsets = [1, 0], sizes = [1, 128], strides = [1, 1]} : vector<2x128xf32> to vector<1x128xf32>
    %cst_5 = arith.constant 0.001953125 : f32
    %7 = vector.broadcast %cst_5 : f32 to vector<1x128xf32>
    %8 = arith.mulf %6, %7 : vector<1x128xf32>
    %9 = arith.mulf %5, %5 : vector<1x128xf32>
    %10 = arith.subf %8, %9 : vector<1x128xf32>
    %cst_6 = arith.constant 0.000000e+00 : f32
    %11 = vector.broadcast %cst_6 : f32 to vector<1x128xf32>
    %12 = arith.maximumf %10, %11 : vector<1x128xf32>
    %cst_7 = arith.constant 9.99999974E-6 : f32
    %13 = vector.broadcast %cst_7 : f32 to vector<1x128xf32>
    %14 = arith.addf %12, %13 : vector<1x128xf32>
    %15 = math.rsqrt %14 : vector<1x128xf32>
    %16 = arith.mulf %1, %15 : vector<1x128xf32>
    %17 = arith.mulf %5, %16 : vector<1x128xf32>
    %18 = arith.subf %2, %17 : vector<1x128xf32>
    %c0_8 = arith.constant 0 : index
    %c0_9 = arith.constant 0 : index
    %19 = vector.load %arg1[%c0_8, %c0_9] : memref<256x128xf32, #tpu.memory_space<vmem>>, vector<256x128xf32>
    %20 = vector.broadcast %16 : vector<1x128xf32> to vector<256x128xf32>
    %21 = arith.mulf %19, %20 : vector<256x128xf32>
    %22 = vector.broadcast %18 : vector<1x128xf32> to vector<256x128xf32>
    %23 = arith.addf %21, %22 : vector<256x128xf32>
    %c0_10 = arith.constant 0 : index
    %c0_11 = arith.constant 0 : index
    %24 = vector.load %arg5[%c0_10, %c0_11] : memref<256x128xf32, #tpu.memory_space<vmem>>, vector<256x128xf32>
    %25 = arith.addf %23, %24 : vector<256x128xf32>
    %c0_12 = arith.constant 0 : index
    %c0_13 = arith.constant 0 : index
    %26 = vector.load %arg6[%c0_12, %c0_13] : memref<256x128xf32, #tpu.memory_space<vmem>>, vector<256x128xf32>
    tpu.vector_store %arg6[%c0_12, %c0_13], %25 {strides = array<i32>} : memref<256x128xf32, #tpu.memory_space<vmem>>, vector<256x128xf32>,
    return
  }
  func.func @transform_0(%arg0: i32) -> (i32, i32) {
    %c0_i32 = arith.constant 0 : i32
    %c0_i32_0 = arith.constant 0 : i32
    return %arg0, %c0_i32 : i32, i32
  }
  func.func @transform_1(%arg0: i32) -> (i32, i32) {
    %c0_i32 = arith.constant 0 : i32
    %c0_i32_0 = arith.constant 0 : i32
    %c0_i32_1 = arith.constant 0 : i32
    return %c0_i32, %c0_i32_0 : i32, i32
  }
  func.func @transform_2(%arg0: i32) -> (i32, i32) {
    %c0_i32 = arith.constant 0 : i32
    %c0_i32_0 = arith.constant 0 : i32
    %c0_i32_1 = arith.constant 0 : i32
    return %c0_i32, %c0_i32_0 : i32, i32
  }
  func.func @transform_3(%arg0: i32) -> (i32, i32) {
    %c0_i32 = arith.constant 0 : i32
    %c0_i32_0 = arith.constant 0 : i32
    %c0_i32_1 = arith.constant 0 : i32
    return %c0_i32, %c0_i32_0 : i32, i32
  }
  func.func @transform_4(%arg0: i32) -> (i32, i32) {
    %c0_i32 = arith.constant 0 : i32
    %c0_i32_0 = arith.constant 0 : i32
    return %arg0, %c0_i32 : i32, i32
  }
  func.func @transform_5(%arg0: i32) -> (i32, i32) {
    %c0_i32 = arith.constant 0 : i32
    %c0_i32_0 = arith.constant 0 : i32
    return %arg0, %c0_i32 : i32, i32
  }
}

</mosaic_0001>

<bundles_post_ra>
// kernel: block_forward.5
= control target key start
LH: loop header
LB: loop body
LE: loop exit
PB: predicated region body
PF: predicated region fallthrough
CT: control target
= control target key end

     0   :  { %s619_s20 = smov 0   ;;  %s826_s0 = inlined_call_operand.vmem [shape: f32[512,128], index: 0, kind: input, shape index: {}]   ;;  %s827_s1 = inlined_call_operand.vmem [shape: f32[2,128], index: 1, kind: input, shape index: {}]   ;;  %s828_s2 = inlined_call_operand.vmem [shape: f32[1,128], index: 2, kind: input, shape index: {}]   ;;  %s829_s3 = inlined_call_operand.vmem [shape: f32[1,128], index: 3, kind: input, shape index: {}]   ;;  %s830_s4 = inlined_call_operand.<no memory space> [shape: f32[1], index: 4, kind: input, shape index: {}]   ;;  %s831_s5 = inlined_call_operand.vmem [shape: f32[512,128], index: 5, kind: output, shape index: {}]  }
   0x1   :  { %10 = sst [smem:[#allocation2]] %s830_s4 }
   0x2 LB: > { %s555_s21 = sadd.s32 4294967295, %s583_s20   ;;  %p559_p0 = scmp.ge.s32.totalorder %s583_s20, 1  ;;  %s583_s20 = sphi %s619_s20, %s16_s20  }
   0x3   : > { %p189_p1 = scmp.lt.s32.totalorder %s583_s20, 3 }
   0x5   : > { %p190_p2 = pnand %p559_p0, %p189_p1 }
   0x6   : > { %v229_v0 = vld [vmem:[%s827_s1] sm:$0x3] (!%p190_p2)  ;;  %v585_v7 = vmov (!%p190_p2), 1966171168   ;;  %v245_v9 = vlaneseq (!%p190_p2)  ;;  %s560_s4 = sshll.u32 (!%p190_p2), %s555_s21, 5  ;;  %s369_s25 = sld [smem:[#allocation2]] (!%p190_p2) }
   0x7   : > { %193 = sbr.rel (%p190_p2) target bundleno = 84 (0x54), region = 40  ;;  %v232_v1 = vmul.f32 (!%p190_p2), 0.001953125, %v229_v0  ;;  %v243_v8 = vunpack.c.l.s4 (!%p190_p2), %v585_v7  ;;  %p218_p3 = scmp.lt.s32.totalorder (!%p190_p2), %s560_s4, 63  ;;  %v230_v16 = vld [vmem:[%s828_s2] sm:$0x1] (!%p190_p2) }
   0x8   : > { %v246_v11 = vshrl.u32 (!%p190_p2), %v245_v9, 7  ;;  %v231_v19 = vld [vmem:[%s829_s3] sm:$0x1] (!%p190_p2) }
   0x9   : > { %v233_v2 = vmul.f32 (!%p190_p2), %v232_v1, %v232_v1  ;;  %v244_v10 = vunpack.c.0.s8 (!%p190_p2), %v243_v8 }
   0xa   : > { %v296_v18 = vsub.s32 (!%p190_p2), 0, %v246_v11 }
   0xb   : > { %v235_v3 = vrot.slane (!%p190_p2), %v233_v2, 7  ;;  %v247_v12 = vsub.s32 (!%p190_p2), %v244_v10, %v246_v11 }
   0xc   : > { %v656_v31 = vstv (!%p190_p2), %s369_s25 }
   0xd   : > { %v237_v4 = vsub.f32 (!%p190_p2), %v232_v1, %v235_v3 }
   0xe   : > { %s833_s4 = smov (!%p218_p3, %s560_s4), 63 }
   0xf   : > { %v238_v5 = vmax.f32 %v237_v4, 0.0  ;;  %s561_s24 = sshll.u32 %s833_s4, 3 }
  0x10   : > { %s638_s28 = scalar_lea.vmem %s826_s0, %s561_s24  ;;  %s695_s10 = scalar_lea.vmem %s831_s5, %s561_s24 }
  0x11   : > { %v239_v6 = vadd.f32 1e-05, %v238_v5  ;;  %v261_v21 = vld [vmem:[%s638_s28] sm:$0xff]  ;;  %v262_v22 = vld [vmem:[%s638_s28 + $0x8] sm:$0xff]  ;;  %v263_v23 = vld [vmem:[%s638_s28 + $0x10] sm:$0xff] }
  0x12   : > { %v264_v24 = vld [vmem:[%s638_s28 + $0x18] sm:$0xff]  ;;  %v265_v25 = vld [vmem:[%s638_s28 + $0x20] sm:$0xff]  ;;  %v266_v28 = vld [vmem:[%s638_s28 + $0x28] sm:$0xff] }
  0x13   : > { %575 = vrsqrt.f32 %v239_v6  ;;  %v267_v29 = vld [vmem:[%s638_s28 + $0x30] sm:$0xff]  ;;  %v268_v30 = vld [vmem:[%s638_s28 + $0x38] sm:$0xff]  ;;  %v269_v32 = vld [vmem:[%s638_s28 + $0x40] sm:$0xff] }
  0x14   : > { %v270_v33 = vld [vmem:[%s638_s28 + $0x48] sm:$0xff]  ;;  %v271_v34 = vld [vmem:[%s638_s28 + $0x50] sm:$0xff]  ;;  %v272_v39 = vld [vmem:[%s638_s28 + $0x58] sm:$0xff] }
  0x15   : > { %v273_v40 = vld [vmem:[%s638_s28 + $0x60] sm:$0xff]  ;;  %v274_v41 = vld [vmem:[%s638_s28 + $0x68] sm:$0xff] }
  0x1d   : > { %v576_v13 = vpop.eup %575 }
  0x1e   : > { %v248_v14 = vrot.slane %v576_v13, %v247_v12 }
  0x20   : > { %v249_v15 = vcombine.high %v248_v14, %v248_v14 }
  0x22   : > { %v256_v17 = vrot.slane %v249_v15, %v247_v12 }
  0x24   : > { %v258_v20 = vmul.f32 %v256_v17, %v230_v16 }
  0x26   : > { %v259_v26 = vmul.f32 %v258_v20, %v232_v1  ;;  %v651_v27 = vrot.slane %v258_v20, %v296_v18  ;;  %v275_v20 = vld [vmem:[%s638_s28 + $0x70] sm:$0xff] }
  0x28   : > { %v260_v35 = vsub.f32 %v231_v19, %v259_v26  ;;  %v299_v36 = vmul.f32 %v651_v27, %v261_v21  ;;  %v300_v37 = vmul.f32 %v651_v27, %v262_v22  ;;  %v301_v38 = vmul.f32 %v651_v27, %v263_v23  ;;  %v276_v23 = vld [vmem:[%s638_s28 + $0x78] sm:$0xff] }
  0x29   : > { %v302_v42 = vmul.f32 %v651_v27, %v264_v24  ;;  %v303_v43 = vmul.f32 %v651_v27, %v265_v25  ;;  %v304_v44 = vmul.f32 %v651_v27, %v266_v28  ;;  %v305_v45 = vmul.f32 %v651_v27, %v267_v29  ;;  %v277_v24 = vld [vmem:[%s638_s28 + $0x80] sm:$0xff]  ;;  %v278_v29 = vld [vmem:[%s638_s28 + $0x88] sm:$0xff] }
  0x2a   : > { %v671_v46 = vrot.slane %v260_v35, %v296_v18  ;;  %v306_v47 = vmul.f32 %v651_v27, %v268_v30  ;;  %v307_v48 = vmul.f32 %v651_v27, %v269_v32  ;;  %v308_v49 = vmul.f32 %v651_v27, %v270_v33  ;;  %v279_v35 = vld [vmem:[%s638_s28 + $0x90] sm:$0xff] }
  0x2b   : > { %v309_v50 = vmul.f32 %v651_v27, %v271_v34  ;;  %v310_v51 = vmul.f32 %v651_v27, %v272_v39  ;;  %v311_v52 = vmul.f32 %v651_v27, %v273_v40  ;;  %v680_v53 = vmul.f32 %v651_v27, %v274_v41 }
  0x2c   : > { %v337_v54 = vadd.f32 %v671_v46, %v299_v36  ;;  %v338_v55 = vadd.f32 %v671_v46, %v300_v37  ;;  %v339_v56 = vadd.f32 %v671_v46, %v301_v38  ;;  %v340_v57 = vadd.f32 %v671_v46, %v302_v42  ;;  %v280_v36 = vld [vmem:[%s638_s28 + $0x98] sm:$0xff] }
  0x2d   : > { %v341_v58 = vadd.f32 %v671_v46, %v303_v43  ;;  %v342_v59 = vadd.f32 %v671_v46, %v304_v44  ;;  %v343_v60 = vadd.f32 %v671_v46, %v305_v45  ;;  %v344_v61 = vadd.f32 %v671_v46, %v306_v47 }
  0x2e   : > { %vm370_vm0 = vcmp.gt.f32.partialorder %v337_v54, 0.0  ;;  %v403_v62 = vmul.f32 %v656_v31, %v337_v54  ;;  %vm371_vm1 = vcmp.gt.f32.partialorder %v338_v55, 0.0  ;;  %v404_v63 = vmul.f32 %v656_v31, %v338_v55 }
  0x2f   : > { %vm372_vm2 = vcmp.gt.f32.partialorder %v339_v56, 0.0  ;;  %v405_v0 = vmul.f32 %v656_v31, %v339_v56  ;;  %vm373_vm3 = vcmp.gt.f32.partialorder %v340_v57, 0.0  ;;  %v406_v1 = vmul.f32 %v656_v31, %v340_v57 }
  0x30   : > { %v435_v2 = vsel %vm370_vm0, %v337_v54, %v403_v62  ;;  %v436_v3 = vsel %vm371_vm1, %v338_v55, %v404_v63  ;;  %vm374_vm4 = vcmp.gt.f32.partialorder %v341_v58, 0.0  ;;  %v407_v4 = vmul.f32 %v656_v31, %v341_v58  ;;  %v282_v55 = vld [vmem:[%s638_s28 + $0xa8] sm:$0xff] }
  0x31   : > { %467 = vst [vmem:[%s695_s10] sm:$0xff] %v435_v2  ;;  %468 = vst [vmem:[%s695_s10 + $0x8] sm:$0xff] %v436_v3  ;;  %v437_v5 = vsel %vm372_vm2, %v339_v56, %v405_v0  ;;  %v438_v6 = vsel %vm373_vm3, %v340_v57, %v406_v1  ;;  %vm375_vm5 = vcmp.gt.f32.partialorder %v342_v59, 0.0  ;;  %v408_v7 = vmul.f32 %v656_v31, %v342_v59  ;;  %v284_v0 = vld [vmem:[%s638_s28 + $0xb8] sm:$0xff]  ;;  %v285_v1 = vld [vmem:[%s638_s28 + $0xc0] sm:$0xff] }
  0x32   : > { %469 = vst [vmem:[%s695_s10 + $0x10] sm:$0xff] %v437_v5  ;;  %470 = vst [vmem:[%s695_s10 + $0x18] sm:$0xff] %v438_v6  ;;  %v439_v8 = vsel %vm374_vm4, %v341_v58, %v407_v4  ;;  %vm376_vm6 = vcmp.gt.f32.partialorder %v343_v60, 0.0  ;;  %v409_v9 = vmul.f32 %v656_v31, %v343_v60  ;;  %vm377_vm7 = vcmp.gt.f32.partialorder %v344_v61, 0.0 }
  0x33   : > { %471 = vst [vmem:[%s695_s10 + $0x20] sm:$0xff] %v439_v8  ;;  %v440_v10 = vsel %vm375_vm5, %v342_v59, %v408_v7  ;;  %v410_v11 = vmul.f32 %v656_v31, %v344_v61  ;;  %v345_v12 = vadd.f32 %v671_v46, %v307_v48  ;;  %v346_v13 = vadd.f32 %v671_v46, %v308_v49  ;;  %v283_v59 = vld [vmem:[%s638_s28 + $0xb0] sm:$0xff] }
  0x34   : > { %472 = vst [vmem:[%s695_s10 + $0x28] sm:$0xff] %v440_v10  ;;  %v441_v14 = vsel %vm376_vm6, %v343_v60, %v409_v9  ;;  %v347_v15 = vadd.f32 %v671_v46, %v309_v50  ;;  %v348_v16 = vadd.f32 %v671_v46, %v310_v51  ;;  %v349_v17 = vadd.f32 %v671_v46, %v311_v52  ;;  %v281_v52 = vld [vmem:[%s638_s28 + $0xa0] sm:$0xff] }
  0x35   : > { %473 = vst [vmem:[%s695_s10 + $0x30] sm:$0xff] %v441_v14  ;;  %v442_v18 = vsel %vm377_vm7, %v344_v61, %v410_v11  ;;  %vm378_vm8 = vcmp.gt.f32.partialorder %v345_v12, 0.0  ;;  %v411_v19 = vmul.f32 %v656_v31, %v345_v12  ;;  %vm379_vm9 = vcmp.gt.f32.partialorder %v346_v13, 0.0 }
  0x36   : > { %474 = vst [vmem:[%s695_s10 + $0x38] sm:$0xff] %v442_v18  ;;  %v412_v21 = vmul.f32 %v656_v31, %v346_v13  ;;  %vm380_vm10 = vcmp.gt.f32.partialorder %v347_v15, 0.0  ;;  %v413_v22 = vmul.f32 %v656_v31, %v347_v15  ;;  %vm381_vm11 = vcmp.gt.f32.partialorder %v348_v16, 0.0 }
  0x37   : > { %v443_v25 = vsel %vm378_vm8, %v345_v12, %v411_v19  ;;  %v414_v26 = vmul.f32 %v656_v31, %v348_v16  ;;  %vm382_vm12 = vcmp.gt.f32.partialorder %v349_v17, 0.0  ;;  %v415_v28 = vmul.f32 %v656_v31, %v349_v17  ;;  %v286_v12 = vld [vmem:[%s638_s28 + $0xc8] sm:$0xff]  ;;  %v287_v19 = vld [vmem:[%s638_s28 + $0xd0] sm:$0xff] }
  0x38   : > { %475 = vst [vmem:[%s695_s10 + $0x40] sm:$0xff] %v443_v25  ;;  %v444_v30 = vsel %vm379_vm9, %v346_v13, %v412_v21  ;;  %v445_v32 = vsel %vm380_vm10, %v347_v15, %v413_v22  ;;  %v350_v33 = vadd.f32 %v671_v46, %v680_v53  ;;  %v313_v34 = vmul.f32 %v651_v27, %v275_v20  ;;  %v290_v25 = vld [vmem:[%s638_s28 + $0xe8] sm:$0xff] }
  0x39   : > { %476 = vst [vmem:[%s695_s10 + $0x48] sm:$0xff] %v444_v30  ;;  %477 = vst [vmem:[%s695_s10 + $0x50] sm:$0xff] %v445_v32  ;;  %v446_v37 = vsel %vm381_vm11, %v348_v16, %v414_v26  ;;  %v447_v38 = vsel %vm382_vm12, %v349_v17, %v415_v28  ;;  %v314_v39 = vmul.f32 %v651_v27, %v276_v23  ;;  %v288_v23 = vld [vmem:[%s638_s28 + $0xd8] sm:$0xff] }
  0x3a   : > { %v315_v40 = vmul.f32 %v651_v27, %v277_v24  ;;  %478 = vst [vmem:[%s695_s10 + $0x58] sm:$0xff] %v446_v37  ;;  %479 = vst [vmem:[%s695_s10 + $0x60] sm:$0xff] %v447_v38  ;;  %vm383_vm13 = vcmp.gt.f32.partialorder %v350_v33, 0.0  ;;  %v416_v41 = vmul.f32 %v656_v31, %v350_v33  ;;  %v351_v42 = vadd.f32 %v671_v46, %v313_v34  ;;  %v289_v24 = vld [vmem:[%s638_s28 + $0xe0] sm:$0xff]  ;;  %v291_v34 = vld [vmem:[%s638_s28 + $0xf0] sm:$0xff] }
  0x3b   : > { %v316_v43 = vmul.f32 %v651_v27, %v278_v29  ;;  %v352_v44 = vadd.f32 %v671_v46, %v314_v39  ;;  %v317_v47 = vmul.f32 %v651_v27, %v279_v35  ;;  %v318_v48 = vmul.f32 %v651_v27, %v280_v36  ;;  %v292_v39 = vld [vmem:[%s638_s28 + $0xf8] sm:$0xff] }
  0x3c   : > { %v353_v45 = vadd.f32 %v671_v46, %v315_v40  ;;  %v448_v49 = vsel %vm383_vm13, %v350_v33, %v416_v41  ;;  %vm384_vm14 = vcmp.gt.f32.partialorder %v351_v42, 0.0  ;;  %v417_v50 = vmul.f32 %v656_v31, %v351_v42 }
  0x3d   : > { %v354_v51 = vadd.f32 %v671_v46, %v316_v43  ;;  %480 = vst [vmem:[%s695_s10 + $0x68] sm:$0xff] %v448_v49  ;;  %vm385_vm15 = vcmp.gt.f32.partialorder %v352_v44, 0.0  ;;  %v418_v53 = vmul.f32 %v656_v31, %v352_v44  ;;  %v355_v58 = vadd.f32 %v671_v46, %v317_v47 }
  0x3e   : > { %vm386_vm0 = vcmp.gt.f32.partialorder %v353_v45, 0.0  ;;  %v419_v54 = vmul.f32 %v656_v31, %v353_v45  ;;  %v449_v56 = vsel %vm384_vm14, %v351_v42, %v417_v50  ;;  %v356_v62 = vadd.f32 %v671_v46, %v318_v48 }
  0x3f   : > { %vm387_vm1 = vcmp.gt.f32.partialorder %v354_v51, 0.0  ;;  %v420_v57 = vmul.f32 %v656_v31, %v354_v51  ;;  %481 = vst [vmem:[%s695_s10 + $0x70] sm:$0xff] %v449_v56  ;;  %v450_v60 = vsel %vm385_vm15, %v352_v44, %v418_v53  ;;  %v319_v63 = vmul.f32 %v651_v27, %v281_v52 }
  0x40   : > { %v451_v61 = vsel %vm386_vm0, %v353_v45, %v419_v54  ;;  %482 = vst [vmem:[%s695_s10 + $0x78] sm:$0xff] %v450_v60  ;;  %vm388_vm2 = vcmp.gt.f32.partialorder %v355_v58, 0.0  ;;  %v421_v3 = vmul.f32 %v656_v31, %v355_v58  ;;  %v320_v4 = vmul.f32 %v651_v27, %v282_v55 }
  0x41   : > { %483 = vst [vmem:[%s695_s10 + $0x80] sm:$0xff] %v451_v61  ;;  %v452_v2 = vsel %vm387_vm1, %v354_v51, %v420_v57  ;;  %vm389_vm3 = vcmp.gt.f32.partialorder %v356_v62, 0.0  ;;  %v422_v5 = vmul.f32 %v656_v31, %v356_v62  ;;  %v357_v6 = vadd.f32 %v671_v46, %v319_v63 }
  0x42   : > { %484 = vst [vmem:[%s695_s10 + $0x88] sm:$0xff] %v452_v2  ;;  %v321_v7 = vmul.f32 %v651_v27, %v283_v59  ;;  %v453_v8 = vsel %vm388_vm2, %v355_v58, %v421_v3  ;;  %v358_v9 = vadd.f32 %v671_v46, %v320_v4  ;;  %v322_v10 = vmul.f32 %v651_v27, %v284_v0 }
  0x43   : > { %v323_v11 = vmul.f32 %v651_v27, %v285_v1  ;;  %485 = vst [vmem:[%s695_s10 + $0x90] sm:$0xff] %v453_v8  ;;  %v454_v13 = vsel %vm389_vm3, %v356_v62, %v422_v5  ;;  %vm390_vm4 = vcmp.gt.f32.partialorder %v357_v6, 0.0  ;;  %v423_v14 = vmul.f32 %v656_v31, %v357_v6 }
  0x44   : > { %v359_v15 = vadd.f32 %v671_v46, %v321_v7  ;;  %486 = vst [vmem:[%s695_s10 + $0x98] sm:$0xff] %v454_v13  ;;  %vm391_vm5 = vcmp.gt.f32.partialorder %v358_v9, 0.0  ;;  %v424_v16 = vmul.f32 %v656_v31, %v358_v9  ;;  %v360_v17 = vadd.f32 %v671_v46, %v322_v10 }
  0x45   : > { %v361_v18 = vadd.f32 %v671_v46, %v323_v11  ;;  %v455_v20 = vsel %vm390_vm4, %v357_v6, %v423_v14  ;;  %v324_v22 = vmul.f32 %v651_v27, %v286_v12  ;;  %v325_v33 = vmul.f32 %v651_v27, %v287_v19 }
  0x46   : > { %vm392_vm6 = vcmp.gt.f32.partialorder %v359_v15, 0.0  ;;  %v425_v21 = vmul.f32 %v656_v31, %v359_v15  ;;  %487 = vst [vmem:[%s695_s10 + $0xa0] sm:$0xff] %v455_v20  ;;  %v456_v26 = vsel %vm391_vm5, %v358_v9, %v424_v16  ;;  %vm393_vm7 = vcmp.gt.f32.partialorder %v360_v17, 0.0 }
  0x47   : > { %v426_v28 = vmul.f32 %v656_v31, %v360_v17  ;;  %vm394_vm8 = vcmp.gt.f32.partialorder %v361_v18, 0.0  ;;  %488 = vst [vmem:[%s695_s10 + $0xa8] sm:$0xff] %v456_v26  ;;  %v427_v30 = vmul.f32 %v656_v31, %v361_v18  ;;  %v362_v32 = vadd.f32 %v671_v46, %v324_v22 }
  0x48   : > { %v457_v29 = vsel %vm392_vm6, %v359_v15, %v425_v21  ;;  %v326_v36 = vmul.f32 %v651_v27, %v288_v23  ;;  %v327_v37 = vmul.f32 %v651_v27, %v289_v24  ;;  %v328_v38 = vmul.f32 %v651_v27, %v290_v25 }
  0x49   : > { %489 = vst [vmem:[%s695_s10 + $0xb0] sm:$0xff] %v457_v29  ;;  %v458_v35 = vsel %vm393_vm7, %v360_v17, %v426_v28  ;;  %v459_v40 = vsel %vm394_vm8, %v361_v18, %v427_v30  ;;  %vm395_vm9 = vcmp.gt.f32.partialorder %v362_v32, 0.0  ;;  %v428_v41 = vmul.f32 %v656_v31, %v362_v32 }
  0x4a   : > { %490 = vst [vmem:[%s695_s10 + $0xb8] sm:$0xff] %v458_v35  ;;  %v363_v42 = vadd.f32 %v671_v46, %v325_v33  ;;  %491 = vst [vmem:[%s695_s10 + $0xc0] sm:$0xff] %v459_v40  ;;  %v364_v43 = vadd.f32 %v671_v46, %v326_v36  ;;  %v365_v44 = vadd.f32 %v671_v46, %v327_v37 }
  0x4b   : > { %v366_v45 = vadd.f32 %v671_v46, %v328_v38  ;;  %v329_v47 = vmul.f32 %v651_v27, %v291_v34  ;;  %v460_v48 = vsel %vm395_vm9, %v362_v32, %v428_v41  ;;  %v330_v50 = vmul.f32 %v651_v27, %v292_v39 }
  0x4c   : > { %vm396_vm10 = vcmp.gt.f32.partialorder %v363_v42, 0.0  ;;  %v429_v49 = vmul.f32 %v656_v31, %v363_v42  ;;  %492 = vst [vmem:[%s695_s10 + $0xc8] sm:$0xff] %v460_v48  ;;  %vm397_vm11 = vcmp.gt.f32.partialorder %v364_v43, 0.0  ;;  %v430_v51 = vmul.f32 %v656_v31, %v364_v43 }
  0x4d   : > { %vm398_vm12 = vcmp.gt.f32.partialorder %v365_v44, 0.0  ;;  %v431_v52 = vmul.f32 %v656_v31, %v365_v44  ;;  %vm399_vm13 = vcmp.gt.f32.partialorder %v366_v45, 0.0  ;;  %v432_v54 = vmul.f32 %v656_v31, %v366_v45 }
  0x4e   : > { %v461_v53 = vsel %vm396_vm10, %v363_v42, %v429_v49  ;;  %v367_v55 = vadd.f32 %v671_v46, %v329_v47  ;;  %v462_v56 = vsel %vm397_vm11, %v364_v43, %v430_v51  ;;  %v368_v27 = vadd.f32 %v671_v46, %v330_v50 }
  0x4f   : > { %493 = vst [vmem:[%s695_s10 + $0xd0] sm:$0xff] %v461_v53  ;;  %v463_v57 = vsel %vm398_vm12, %v365_v44, %v431_v52  ;;  %494 = vst [vmem:[%s695_s10 + $0xd8] sm:$0xff] %v462_v56  ;;  %v464_v58 = vsel %vm399_vm13, %v366_v45, %v432_v54 }
  0x50   : > { %495 = vst [vmem:[%s695_s10 + $0xe0] sm:$0xff] %v463_v57  ;;  %vm400_vm14 = vcmp.gt.f32.partialorder %v367_v55, 0.0  ;;  %v433_v59 = vmul.f32 %v656_v31, %v367_v55  ;;  %496 = vst [vmem:[%s695_s10 + $0xe8] sm:$0xff] %v464_v58  ;;  %vm401_vm15 = vcmp.gt.f32.partialorder %v368_v27, 0.0  ;;  %v434_v60 = vmul.f32 %v656_v31, %v368_v27 }
  0x52   : > { %v465_v61 = vsel %vm400_vm14, %v367_v55, %v433_v59  ;;  %v466_v62 = vsel %vm401_vm15, %v368_v27, %v434_v60 }
  0x53   : > { %497 = vst [vmem:[%s695_s10 + $0xf0] sm:$0xff] %v465_v61  ;;  %498 = vst [vmem:[%s695_s10 + $0xf8] sm:$0xff] %v466_v62 }
  0x54 PF: > { %s16_s20 = sadd.s32 1, %s583_s20  }
  0x55   : > { %p13_p4 = scmp.ge.s32.totalorder %s16_s20, 4  }
  0x57   :  { %15 = sbr.rel (!%p13_p4) target bundleno = 2 (0x2), region = 70 }

// kernel: block_forward.7
= control target key start
LH: loop header
LB: loop body
LE: loop exit
PB: predicated region body
PF: predicated region fallthrough
CT: control target
= control target key end

     0   :  { %s617_s18 = smov 0   ;;  %s821_s0 = inlined_call_operand.vmem [shape: f32[512,128], index: 0, kind: input, shape index: {}]   ;;  %s822_s1 = inlined_call_operand.vmem [shape: f32[2,128], index: 1, kind: input, shape index: {}]   ;;  %s823_s2 = inlined_call_operand.vmem [shape: f32[1,128], index: 2, kind: input, shape index: {}]   ;;  %s824_s3 = inlined_call_operand.vmem [shape: f32[1,128], index: 3, kind: input, shape index: {}]   ;;  %s825_s4 = inlined_call_operand.vmem [shape: f32[512,128], index: 4, kind: input, shape index: {}]   ;;  %s826_s5 = inlined_call_operand.vmem [shape: f32[512,128], index: 5, kind: output, shape index: {}]  }
   0x1 LB: > { %s554_s19 = sadd.s32 4294967295, %s584_s18   ;;  %p558_p0 = scmp.ge.s32.totalorder %s584_s18, 1  ;;  %s584_s18 = sphi %s617_s18, %s15_s18  }
   0x2   : > { %p199_p1 = scmp.lt.s32.totalorder %s584_s18, 3 }
   0x4   : > { %p200_p2 = pnand %p558_p0, %p199_p1 }
   0x5   : > { %v250_v0 = vld [vmem:[%s822_s1] sm:$0x3] (!%p200_p2)  ;;  %v586_v7 = vmov (!%p200_p2), 1966171168   ;;  %v266_v9 = vlaneseq (!%p200_p2)  ;;  %s559_s22 = sshll.u32 (!%p200_p2), %s554_s19, 5 }
   0x6   : > { %203 = sbr.rel (%p200_p2) target bundleno = 70 (0x46), region = 40  ;;  %v253_v1 = vmul.f32 (!%p200_p2), 0.001953125, %v250_v0  ;;  %v264_v8 = vunpack.c.l.s4 (!%p200_p2), %v586_v7  ;;  %p233_p3 = scmp.lt.s32.totalorder (!%p200_p2), %s559_s22, 63  ;;  %v251_v16 = vld [vmem:[%s823_s2] sm:$0x1] (!%p200_p2) }
   0x7   : > { %v267_v11 = vshrl.u32 (!%p200_p2), %v266_v9, 7  ;;  %v252_v19 = vld [vmem:[%s824_s3] sm:$0x1] (!%p200_p2) }
   0x8   : > { %v254_v2 = vmul.f32 (!%p200_p2), %v253_v1, %v253_v1  ;;  %v265_v10 = vunpack.c.0.s8 (!%p200_p2), %v264_v8 }
   0x9   : > { %v317_v18 = vsub.s32 (!%p200_p2), 0, %v267_v11 }
   0xa   : > { %v256_v3 = vrot.slane (!%p200_p2), %v254_v2, 7  ;;  %v268_v12 = vsub.s32 (!%p200_p2), %v265_v10, %v267_v11 }
   0xc   : > { %v258_v4 = vsub.f32 (!%p200_p2), %v253_v1, %v256_v3 }
   0xd   : > { %s828_s22 = smov (!%p233_p3, %s559_s22), 63 }
   0xe   : > { %v259_v5 = vmax.f32 %v258_v4, 0.0  ;;  %s628_s23 = sshll.u32 %s828_s22, 3 }
   0xf   : > { %s634_s26 = scalar_lea.vmem %s821_s0, %s628_s23  ;;  %s656_s8 = scalar_lea.vmem %s825_s4, %s628_s23 }
  0x10   : > { %v260_v6 = vadd.f32 1e-05, %v259_v5  ;;  %v282_v21 = vld [vmem:[%s634_s26] sm:$0xff]  ;;  %v283_v22 = vld [vmem:[%s634_s26 + $0x8] sm:$0xff]  ;;  %v284_v23 = vld [vmem:[%s634_s26 + $0x10] sm:$0xff]  ;;  %s696_s11 = scalar_lea.vmem %s826_s5, %s628_s23 }
  0x11   : > { %v285_v24 = vld [vmem:[%s634_s26 + $0x18] sm:$0xff]  ;;  %v286_v25 = vld [vmem:[%s634_s26 + $0x20] sm:$0xff]  ;;  %v287_v28 = vld [vmem:[%s634_s26 + $0x28] sm:$0xff] }
  0x12   : > { %576 = vrsqrt.f32 %v260_v6  ;;  %v288_v29 = vld [vmem:[%s634_s26 + $0x30] sm:$0xff]  ;;  %v289_v30 = vld [vmem:[%s634_s26 + $0x38] sm:$0xff]  ;;  %v290_v31 = vld [vmem:[%s634_s26 + $0x40] sm:$0xff] }
  0x13   : > { %v291_v32 = vld [vmem:[%s634_s26 + $0x48] sm:$0xff]  ;;  %v292_v33 = vld [vmem:[%s634_s26 + $0x50] sm:$0xff]  ;;  %v293_v38 = vld [vmem:[%s634_s26 + $0x58] sm:$0xff] }
  0x14   : > { %v294_v39 = vld [vmem:[%s634_s26 + $0x60] sm:$0xff]  ;;  %v295_v40 = vld [vmem:[%s634_s26 + $0x68] sm:$0xff]  ;;  %v392_v51 = vld [vmem:[%s656_s8 + $0x10] sm:$0xff] }
  0x15   : > { %v390_v46 = vld [vmem:[%s656_s8] sm:$0xff]  ;;  %v391_v47 = vld [vmem:[%s656_s8 + $0x8] sm:$0xff]  ;;  %v393_v52 = vld [vmem:[%s656_s8 + $0x18] sm:$0xff] }
  0x16   : > { %v394_v53 = vld [vmem:[%s656_s8 + $0x20] sm:$0xff]  ;;  %v395_v62 = vld [vmem:[%s656_s8 + $0x28] sm:$0xff]  ;;  %v396_v63 = vld [vmem:[%s656_s8 + $0x30] sm:$0xff] }
  0x17   : > { %v397_v0 = vld [vmem:[%s656_s8 + $0x38] sm:$0xff]  ;;  %v398_v5 = vld [vmem:[%s656_s8 + $0x40] sm:$0xff]  ;;  %v399_v10 = vld [vmem:[%s656_s8 + $0x48] sm:$0xff] }
  0x18   : > { %v296_v11 = vld [vmem:[%s634_s26 + $0x70] sm:$0xff] }
  0x1c   : > { %v577_v13 = vpop.eup %576 }
  0x1d   : > { %v269_v14 = vrot.slane %v577_v13, %v268_v12 }
  0x1f   : > { %v270_v15 = vcombine.high %v269_v14, %v269_v14 }
  0x21   : > { %v277_v17 = vrot.slane %v270_v15, %v268_v12  ;;  %v297_v12 = vld [vmem:[%s634_s26 + $0x78] sm:$0xff] }
  0x23   : > { %v279_v20 = vmul.f32 %v277_v17, %v251_v16  ;;  %v400_v17 = vld [vmem:[%s656_s8 + $0x50] sm:$0xff] }
  0x25   : > { %v280_v26 = vmul.f32 %v279_v20, %v253_v1  ;;  %v647_v27 = vrot.slane %v279_v20, %v317_v18 }
  0x27   : > { %v281_v34 = vsub.f32 %v252_v19, %v280_v26  ;;  %v320_v35 = vmul.f32 %v647_v27, %v282_v21  ;;  %v321_v36 = vmul.f32 %v647_v27, %v283_v22  ;;  %v322_v37 = vmul.f32 %v647_v27, %v284_v23  ;;  %v402_v19 = vld [vmem:[%s656_s8 + $0x60] sm:$0xff] }
  0x28   : > { %v323_v41 = vmul.f32 %v647_v27, %v285_v24  ;;  %v324_v42 = vmul.f32 %v647_v27, %v286_v25  ;;  %v325_v43 = vmul.f32 %v647_v27, %v287_v28  ;;  %v326_v44 = vmul.f32 %v647_v27, %v288_v29  ;;  %v403_v24 = vld [vmem:[%s656_s8 + $0x68] sm:$0xff]  ;;  %v404_v25 = vld [vmem:[%s656_s8 + $0x70] sm:$0xff]  ;;  %v298_v26 = vld [vmem:[%s634_s26 + $0x80] sm:$0xff] }
  0x29   : > { %v671_v45 = vrot.slane %v281_v34, %v317_v18  ;;  %v327_v48 = vmul.f32 %v647_v27, %v289_v30  ;;  %v328_v49 = vmul.f32 %v647_v27, %v290_v31  ;;  %v329_v50 = vmul.f32 %v647_v27, %v291_v32  ;;  %v401_v18 = vld [vmem:[%s656_s8 + $0x58] sm:$0xff]  ;;  %v299_v32 = vld [vmem:[%s634_s26 + $0x88] sm:$0xff] }
  0x2a   : > { %v330_v54 = vmul.f32 %v647_v27, %v292_v33  ;;  %v331_v55 = vmul.f32 %v647_v27, %v293_v38  ;;  %v332_v56 = vmul.f32 %v647_v27, %v294_v39  ;;  %v333_v57 = vmul.f32 %v647_v27, %v295_v40  ;;  %v300_v33 = vld [vmem:[%s634_s26 + $0x90] sm:$0xff]  ;;  %v301_v34 = vld [vmem:[%s634_s26 + $0x98] sm:$0xff]  ;;  %v302_v40 = vld [vmem:[%s634_s26 + $0xa0] sm:$0xff] }
  0x2b   : > { %v358_v58 = vadd.f32 %v671_v45, %v320_v35  ;;  %v359_v59 = vadd.f32 %v671_v45, %v321_v36  ;;  %v360_v60 = vadd.f32 %v671_v45, %v322_v37  ;;  %v361_v61 = vadd.f32 %v671_v45, %v323_v41  ;;  %v405_v39 = vld [vmem:[%s656_s8 + $0x78] sm:$0xff]  ;;  %v303_v41 = vld [vmem:[%s634_s26 + $0xa8] sm:$0xff] }
  0x2c   : > { %v362_v1 = vadd.f32 %v671_v45, %v324_v42  ;;  %v363_v2 = vadd.f32 %v671_v45, %v325_v43  ;;  %v364_v3 = vadd.f32 %v671_v45, %v326_v44  ;;  %v365_v4 = vadd.f32 %v671_v45, %v327_v48 }
  0x2d   : > { %v422_v6 = vadd.f32 %v390_v46, %v358_v58  ;;  %v423_v7 = vadd.f32 %v391_v47, %v359_v59  ;;  %v424_v8 = vadd.f32 %v392_v51, %v360_v60  ;;  %v425_v9 = vadd.f32 %v393_v52, %v361_v61  ;;  %v406_v47 = vld [vmem:[%s656_s8 + $0x80] sm:$0xff]  ;;  %v409_v58 = vld [vmem:[%s656_s8 + $0x98] sm:$0xff] }
  0x2e   : > { %v426_v13 = vadd.f32 %v394_v53, %v362_v1  ;;  %v427_v14 = vadd.f32 %v395_v62, %v363_v2  ;;  %v428_v15 = vadd.f32 %v396_v63, %v364_v3  ;;  %v429_v16 = vadd.f32 %v397_v0, %v365_v4  ;;  %v304_v53 = vld [vmem:[%s634_s26 + $0xb0] sm:$0xff]  ;;  %v410_v60 = vld [vmem:[%s656_s8 + $0xa0] sm:$0xff]  ;;  %v411_v2 = vld [vmem:[%s656_s8 + $0xa8] sm:$0xff] }
  0x2f   : > { %454 = vst [vmem:[%s696_s11] sm:$0xff] %v422_v6  ;;  %455 = vst [vmem:[%s696_s11 + $0x8] sm:$0xff] %v423_v7  ;;  %v366_v20 = vadd.f32 %v671_v45, %v328_v49  ;;  %v367_v21 = vadd.f32 %v671_v45, %v329_v50  ;;  %v368_v22 = vadd.f32 %v671_v45, %v330_v54  ;;  %v407_v50 = vld [vmem:[%s656_s8 + $0x88] sm:$0xff]  ;;  %v305_v54 = vld [vmem:[%s634_s26 + $0xb8] sm:$0xff] }
  0x30   : > { %456 = vst [vmem:[%s696_s11 + $0x10] sm:$0xff] %v424_v8  ;;  %457 = vst [vmem:[%s696_s11 + $0x18] sm:$0xff] %v425_v9  ;;  %v369_v23 = vadd.f32 %v671_v45, %v331_v55  ;;  %v370_v28 = vadd.f32 %v671_v45, %v332_v56  ;;  %v371_v29 = vadd.f32 %v671_v45, %v333_v57  ;;  %v408_v57 = vld [vmem:[%s656_s8 + $0x90] sm:$0xff]  ;;  %v306_v4 = vld [vmem:[%s634_s26 + $0xc0] sm:$0xff] }
  0x31   : > { %458 = vst [vmem:[%s696_s11 + $0x20] sm:$0xff] %v426_v13  ;;  %459 = vst [vmem:[%s696_s11 + $0x28] sm:$0xff] %v427_v14  ;;  %v334_v30 = vmul.f32 %v647_v27, %v296_v11  ;;  %v335_v31 = vmul.f32 %v647_v27, %v297_v12  ;;  %v430_v35 = vadd.f32 %v398_v5, %v366_v20  ;;  %v412_v3 = vld [vmem:[%s656_s8 + $0xb0] sm:$0xff]  ;;  %v307_v9 = vld [vmem:[%s634_s26 + $0xc8] sm:$0xff] }
  0x32   : > { %460 = vst [vmem:[%s696_s11 + $0x30] sm:$0xff] %v428_v15  ;;  %461 = vst [vmem:[%s696_s11 + $0x38] sm:$0xff] %v429_v16  ;;  %v431_v36 = vadd.f32 %v399_v10, %v367_v21  ;;  %v432_v37 = vadd.f32 %v400_v17, %v368_v22  ;;  %v433_v38 = vadd.f32 %v401_v18, %v369_v23  ;;  %v308_v10 = vld [vmem:[%s634_s26 + $0xd0] sm:$0xff]  ;;  %v309_v11 = vld [vmem:[%s634_s26 + $0xd8] sm:$0xff] }
  0x33   : > { %v434_v42 = vadd.f32 %v402_v19, %v370_v28  ;;  %v435_v43 = vadd.f32 %v403_v24, %v371_v29  ;;  %v372_v44 = vadd.f32 %v671_v45, %v334_v30  ;;  %v373_v46 = vadd.f32 %v671_v45, %v335_v31  ;;  %462 = vst [vmem:[%s696_s11 + $0x40] sm:$0xff] %v430_v35  ;;  %v413_v16 = vld [vmem:[%s656_s8 + $0xb8] sm:$0xff]  ;;  %v310_v17 = vld [vmem:[%s634_s26 + $0xe0] sm:$0xff]  ;;  %v311_v18 = vld [vmem:[%s634_s26 + $0xe8] sm:$0xff] }
  0x34   : > { %463 = vst [vmem:[%s696_s11 + $0x48] sm:$0xff] %v431_v36  ;;  %464 = vst [vmem:[%s696_s11 + $0x50] sm:$0xff] %v432_v37  ;;  %v336_v48 = vmul.f32 %v647_v27, %v298_v26  ;;  %v337_v49 = vmul.f32 %v647_v27, %v299_v32  ;;  %v338_v51 = vmul.f32 %v647_v27, %v300_v33  ;;  %v414_v24 = vld [vmem:[%s656_s8 + $0xc0] sm:$0xff]  ;;  %v312_v29 = vld [vmem:[%s634_s26 + $0xf0] sm:$0xff] }
  0x35   : > { %465 = vst [vmem:[%s696_s11 + $0x58] sm:$0xff] %v433_v38  ;;  %v339_v52 = vmul.f32 %v647_v27, %v301_v34  ;;  %466 = vst [vmem:[%s696_s11 + $0x60] sm:$0xff] %v434_v42  ;;  %v436_v55 = vadd.f32 %v404_v25, %v372_v44  ;;  %v437_v56 = vadd.f32 %v405_v39, %v373_v46  ;;  %v313_v30 = vld [vmem:[%s634_s26 + $0xf8] sm:$0xff]  ;;  %v415_v33 = vld [vmem:[%s656_s8 + $0xc8] sm:$0xff] }
  0x36   : > { %467 = vst [vmem:[%s696_s11 + $0x68] sm:$0xff] %v435_v43  ;;  %v340_v59 = vmul.f32 %v647_v27, %v302_v40  ;;  %v341_v61 = vmul.f32 %v647_v27, %v303_v41  ;;  %v374_v62 = vadd.f32 %v671_v45, %v336_v48  ;;  %v375_v63 = vadd.f32 %v671_v45, %v337_v49  ;;  %v416_v34 = vld [vmem:[%s656_s8 + $0xd0] sm:$0xff]  ;;  %v417_v35 = vld [vmem:[%s656_s8 + $0xd8] sm:$0xff]  ;;  %v418_v42 = vld [vmem:[%s656_s8 + $0xe0] sm:$0xff] }
  0x37   : > { %v376_v0 = vadd.f32 %v671_v45, %v338_v51  ;;  %v377_v1 = vadd.f32 %v671_v45, %v339_v52  ;;  %468 = vst [vmem:[%s696_s11 + $0x70] sm:$0xff] %v436_v55  ;;  %469 = vst [vmem:[%s696_s11 + $0x78] sm:$0xff] %v437_v56  ;;  %v342_v7 = vmul.f32 %v647_v27, %v304_v53  ;;  %v419_v43 = vld [vmem:[%s656_s8 + $0xe8] sm:$0xff]  ;;  %v420_v53 = vld [vmem:[%s656_s8 + $0xf0] sm:$0xff] }
  0x38   : > { %v378_v5 = vadd.f32 %v671_v45, %v340_v59  ;;  %v379_v6 = vadd.f32 %v671_v45, %v341_v61  ;;  %v343_v8 = vmul.f32 %v647_v27, %v305_v54  ;;  %v438_v12 = vadd.f32 %v406_v47, %v374_v62  ;;  %v421_v54 = vld [vmem:[%s656_s8 + $0xf8] sm:$0xff] }
  0x39   : > { %v439_v13 = vadd.f32 %v407_v50, %v375_v63  ;;  %v440_v14 = vadd.f32 %v408_v57, %v376_v0  ;;  %v441_v15 = vadd.f32 %v409_v58, %v377_v1  ;;  %v380_v21 = vadd.f32 %v671_v45, %v342_v7 }
  0x3a   : > { %v442_v19 = vadd.f32 %v410_v60, %v378_v5  ;;  %v443_v20 = vadd.f32 %v411_v2, %v379_v6  ;;  %v381_v22 = vadd.f32 %v671_v45, %v343_v8  ;;  %470 = vst [vmem:[%s696_s11 + $0x80] sm:$0xff] %v438_v12  ;;  %v344_v23 = vmul.f32 %v647_v27, %v306_v4 }
  0x3b   : > { %471 = vst [vmem:[%s696_s11 + $0x88] sm:$0xff] %v439_v13  ;;  %472 = vst [vmem:[%s696_s11 + $0x90] sm:$0xff] %v440_v14  ;;  %v345_v25 = vmul.f32 %v647_v27, %v307_v9  ;;  %v346_v26 = vmul.f32 %v647_v27, %v308_v10  ;;  %v347_v28 = vmul.f32 %v647_v27, %v309_v11 }
  0x3c   : > { %473 = vst [vmem:[%s696_s11 + $0x98] sm:$0xff] %v441_v15  ;;  %474 = vst [vmem:[%s696_s11 + $0xa0] sm:$0xff] %v442_v19  ;;  %v444_v31 = vadd.f32 %v412_v3, %v380_v21  ;;  %v445_v32 = vadd.f32 %v413_v16, %v381_v22  ;;  %v348_v36 = vmul.f32 %v647_v27, %v310_v17 }
  0x3d   : > { %475 = vst [vmem:[%s696_s11 + $0xa8] sm:$0xff] %v443_v20  ;;  %v349_v37 = vmul.f32 %v647_v27, %v311_v18  ;;  %v382_v38 = vadd.f32 %v671_v45, %v344_v23  ;;  %v383_v39 = vadd.f32 %v671_v45, %v345_v25  ;;  %v384_v40 = vadd.f32 %v671_v45, %v346_v26 }
  0x3e   : > { %v385_v41 = vadd.f32 %v671_v45, %v347_v28  ;;  %476 = vst [vmem:[%s696_s11 + $0xb0] sm:$0xff] %v444_v31  ;;  %477 = vst [vmem:[%s696_s11 + $0xb8] sm:$0xff] %v445_v32  ;;  %v386_v44 = vadd.f32 %v671_v45, %v348_v36  ;;  %v350_v47 = vmul.f32 %v647_v27, %v312_v29 }
  0x3f   : > { %v387_v46 = vadd.f32 %v671_v45, %v349_v37  ;;  %v351_v48 = vmul.f32 %v647_v27, %v313_v30  ;;  %v446_v49 = vadd.f32 %v414_v24, %v382_v38  ;;  %v447_v50 = vadd.f32 %v415_v33, %v383_v39 }
  0x40   : > { %v448_v51 = vadd.f32 %v416_v34, %v384_v40  ;;  %v449_v52 = vadd.f32 %v417_v35, %v385_v41  ;;  %v450_v55 = vadd.f32 %v418_v42, %v386_v44  ;;  %v388_v57 = vadd.f32 %v671_v45, %v350_v47 }
  0x41   : > { %v451_v56 = vadd.f32 %v419_v43, %v387_v46  ;;  %v389_v58 = vadd.f32 %v671_v45, %v351_v48  ;;  %478 = vst [vmem:[%s696_s11 + $0xc0] sm:$0xff] %v446_v49  ;;  %479 = vst [vmem:[%s696_s11 + $0xc8] sm:$0xff] %v447_v50 }
  0x42   : > { %480 = vst [vmem:[%s696_s11 + $0xd0] sm:$0xff] %v448_v51  ;;  %481 = vst [vmem:[%s696_s11 + $0xd8] sm:$0xff] %v449_v52  ;;  %v452_v27 = vadd.f32 %v420_v53, %v388_v57 }
  0x43   : > { %482 = vst [vmem:[%s696_s11 + $0xe0] sm:$0xff] %v450_v55  ;;  %483 = vst [vmem:[%s696_s11 + $0xe8] sm:$0xff] %v451_v56  ;;  %v453_v59 = vadd.f32 %v421_v54, %v389_v58 }
  0x44   : > { %484 = vst [vmem:[%s696_s11 + $0xf0] sm:$0xff] %v452_v27 }
  0x45   : > { %485 = vst [vmem:[%s696_s11 + $0xf8] sm:$0xff] %v453_v59 }
  0x46 PF: > { %s15_s18 = sadd.s32 1, %s584_s18  }
  0x47   : > { %p12_p4 = scmp.ge.s32.totalorder %s15_s18, 4  }
  0x49   :  { %14 = sbr.rel (!%p12_p4) target bundleno = 1 (0x1), region = 73 }

// kernel: block_forward.4
= control target key start
LH: loop header
LB: loop body
LE: loop exit
PB: predicated region body
PF: predicated region fallthrough
CT: control target
= control target key end

     0   :  { %s3982_s15 = smov 0   ;;  %s4982_s0 = inlined_call_operand.vmem [shape: bf16[512,1152], index: 0, kind: input, shape index: {}]   ;;  %s4983_s1 = inlined_call_operand.vmem [shape: bf16[1152,128], index: 1, kind: input, shape index: {}]   ;;  %s4984_s2 = inlined_call_operand.vmem [shape: f32[1,128], index: 2, kind: input, shape index: {}]   ;;  %s4985_s3 = inlined_call_operand.vmem [shape: f32[512,128], index: 3, kind: output, shape index: {0}]   ;;  %s4986_s4 = inlined_call_operand.vmem [shape: f32[2,128], index: 4, kind: output, shape index: {1}]  }
   0x1 LB: > { %s3988_s16 = sadd.s32 4294967295, %s3954_s15   ;;  %p2896_p0 = scmp.ge.s32.totalorder %s3954_s15, 1  ;;  %s3954_s15 = sphi %s3982_s15, %s15_s15  }
   0x2   : > { %p162_p1 = scmp.lt.s32.totalorder %s3954_s15, 3 }
   0x4   : > { %p163_p2 = pnand %p2896_p0, %p162_p1 }
   0x5   : > { %v3668_v0 = vld [vmem:[%s4983_s1 + $0x40] sm:$0xff] (!%p163_p2)   ;;  %s2897_s19 = sshll.u32 (!%p163_p2), %s3988_s16, 5  ;;  %v3670_v2 = vld [vmem:[%s4983_s1 + $0x48] sm:$0xff] (!%p163_p2)   ;;  %v3672_v4 = vld [vmem:[%s4983_s1 + $0x50] sm:$0xff] (!%p163_p2)   ;;  %p3118_p4 = scmp.ne.s32.totalorder (!%p163_p2), %s3988_s16, 0 }
   0x6   : > { %166 = sbr.rel (%p163_p2) target bundleno = 633 (0x279), region = 32  ;;  %v3669_v1 = vld [vmem:[%s4983_s1] sm:$0xff] (!%p163_p2)   ;;  %3122 = vmatprep.subr.bf16.mxu0 (!%p163_p2), %v3668_v0  ;;  %3642 = vmatprep.subr.bf16.mxu1 (!%p163_p2), %v3668_v0  ;;  %p190_p3 = scmp.lt.s32.totalorder (!%p163_p2), %s2897_s19, 63  ;;  %v3671_v3 = vld [vmem:[%s4983_s1 + $0x8] sm:$0xff] (!%p163_p2)   ;;  %v3673_v5 = vld [vmem:[%s4983_s1 + $0x10] sm:$0xff] (!%p163_p2)  }
   0x7   : > { %3123 = vmatpush3.bf16.msra.mxu0 (!%p163_p2), %v3669_v1  ;;  %3650 = vmatpush3.bf16.msra.mxu1 (!%p163_p2), %v3669_v1  ;;  %v3674_v6 = vld [vmem:[%s4983_s1 + $0x58] sm:$0xff] (!%p163_p2)   ;;  %v3676_v8 = vld [vmem:[%s4983_s1 + $0x60] sm:$0xff] (!%p163_p2)   ;;  %v3678_v10 = vld [vmem:[%s4983_s1 + $0x68] sm:$0xff] (!%p163_p2)  }
   0x8   : > { %3124 = vmatprep.subr.bf16.mxu0 (!%p163_p2), %v3670_v2  ;;  %3643 = vmatprep.subr.bf16.mxu1 (!%p163_p2), %v3670_v2  ;;  %v3675_v7 = vld [vmem:[%s4983_s1 + $0x18] sm:$0xff] (!%p163_p2)   ;;  %v3677_v9 = vld [vmem:[%s4983_s1 + $0x20] sm:$0xff] (!%p163_p2)   ;;  %v3679_v13 = vld [vmem:[%s4983_s1 + $0x28] sm:$0xff] (!%p163_p2)  }
   0x9   : > { %v3680_v14 = vld [vmem:[%s4983_s1 + $0x70] sm:$0xff] (!%p163_p2)   ;;  %v3682_v16 = vld [vmem:[%s4983_s1 + $0x78] sm:$0xff] (!%p163_p2)   ;;  %v3690_v18 = vld [vmem:[%s4983_s1 + $0xc0] sm:$0xff] (!%p163_p2)  }
   0xa   : > { %v3681_v15 = vld [vmem:[%s4983_s1 + $0x30] sm:$0xff] (!%p163_p2)   ;;  %v3683_v17 = vld [vmem:[%s4983_s1 + $0x38] sm:$0xff] (!%p163_p2)   ;;  %v3693_v21 = vld [vmem:[%s4983_s1 + $0x140] sm:$0xff] (!%p163_p2)  }
   0xb   : > { %3125 = vmatpush3.bf16.msra.mxu0 (!%p163_p2), %v3671_v3  ;;  %3651 = vmatpush3.bf16.msra.mxu1 (!%p163_p2), %v3671_v3  ;;  %v3691_v22 = vld [vmem:[%s4983_s1 + $0x80] sm:$0xff] (!%p163_p2)   ;;  %v3692_v23 = vld [vmem:[%s4983_s1 + $0xc8] sm:$0xff] (!%p163_p2)   ;;  %v3702_v31 = vld [vmem:[%s4983_s1 + $0xd0] sm:$0xff] (!%p163_p2)  }
   0xc   : > { %3126 = vmatprep.subr.bf16.mxu0 (!%p163_p2), %v3672_v4  ;;  %3644 = vmatprep.subr.bf16.mxu1 (!%p163_p2), %v3672_v4  ;;  %v3695_v24 = vld [vmem:[%s4983_s1 + $0x100] sm:$0xff] (!%p163_p2)   ;;  %v3694_v27 = vld [vmem:[%s4983_s1 + $0x88] sm:$0xff] (!%p163_p2)   ;;  %v3703_v32 = vld [vmem:[%s4983_s1 + $0x90] sm:$0xff] (!%p163_p2)  }
   0xd   : > { %s4988_s19 = smov (!%p190_p3, %s2897_s19), 63  ;;  %v3713_v28 = vld [vmem:[%s4983_s1 + $0x148] sm:$0xff]   ;;  %v3704_v34 = vld [vmem:[%s4983_s1 + $0xd8] sm:$0xff]   ;;  %v3712_v40 = vld [vmem:[%s4983_s1 + $0xe0] sm:$0xff]  }
   0xe   : > { %s3658_s6 = smul.u32 36, %s4988_s19  ;;  %v3715_v33 = vld [vmem:[%s4983_s1 + $0x108] sm:$0xff]   ;;  %v3705_v37 = vld [vmem:[%s4983_s1 + $0x98] sm:$0xff]   ;;  %v3714_v41 = vld [vmem:[%s4983_s1 + $0xa0] sm:$0xff]  }
   0xf   : > { %3127 = vmatpush3.bf16.msra.mxu0 %v3673_v5  ;;  %3652 = vmatpush3.bf16.msra.mxu1 %v3673_v5  ;;  %v3716_v42 = vld [vmem:[%s4983_s1 + $0xe8] sm:$0xff]   ;;  %v3727_v43 = vld [vmem:[%s4983_s1 + $0x150] sm:$0xff]   ;;  %v3726_v52 = vld [vmem:[%s4983_s1 + $0xf8] sm:$0xff]  }
  0x10   : > { %3128 = vmatprep.subr.bf16.mxu0 %v3674_v6  ;;  %3645 = vmatprep.subr.bf16.mxu1 %v3674_v6  ;;  %s4026_s13 = scalar_lea.vmem %s4982_s0, %s3658_s6  ;;  %v3729_v46 = vld [vmem:[%s4983_s1 + $0x110] sm:$0xff]   ;;  %v3717_v47 = vld [vmem:[%s4983_s1 + $0xa8] sm:$0xff]   ;;  %v3744_v55 = vld [vmem:[%s4983_s1 + $0x158] sm:$0xff]  }
  0x11   : > { %v3686_v11 = vld [vmem:[%s4026_s13 + $0x4] ss:$36 sps:$4 sm:$0xff]   ;;  %v3696_v25 = vld [vmem:[%s4026_s13 + $0x4c] ss:$36 sps:$4 sm:$0xff]   ;;  %v3706_v35 = vld [vmem:[%s4026_s13 + $0x94] ss:$36 sps:$4 sm:$0xff]  }
  0x12   : > { %v3689_v12 = vld [vmem:[%s4026_s13 + $0x364] ss:$36 sps:$4 sm:$0xff]   ;;  %1714 = vmatprep.mubr.bf16.mxu0 %v3686_v11  ;;  %v3698_v26 = vld [vmem:[%s4026_s13 + $0x3ac] ss:$36 sps:$4 sm:$0xff]   ;;  %v3708_v36 = vld [vmem:[%s4026_s13 + $0x3f4] ss:$36 sps:$4 sm:$0xff]  }
  0x13   : > { %3129 = vmatpush3.bf16.msra.mxu0 %v3675_v7  ;;  %3653 = vmatpush3.bf16.msra.mxu1 %v3675_v7  ;;  %v3684_v19 = vld [vmem:[%s4026_s13] ss:$36 sps:$4 sm:$0xff]   ;;  %v3700_v29 = vld [vmem:[%s4026_s13 + $0x48] ss:$36 sps:$4 sm:$0xff]   ;;  %v3710_v38 = vld [vmem:[%s4026_s13 + $0x90] ss:$36 sps:$4 sm:$0xff]  }
  0x14   : > { %3130 = vmatprep.subr.bf16.mxu0 %v3676_v8  ;;  %3646 = vmatprep.subr.bf16.mxu1 %v3676_v8  ;;  %v3687_v20 = vld [vmem:[%s4026_s13 + $0x360] ss:$36 sps:$4 sm:$0xff]   ;;  %v3701_v30 = vld [vmem:[%s4026_s13 + $0x3a8] ss:$36 sps:$4 sm:$0xff]   ;;  %v3711_v39 = vld [vmem:[%s4026_s13 + $0x3f0] ss:$36 sps:$4 sm:$0xff]  }
  0x15   : > { %1810 = vmatprep.mubr.bf16.mxu1 %v3689_v12  ;;  %v3718_v44 = vld [vmem:[%s4026_s13 + $0xdc] ss:$36 sps:$4 sm:$0xff]   ;;  %v3724_v48 = vld [vmem:[%s4983_s1 + $0xf0] sm:$0xff]   ;;  %v3730_v53 = vld [vmem:[%s4026_s13 + $0x124] ss:$36 sps:$4 sm:$0xff]  }
  0x16   : > { %v3720_v45 = vld [vmem:[%s4026_s13 + $0x43c] ss:$36 sps:$4 sm:$0xff]   ;;  %v3725_v51 = vld [vmem:[%s4983_s1 + $0xb0] sm:$0xff]   ;;  %v3732_v58 = vld [vmem:[%s4026_s13 + $0x8] ss:$36 sps:$4 sm:$0xff]  }
  0x17   : > { %3131 = vmatpush3.bf16.msra.mxu0 %v3677_v9  ;;  %3654 = vmatpush3.bf16.msra.mxu1 %v3677_v9  ;;  %v3722_v49 = vld [vmem:[%s4026_s13 + $0xd8] ss:$36 sps:$4 sm:$0xff]   ;;  %v3734_v54 = vld [vmem:[%s4026_s13 + $0xc] ss:$36 sps:$4 sm:$0xff]   ;;  %v3735_v59 = vld [vmem:[%s4026_s13 + $0x120] ss:$36 sps:$4 sm:$0xff]  }
  0x18   : > { %3132 = vmatprep.subr.bf16.mxu0 %v3678_v10  ;;  %3647 = vmatprep.subr.bf16.mxu1 %v3678_v10  ;;  %v3723_v50 = vld [vmem:[%s4026_s13 + $0x438] ss:$36 sps:$4 sm:$0xff]   ;;  %v3736_v60 = vld [vmem:[%s4983_s1 + $0x1c0] sm:$0xff]   ;;  %v3738_v62 = vld [vmem:[%s4026_s13 + $0x16c] ss:$36 sps:$4 sm:$0xff]  }
  0x19   : > { %v3745_v56 = vld [vmem:[%s4983_s1 + $0x118] sm:$0xff]   ;;  %v3737_v61 = vld [vmem:[%s4983_s1 + $0x180] sm:$0xff]   ;;  %v3752_v1 = vld [vmem:[%s4983_s1 + $0x1c8] sm:$0xff]  }
  0x1a   : > { %v3728_v57 = vld [vmem:[%s4983_s1 + $0xb8] sm:$0xff]   ;;  %v3754_v0 = vld [vmem:[%s4983_s1 + $0x160] sm:$0xff]   ;;  %v3753_v3 = vld [vmem:[%s4983_s1 + $0x188] sm:$0xff]  }
  0x1b   : > { %3133 = vmatpush3.bf16.msra.mxu0 %v3679_v13  ;;  %3655 = vmatpush3.bf16.msra.mxu1 %v3679_v13  ;;  %v3740_v63 = vld [vmem:[%s4026_s13 + $0x54] ss:$36 sps:$4 sm:$0xff]   ;;  %v3755_v2 = vld [vmem:[%s4983_s1 + $0x120] sm:$0xff]   ;;  %v3742_v4 = vld [vmem:[%s4026_s13 + $0x168] ss:$36 sps:$4 sm:$0xff]  }
  0x1c   : > { %3134 = vmatprep.subr.bf16.mxu0 %v3680_v14  ;;  %3648 = vmatprep.subr.bf16.mxu1 %v3680_v14  ;;  %v3743_v5 = vld [vmem:[%s4026_s13 + $0x50] ss:$36 sps:$4 sm:$0xff]   ;;  %v3748_v7 = vld [vmem:[%s4026_s13 + $0x9c] ss:$36 sps:$4 sm:$0xff]   ;;  %v3768_v8 = vld [vmem:[%s4983_s1 + $0x168] sm:$0xff]  }
  0x1d   : > { %v3746_v6 = vld [vmem:[%s4026_s13 + $0x1b4] ss:$36 sps:$4 sm:$0xff]   ;;  %v3770_v10 = vld [vmem:[%s4983_s1 + $0x128] sm:$0xff]   ;;  %v3756_v14 = vld [vmem:[%s4026_s13 + $0x1fc] ss:$36 sps:$4 sm:$0xff]  }
  0x1e   : > { %v3769_v9 = vld [vmem:[%s4983_s1 + $0x1d0] sm:$0xff]   ;;  %v3751_v13 = vld [vmem:[%s4026_s13 + $0x98] ss:$36 sps:$4 sm:$0xff]  }
  0x1f   : > { %3135 = vmatpush3.bf16.msra.mxu0 %v3681_v15  ;;  %3656 = vmatpush3.bf16.msra.mxu1 %v3681_v15  ;;  %v3771_v11 = vld [vmem:[%s4983_s1 + $0x190] sm:$0xff]  }
  0x20   : > { %3136 = vmatprep.subr.bf16.mxu0 %v3682_v16  ;;  %3649 = vmatprep.subr.bf16.mxu1 %v3682_v16  ;;  %v3750_v12 = vld [vmem:[%s4026_s13 + $0x1b0] ss:$36 sps:$4 sm:$0xff]  }
  0x21   : > { %v3778_v15 = vld [vmem:[%s4983_s1 + $0x170] sm:$0xff]  }
  0x22   : > { %v3779_v16 = vld [vmem:[%s4983_s1 + $0x130] sm:$0xff]  }
  0x23   : > { %3137 = vmatpush3.bf16.msra.mxu0 %v3683_v17  ;;  %3657 = vmatpush3.bf16.msra.mxu1 %v3683_v17  ;;  %v3758_v17 = vld [vmem:[%s4026_s13 + $0xe4] ss:$36 sps:$4 sm:$0xff]  }
  0x24   : > { %3234 = vmatprep.subr.bf16.mxu1 %v3690_v18  ;;  %3346 = vmatprep.subr.bf16.mxu0 %v3693_v21  ;;  %v3786_v18 = vld [vmem:[%s4983_s1 + $0x1d8] sm:$0xff]   ;;  %v3761_v21 = vld [vmem:[%s4026_s13 + $0xe0] ss:$36 sps:$4 sm:$0xff]  }
  0x26   : > { %1715 = vmatmul.mubr.bf16.vlgmr.msra.gmra.mrb[0].mxu0 %v3684_v19  ;;  %1811 = vmatmul.mubr.bf16.vlgmr.msra.gmra.mrb[0].mxu1 %v3687_v20  ;;  %v3787_v19 = vld [vmem:[%s4983_s1 + $0x198] sm:$0xff]  }
  0x27   : > { %3235 = vmatpush3.bf16.msra.mxu1 %v3691_v22  ;;  %3347 = vmatpush3.bf16.msra.mxu0 %v3695_v24  ;;  %v3760_v20 = vld [vmem:[%s4026_s13 + $0x1f8] ss:$36 sps:$4 sm:$0xff]   ;;  %v3762_v22 = vld [vmem:[%s4026_s13 + $0x244] ss:$36 sps:$4 sm:$0xff]  }
  0x28   : > { %3236 = vmatprep.subr.bf16.mxu1 %v3692_v23  ;;  %1722 = vmatprep.mubr.bf16.mxu0 %v3696_v25  ;;  %v3764_v23 = vld [vmem:[%s4026_s13 + $0x12c] ss:$36 sps:$4 sm:$0xff]   ;;  %v3794_v24 = vld [vmem:[%s4983_s1 + $0x178] sm:$0xff]  }
  0x29   : > { %1818 = vmatprep.mubr.bf16.mxu1 %v3698_v26  ;;  %3348 = vmatprep.subr.bf16.mxu0 %v3713_v28  ;;  %v3795_v25 = vld [vmem:[%s4983_s1 + $0x138] sm:$0xff]   ;;  %v3802_v26 = vld [vmem:[%s4983_s1 + $0x1e0] sm:$0xff]  }
  0x2a   : > { %v3803_v28 = vld [vmem:[%s4983_s1 + $0x1a0] sm:$0xff]  }
  0x2b   : > { %3237 = vmatpush3.bf16.msra.mxu1 %v3694_v27  ;;  %3349 = vmatpush3.bf16.msra.mxu0 %v3715_v33  ;;  %v3766_v27 = vld [vmem:[%s4026_s13 + $0x240] ss:$36 sps:$4 sm:$0xff]   ;;  %v3817_v33 = vld [vmem:[%s4983_s1 + $0x1e8] sm:$0xff]  }
  0x2c   : > { %3238 = vmatprep.subr.bf16.mxu1 %v3702_v31  ;;  %3350 = vmatprep.subr.bf16.mxu0 %v3727_v43  ;;  %v3772_v31 = vld [vmem:[%s4026_s13 + $0x28c] ss:$36 sps:$4 sm:$0xff]   ;;  %v3788_v43 = vld [vmem:[%s4026_s13 + $0x31c] ss:$36 sps:$4 sm:$0xff]  }
  0x2e   : > { %1723 = vmatmul.mubr.bf16.gmra.mrb[4].mxu0 %v3700_v29  ;;  %1819 = vmatmul.mubr.bf16.gmra.mrb[4].mxu1 %v3701_v30  ;;  %v3804_v29 = vld [vmem:[%s4983_s1 + $0x200] sm:$0xff]   ;;  %v3767_v30 = vld [vmem:[%s4026_s13 + $0x128] ss:$36 sps:$4 sm:$0xff]  }
  0x2f   : > { %3239 = vmatpush3.bf16.msra.mxu1 %v3703_v32  ;;  %1730 = vmatprep.mubr.bf16.mxu0 %v3706_v35  ;;  %v3774_v32 = vld [vmem:[%s4026_s13 + $0x174] ss:$36 sps:$4 sm:$0xff]   ;;  %v3818_v35 = vld [vmem:[%s4983_s1 + $0x1a8] sm:$0xff]  }
  0x30   : > { %3240 = vmatprep.subr.bf16.mxu1 %v3704_v34  ;;  %1826 = vmatprep.mubr.bf16.mxu1 %v3708_v36  ;;  %v3776_v34 = vld [vmem:[%s4026_s13 + $0x288] ss:$36 sps:$4 sm:$0xff]   ;;  %v3777_v36 = vld [vmem:[%s4026_s13 + $0x170] ss:$36 sps:$4 sm:$0xff]  }
  0x31   : > { %3351 = vmatpush3.bf16.msra.mxu0 %v3729_v46  ;;  %v3793_v46 = vld [vmem:[%s4026_s13 + $0x200] ss:$36 sps:$4 sm:$0xff]  }
  0x32   : > { %3352 = vmatprep.subr.bf16.mxu0 %v3744_v55  ;;  %v3819_v55 = vld [vmem:[%s4983_s1 + $0x208] sm:$0xff]  }
  0x33   : > { %3241 = vmatpush3.bf16.msra.mxu1 %v3705_v37  ;;  %v3780_v37 = vld [vmem:[%s4026_s13 + $0x2d4] ss:$36 sps:$4 sm:$0xff]  }
  0x34   : > { %3242 = vmatprep.subr.bf16.mxu1 %v3712_v40  ;;  %v3785_v40 = vld [vmem:[%s4026_s13 + $0x1b8] ss:$36 sps:$4 sm:$0xff]  }
  0x35   : > { %3353 = vmatpush3.bf16.msra.mxu0 %v3745_v56  ;;  %v3834_v56 = vld [vmem:[%s4983_s1 + $0x210] sm:$0xff]  }
  0x36   : > { %1731 = vmatmul.mubr.bf16.gmra.mrb[8].mxu0 %v3710_v38  ;;  %1827 = vmatmul.mubr.bf16.gmra.mrb[8].mxu1 %v3711_v39  ;;  %v3782_v38 = vld [vmem:[%s4026_s13 + $0x1bc] ss:$36 sps:$4 sm:$0xff]   ;;  %v3784_v39 = vld [vmem:[%s4026_s13 + $0x2d0] ss:$36 sps:$4 sm:$0xff]  }
  0x37   : > { %3243 = vmatpush3.bf16.msra.mxu1 %v3714_v41  ;;  %1738 = vmatprep.mubr.bf16.mxu0 %v3718_v44  ;;  %v3832_v41 = vld [vmem:[%s4983_s1 + $0x1f0] sm:$0xff]   ;;  %v3790_v44 = vld [vmem:[%s4026_s13 + $0x204] ss:$36 sps:$4 sm:$0xff]  }
  0x38   : > { %3244 = vmatprep.subr.bf16.mxu1 %v3716_v42  ;;  %1834 = vmatprep.mubr.bf16.mxu1 %v3720_v45  ;;  %v3833_v42 = vld [vmem:[%s4983_s1 + $0x1b0] sm:$0xff]   ;;  %v3792_v45 = vld [vmem:[%s4026_s13 + $0x318] ss:$36 sps:$4 sm:$0xff]  }
  0x39   : > { %3354 = vmatprep.subr.bf16.mxu0 %v3754_v0  ;;  %v3816_v0 = vld [vmem:[%s4026_s13 + $0xa0] ss:$36 sps:$4 sm:$0xff]  }
  0x3a   : > { %3355 = vmatpush3.bf16.msra.mxu0 %v3755_v2  ;;  %v3822_v2 = vld [vmem:[%s4026_s13 + $0xec] ss:$36 sps:$4 sm:$0xff]  }
  0x3b   : > { %3245 = vmatpush3.bf16.msra.mxu1 %v3717_v47  ;;  %3356 = vmatprep.subr.bf16.mxu0 %v3768_v8  ;;  %v3847_v47 = vld [vmem:[%s4983_s1 + $0x1f8] sm:$0xff]  }
  0x3c   : > { %3246 = vmatprep.subr.bf16.mxu1 %v3724_v48  ;;  %v3848_v48 = vld [vmem:[%s4983_s1 + $0x1b8] sm:$0xff]  }
  0x3d   : > { %v3828_v8 = vld [vmem:[%s4026_s13 + $0x134] ss:$36 sps:$4 sm:$0xff]  }
  0x3e   : > { %1739 = vmatmul.mubr.bf16.gmra.mrb[12].mxu0 %v3722_v49  ;;  %1835 = vmatmul.mubr.bf16.gmra.mrb[12].mxu1 %v3723_v50  ;;  %v3796_v49 = vld [vmem:[%s4026_s13 + $0x24c] ss:$36 sps:$4 sm:$0xff]   ;;  %v3800_v50 = vld [vmem:[%s4026_s13 + $0x14] ss:$36 sps:$4 sm:$0xff]  }
  0x3f   : > { %3247 = vmatpush3.bf16.msra.mxu1 %v3725_v51  ;;  %1746 = vmatprep.mubr.bf16.mxu0 %v3730_v53  ;;  %v3798_v51 = vld [vmem:[%s4026_s13 + $0x10] ss:$36 sps:$4 sm:$0xff]  }
  0x40   : > { %3248 = vmatprep.subr.bf16.mxu1 %v3726_v52  ;;  %1875 = vmatprep.mubr.bf16.mxu1 %v3734_v54  ;;  %v3801_v52 = vld [vmem:[%s4026_s13 + $0x248] ss:$36 sps:$4 sm:$0xff]   ;;  %v3805_v53 = vld [vmem:[%s4026_s13 + $0x294] ss:$36 sps:$4 sm:$0xff]   ;;  %v3807_v54 = vld [vmem:[%s4026_s13 + $0x5c] ss:$36 sps:$4 sm:$0xff]  }
  0x41   : > { %3357 = vmatpush3.bf16.msra.mxu0 %v3770_v10  ;;  %v3830_v10 = vld [vmem:[%s4026_s13 + $0x368] ss:$36 sps:$4 sm:$0xff]  }
  0x42   : > { %3358 = vmatprep.subr.bf16.mxu0 %v3778_v15  ;;  %v3840_v15 = vld [vmem:[%s4026_s13 + $0x178] ss:$36 sps:$4 sm:$0xff]  }
  0x43   : > { %3249 = vmatpush3.bf16.msra.mxu1 %v3728_v57  ;;  %v3809_v57 = vld [vmem:[%s4026_s13 + $0x290] ss:$36 sps:$4 sm:$0xff]  }
  0x44   : > { %3458 = vmatprep.subr.bf16.mxu1 %v3736_v60  ;;  %v3813_v60 = vld [vmem:[%s4026_s13 + $0xa4] ss:$36 sps:$4 sm:$0xff]  }
  0x45   : > { %3359 = vmatpush3.bf16.msra.mxu0 %v3779_v16  ;;  %v3841_v16 = vld [vmem:[%s4026_s13 + $0x3fc] ss:$36 sps:$4 sm:$0xff]  }
  0x46   : > { %1747 = vmatmul.mubr.bf16.gmra.mrb[16].mxu0 %v3735_v59  ;;  %1876 = vmatmul.mubr.bf16.vlgmr.msra.gmra.mrb[16].mxu1 %v3732_v58  ;;  %v3810_v58 = vld [vmem:[%s4026_s13 + $0x58] ss:$36 sps:$4 sm:$0xff]  }
  0x47   : > { %3459 = vmatpush3.bf16.msra.mxu1 %v3737_v61  ;;  %1754 = vmatprep.mubr.bf16.mxu0 %v3738_v62  ;;  %v3811_v59 = vld [vmem:[%s4026_s13 + $0x2dc] ss:$36 sps:$4 sm:$0xff]  }
  0x48   : > { %1883 = vmatprep.mubr.bf16.mxu1 %v3740_v63  ;;  %3460 = vmatprep.subr.bf16.mxu1 %v3752_v1  ;;  %v3849_v61 = vld [vmem:[%s4983_s1 + $0x218] sm:$0xff]   ;;  %v3862_v62 = vld [vmem:[%s4983_s1 + $0x220] sm:$0xff]  }
  0x49   : > { %3360 = vmatprep.subr.bf16.mxu0 %v3794_v24  ;;  %v3815_v63 = vld [vmem:[%s4026_s13 + $0x2d8] ss:$36 sps:$4 sm:$0xff]   ;;  %v3820_v1 = vld [vmem:[%s4026_s13 + $0x324] ss:$36 sps:$4 sm:$0xff]  }
  0x4a   : > { %3361 = vmatpush3.bf16.msra.mxu0 %v3795_v25  ;;  %v3856_v24 = vld [vmem:[%s4026_s13 + $0x254] ss:$36 sps:$4 sm:$0xff]   ;;  %v3860_v25 = vld [vmem:[%s4026_s13 + $0x1c] ss:$36 sps:$4 sm:$0xff]  }
  0x4b   : > { %3461 = vmatpush3.bf16.msra.mxu1 %v3753_v3  ;;  %3594 = vmatprep.subr.bf16.mxu0 %v3804_v29  ;;  %v3875_v3 = vld [vmem:[%s4983_s1 + $0x228] sm:$0xff]  }
  0x4c   : > { %3462 = vmatprep.subr.bf16.mxu1 %v3769_v9  ;;  %v3901_v9 = vld [vmem:[%s4983_s1 + $0x238] sm:$0xff]  }
  0x4e   : > { %1755 = vmatmul.mubr.bf16.gmra.mrb[20].mxu0 %v3742_v4  ;;  %1884 = vmatmul.mubr.bf16.gmra.mrb[20].mxu1 %v3743_v5  ;;  %v3824_v4 = vld [vmem:[%s4026_s13 + $0x320] ss:$36 sps:$4 sm:$0xff]   ;;  %v3825_v5 = vld [vmem:[%s4026_s13 + $0xe8] ss:$36 sps:$4 sm:$0xff]  }
  0x4f   : > { %1762 = vmatprep.mubr.bf16.mxu0 %v3746_v6  ;;  %1891 = vmatprep.mubr.bf16.mxu1 %v3748_v7  ;;  %v3888_v6 = vld [vmem:[%s4983_s1 + $0x230] sm:$0xff]  }
  0x50   : > { %3463 = vmatpush3.bf16.msra.mxu1 %v3771_v11  ;;  %v3826_v7 = vld [vmem:[%s4026_s13 + $0x36c] ss:$36 sps:$4 sm:$0xff]  }
  0x51   : > { %3464 = vmatprep.subr.bf16.mxu1 %v3786_v18  ;;  %v3831_v11 = vld [vmem:[%s4026_s13 + $0x130] ss:$36 sps:$4 sm:$0xff]   ;;  %v3845_v18 = vld [vmem:[%s4026_s13 + $0x3f8] ss:$36 sps:$4 sm:$0xff]  }
  0x54   : > { %3465 = vmatpush3.bf16.msra.mxu1 %v3787_v19  ;;  %v3846_v19 = vld [vmem:[%s4026_s13 + $0x1c0] ss:$36 sps:$4 sm:$0xff]  }
  0x55   : > { %3466 = vmatprep.subr.bf16.mxu1 %v3802_v26  ;;  %v3858_v26 = vld [vmem:[%s4026_s13 + $0x18] ss:$36 sps:$4 sm:$0xff]  }
  0x56   : > { %1763 = vmatmul.mubr.bf16.gmra.mrb[24].mxu0 %v3750_v12  ;;  %1892 = vmatmul.mubr.bf16.gmra.mrb[24].mxu1 %v3751_v13  ;;  %v3835_v12 = vld [vmem:[%s4026_s13 + $0x3b4] ss:$36 sps:$4 sm:$0xff]   ;;  %v3837_v13 = vld [vmem:[%s4026_s13 + $0x17c] ss:$36 sps:$4 sm:$0xff]  }
  0x57   : > { %1770 = vmatprep.mubr.bf16.mxu0 %v3756_v14  ;;  %1899 = vmatprep.mubr.bf16.mxu1 %v3758_v17  ;;  %v3839_v14 = vld [vmem:[%s4026_s13 + $0x3b0] ss:$36 sps:$4 sm:$0xff]   ;;  %v3843_v17 = vld [vmem:[%s4026_s13 + $0x1c4] ss:$36 sps:$4 sm:$0xff]  }
  0x58   : > { %3467 = vmatpush3.bf16.msra.mxu1 %v3803_v28  ;;  %v3863_v28 = vld [vmem:[%s4026_s13 + $0x29c] ss:$36 sps:$4 sm:$0xff]  }
  0x59   : > { %3468 = vmatprep.subr.bf16.mxu1 %v3817_v33  ;;  %v3871_v33 = vld [vmem:[%s4026_s13 + $0xac] ss:$36 sps:$4 sm:$0xff]  }
  0x5c   : > { %3469 = vmatpush3.bf16.msra.mxu1 %v3818_v35  ;;  %v3874_v35 = vld [vmem:[%s4026_s13 + $0xa8] ss:$36 sps:$4 sm:$0xff]  }
  0x5d   : > { %3470 = vmatprep.subr.bf16.mxu1 %v3832_v41  ;;  %v3884_v41 = vld [vmem:[%s4026_s13 + $0x13c] ss:$36 sps:$4 sm:$0xff]  }
  0x5e   : > { %1771 = vmatmul.mubr.bf16.gmra.mrb[28].mxu0 %v3760_v20  ;;  %1900 = vmatmul.mubr.bf16.gmra.mrb[28].mxu1 %v3761_v21  ;;  %v3850_v20 = vld [vmem:[%s4026_s13 + $0x444] ss:$36 sps:$4 sm:$0xff]   ;;  %v3852_v21 = vld [vmem:[%s4026_s13 + $0x20c] ss:$36 sps:$4 sm:$0xff]  }
  0x5f   : > { %1778 = vmatprep.mubr.bf16.mxu0 %v3762_v22  ;;  %1907 = vmatprep.mubr.bf16.mxu1 %v3764_v23  ;;  %v3854_v22 = vld [vmem:[%s4026_s13 + $0x440] ss:$36 sps:$4 sm:$0xff]   ;;  %v3855_v23 = vld [vmem:[%s4026_s13 + $0x208] ss:$36 sps:$4 sm:$0xff]  }
  0x60   : > { %3471 = vmatpush3.bf16.msra.mxu1 %v3833_v42  ;;  %v3886_v42 = vld [vmem:[%s4026_s13 + $0x370] ss:$36 sps:$4 sm:$0xff]  }
  0x61   : > { %3472 = vmatprep.subr.bf16.mxu1 %v3847_v47  ;;  %v3894_v47 = vld [vmem:[%s4026_s13 + $0x180] ss:$36 sps:$4 sm:$0xff]  }
  0x64   : > { %3473 = vmatpush3.bf16.msra.mxu1 %v3848_v48  ;;  %v3895_v48 = vld [vmem:[%s4026_s13 + $0x404] ss:$36 sps:$4 sm:$0xff]  }
  0x66   : > { %1779 = vmatmul.mubr.bf16.gmra.mrb[32].mxu0 %v3766_v27  ;;  %1908 = vmatmul.mubr.bf16.gmra.mrb[32].mxu1 %v3767_v30  ;;  %v3861_v27 = vld [vmem:[%s4026_s13 + $0x250] ss:$36 sps:$4 sm:$0xff]   ;;  %v3867_v30 = vld [vmem:[%s4026_s13 + $0x298] ss:$36 sps:$4 sm:$0xff]  }
  0x67   : > { %1786 = vmatprep.mubr.bf16.mxu0 %v3772_v31  ;;  %1915 = vmatprep.mubr.bf16.mxu1 %v3774_v32  ;;  %v3868_v31 = vld [vmem:[%s4026_s13 + $0x60] ss:$36 sps:$4 sm:$0xff]  }
  0x68   : > { %v3869_v32 = vld [vmem:[%s4026_s13 + $0x2e4] ss:$36 sps:$4 sm:$0xff]  }
  0x6e   : > { %1787 = vmatmul.mubr.bf16.gmra.mrb[36].mxu0 %v3776_v34  ;;  %1916 = vmatmul.mubr.bf16.gmra.mrb[36].mxu1 %v3777_v36  ;;  %v3873_v34 = vld [vmem:[%s4026_s13 + $0x2e0] ss:$36 sps:$4 sm:$0xff]   ;;  %v3876_v36 = vld [vmem:[%s4026_s13 + $0x32c] ss:$36 sps:$4 sm:$0xff]  }
  0x6f   : > { %1794 = vmatprep.mubr.bf16.mxu0 %v3780_v37  ;;  %1923 = vmatprep.mubr.bf16.mxu1 %v3782_v38  ;;  %v3878_v37 = vld [vmem:[%s4026_s13 + $0xf4] ss:$36 sps:$4 sm:$0xff]   ;;  %v3880_v38 = vld [vmem:[%s4026_s13 + $0x328] ss:$36 sps:$4 sm:$0xff]  }
  0x76   : > { %1795 = vmatmul.mubr.bf16.gmra.mrb[40].mxu0 %v3784_v39  ;;  %1924 = vmatmul.mubr.bf16.gmra.mrb[40].mxu1 %v3785_v40  ;;  %v3881_v39 = vld [vmem:[%s4026_s13 + $0xf0] ss:$36 sps:$4 sm:$0xff]  }
  0x77   : > { %1802 = vmatprep.mubr.bf16.mxu0 %v3788_v43  ;;  %1931 = vmatprep.mubr.bf16.mxu1 %v3790_v44  ;;  %v3882_v40 = vld [vmem:[%s4026_s13 + $0x374] ss:$36 sps:$4 sm:$0xff]   ;;  %v3889_v44 = vld [vmem:[%s4026_s13 + $0x3bc] ss:$36 sps:$4 sm:$0xff]  }
  0x78   : > { %v3887_v43 = vld [vmem:[%s4026_s13 + $0x138] ss:$36 sps:$4 sm:$0xff]  }
  0x7e   : > { %1803 = vmatmul.mubr.bf16.gmra.mrb[44].mxu0 %v3792_v45  ;;  %1932 = vmatmul.mubr.bf16.gmra.mrb[44].mxu1 %v3793_v46  ;;  %v3891_v45 = vld [vmem:[%s4026_s13 + $0x184] ss:$36 sps:$4 sm:$0xff]   ;;  %v3893_v46 = vld [vmem:[%s4026_s13 + $0x3b8] ss:$36 sps:$4 sm:$0xff]  }
  0x7f   : > { %1939 = vmatprep.mubr.bf16.mxu1 %v3796_v49  ;;  %2036 = vmatprep.mubr.bf16.mxu0 %v3800_v50  ;;  %v3897_v49 = vld [vmem:[%s4026_s13 + $0x1cc] ss:$36 sps:$4 sm:$0xff]   ;;  %v3899_v50 = vld [vmem:[%s4026_s13 + $0x400] ss:$36 sps:$4 sm:$0xff]  }
  0x86   : > { %1940 = vmatmul.mubr.bf16.gmra.mrb[48].mxu1 %v3801_v52  ;;  %2037 = vmatmul.mubr.bf16.vlgmr.msra.gmra.mrb[48].mxu0 %v3798_v51  ;;  %v3900_v51 = vld [vmem:[%s4026_s13 + $0x1c8] ss:$36 sps:$4 sm:$0xff]  }
  0x87   : > { %3595 = vmatpush3.bf16.msra.mxu0 %v3804_v29  ;;  %1947 = vmatprep.mubr.bf16.mxu1 %v3805_v53  ;;  %v3865_v29 = vld [vmem:[%s4026_s13 + $0x64] ss:$36 sps:$4 sm:$0xff]   ;;  %v3902_v52 = vld [vmem:[%s4026_s13 + $0x44c] ss:$36 sps:$4 sm:$0xff]   ;;  %v3904_v53 = vld [vmem:[%s4026_s13 + $0x214] ss:$36 sps:$4 sm:$0xff]  }
  0x88   : > { %2044 = vmatprep.mubr.bf16.mxu0 %v3807_v54  ;;  %3596 = vmatprep.subr.bf16.mxu0 %v3819_v55 }
  0x8b   : > { %3597 = vmatpush3.bf16.msra.mxu0 %v3819_v55 }
  0x8c   : > { %3598 = vmatprep.subr.bf16.mxu0 %v3834_v56 }
  0x8e   : > { %1948 = vmatmul.mubr.bf16.gmra.mrb[52].mxu1 %v3809_v57  ;;  %2045 = vmatmul.mubr.bf16.gmra.mrb[52].mxu0 %v3810_v58  ;;  %v3906_v58 = vld [vmem:[%s4026_s13 + $0x448] ss:$36 sps:$4 sm:$0xff]  }
  0x8f   : > { %1955 = vmatprep.mubr.bf16.mxu1 %v3811_v59  ;;  %2052 = vmatprep.mubr.bf16.mxu0 %v3813_v60  ;;  %v3907_v59 = vld [vmem:[%s4026_s13 + $0x210] ss:$36 sps:$4 sm:$0xff]  }
  0x90   : > { %3599 = vmatpush3.bf16.msra.mxu0 %v3834_v56 }
  0x91   : > { %3600 = vmatprep.subr.bf16.mxu0 %v3849_v61 }
  0x94   : > { %3601 = vmatpush3.bf16.msra.mxu0 %v3849_v61 }
  0x95   : > { %3602 = vmatprep.subr.bf16.mxu0 %v3862_v62 }
  0x96   : > { %1956 = vmatmul.mubr.bf16.gmra.mrb[56].mxu1 %v3815_v63  ;;  %2053 = vmatmul.mubr.bf16.gmra.mrb[56].mxu0 %v3816_v0  ;;  %v3908_v0 = vld [vmem:[%s4026_s13 + $0x25c] ss:$36 sps:$4 sm:$0xff]  }
  0x97   : > { %1963 = vmatprep.mubr.bf16.mxu1 %v3820_v1  ;;  %2060 = vmatprep.mubr.bf16.mxu0 %v3822_v2  ;;  %v3910_v1 = vld [vmem:[%s4026_s13 + $0x20] ss:$36 sps:$4 sm:$0xff]  }
  0x98   : > { %3603 = vmatpush3.bf16.msra.mxu0 %v3862_v62 }
  0x99   : > { %3604 = vmatprep.subr.bf16.mxu0 %v3875_v3 }
  0x9c   : > { %3605 = vmatpush3.bf16.msra.mxu0 %v3875_v3 }
  0x9d   : > { %3606 = vmatprep.subr.bf16.mxu0 %v3888_v6 }
  0x9e   : > { %1964 = vmatmul.mubr.bf16.gmra.mrb[60].mxu1 %v3824_v4  ;;  %2061 = vmatmul.mubr.bf16.gmra.mrb[60].mxu0 %v3825_v5 }
  0x9f   : > { %1971 = vmatprep.mubr.bf16.mxu1 %v3826_v7  ;;  %2068 = vmatprep.mubr.bf16.mxu0 %v3828_v8 }
  0xa0   : > { %3607 = vmatpush3.bf16.msra.mxu0 %v3888_v6 }
  0xa1   : > { %3608 = vmatprep.subr.bf16.mxu0 %v3901_v9 }
  0xa4   : > { %3609 = vmatpush3.bf16.msra.mxu0 %v3901_v9 }
  0xa6   : > { %1972 = vmatmul.mubr.bf16.gmra.mrb[64].mxu1 %v3830_v10  ;;  %2069 = vmatmul.mubr.bf16.gmra.mrb[64].mxu0 %v3831_v11  ;;  %v3911_v10 = vld [vmem:[%s4026_s13 + $0x258] ss:$36 sps:$4 sm:$0xff]   ;;  %v3912_v11 = vld [vmem:[%s4026_s13 + $0x68] ss:$36 sps:$4 sm:$0xff]  }
  0xa7   : > { %1979 = vmatprep.mubr.bf16.mxu1 %v3835_v12  ;;  %2076 = vmatprep.mubr.bf16.mxu0 %v3837_v13 }
  0xae   : > { %1980 = vmatmul.mubr.bf16.gmra.mrb[68].mxu1 %v3839_v14  ;;  %2077 = vmatmul.mubr.bf16.gmra.mrb[68].mxu0 %v3840_v15 }
  0xaf   : > { %1987 = vmatprep.mubr.bf16.mxu1 %v3841_v16  ;;  %2084 = vmatprep.mubr.bf16.mxu0 %v3843_v17  ;;  %v3913_v16 = vld [vmem:[%s4026_s13 + $0x2a4] ss:$36 sps:$4 sm:$0xff]   ;;  %v3915_v17 = vld [vmem:[%s4026_s13 + $0xb0] ss:$36 sps:$4 sm:$0xff]  }
  0xb6   : > { %1988 = vmatmul.mubr.bf16.gmra.mrb[72].mxu1 %v3845_v18  ;;  %2085 = vmatmul.mubr.bf16.gmra.mrb[72].mxu0 %v3846_v19 }
  0xb7   : > { %1995 = vmatprep.mubr.bf16.mxu1 %v3850_v20  ;;  %2092 = vmatprep.mubr.bf16.mxu0 %v3852_v21 }
  0xbe   : > { %1996 = vmatmul.mubr.bf16.gmra.mrb[76].mxu1 %v3854_v22  ;;  %2093 = vmatmul.mubr.bf16.gmra.mrb[76].mxu0 %v3855_v23 }
  0xbf   : > { %2100 = vmatprep.mubr.bf16.mxu0 %v3856_v24  ;;  %2197 = vmatprep.mubr.bf16.mxu1 %v3860_v25 }
  0xc6   : > { %2101 = vmatmul.mubr.bf16.gmra.mrb[80].mxu0 %v3861_v27  ;;  %2198 = vmatmul.mubr.bf16.vlgmr.msra.gmra.mrb[80].mxu1 %v3858_v26  ;;  %v3916_v26 = vld [vmem:[%s4026_s13 + $0x2a0] ss:$36 sps:$4 sm:$0xff]   ;;  %v3917_v27 = vld [vmem:[%s4026_s13 + $0xf8] ss:$36 sps:$4 sm:$0xff]  }
  0xc7   : > { %2108 = vmatprep.mubr.bf16.mxu0 %v3863_v28  ;;  %2205 = vmatprep.mubr.bf16.mxu1 %v3865_v29 }
  0xce   : > { %2109 = vmatmul.mubr.bf16.gmra.mrb[84].mxu0 %v3867_v30  ;;  %2206 = vmatmul.mubr.bf16.gmra.mrb[84].mxu1 %v3868_v31 }
  0xcf   : > { %2116 = vmatprep.mubr.bf16.mxu0 %v3869_v32  ;;  %2213 = vmatprep.mubr.bf16.mxu1 %v3871_v33  ;;  %v3918_v32 = vld [vmem:[%s4026_s13 + $0x2ec] ss:$36 sps:$4 sm:$0xff]   ;;  %v3920_v33 = vld [vmem:[%s4026_s13 + $0x140] ss:$36 sps:$4 sm:$0xff]  }
  0xd6   : > { %2117 = vmatmul.mubr.bf16.gmra.mrb[88].mxu0 %v3873_v34  ;;  %2214 = vmatmul.mubr.bf16.gmra.mrb[88].mxu1 %v3874_v35 }
  0xd7   : > { %2124 = vmatprep.mubr.bf16.mxu0 %v3876_v36  ;;  %2221 = vmatprep.mubr.bf16.mxu1 %v3878_v37 }
  0xde   : > { %2125 = vmatmul.mubr.bf16.gmra.mrb[92].mxu0 %v3880_v38  ;;  %2222 = vmatmul.mubr.bf16.gmra.mrb[92].mxu1 %v3881_v39 }
  0xdf   : > { %2132 = vmatprep.mubr.bf16.mxu0 %v3882_v40  ;;  %2229 = vmatprep.mubr.bf16.mxu1 %v3884_v41 }
  0xe6   : > { %2133 = vmatmul.mubr.bf16.gmra.mrb[96].mxu0 %v3886_v42  ;;  %2230 = vmatmul.mubr.bf16.gmra.mrb[96].mxu1 %v3887_v43  ;;  %v3921_v42 = vld [vmem:[%s4026_s13 + $0x2e8] ss:$36 sps:$4 sm:$0xff]  }
  0xe7   : > { %2140 = vmatprep.mubr.bf16.mxu0 %v3889_v44  ;;  %2237 = vmatprep.mubr.bf16.mxu1 %v3891_v45  ;;  %v3922_v43 = vld [vmem:[%s4026_s13 + $0x188] ss:$36 sps:$4 sm:$0xff]  }
  0xee   : > { %2141 = vmatmul.mubr.bf16.gmra.mrb[100].mxu0 %v3893_v46  ;;  %2238 = vmatmul.mubr.bf16.gmra.mrb[100].mxu1 %v3894_v47 }
  0xef   : > { %2148 = vmatprep.mubr.bf16.mxu0 %v3895_v48  ;;  %2245 = vmatprep.mubr.bf16.mxu1 %v3897_v49  ;;  %v3923_v48 = vld [vmem:[%s4026_s13 + $0x334] ss:$36 sps:$4 sm:$0xff]  }
  0xf0   : > { %v3925_v49 = vld [vmem:[%s4026_s13 + $0x1d0] ss:$36 sps:$4 sm:$0xff]  }
  0xf6   : > { %2149 = vmatmul.mubr.bf16.gmra.mrb[104].mxu0 %v3899_v50  ;;  %2246 = vmatmul.mubr.bf16.gmra.mrb[104].mxu1 %v3900_v51 }
  0xf7   : > { %2156 = vmatprep.mubr.bf16.mxu0 %v3902_v52  ;;  %2253 = vmatprep.mubr.bf16.mxu1 %v3904_v53 }
  0xf9   : > { %v3210_v54 = vpop.f32.mrb[0].mxu1  ;;  %v3138_v55 = vpop.f32.mrb[0].mxu0 }
  0xfa   : > { %v3211_v56 = vpop.f32.mrb[1].mxu1  ;;  %v3139_v57 = vpop.f32.mrb[1].mxu0 }
  0xfb   : > { %v4329_v60 = vadd.f32 %v3211_v56, %v3210_v54  ;;  %v3213_v61 = vpop.f32.mrb[2].mxu1  ;;  %v4331_v62 = vadd.f32 %v3139_v57, %v3138_v55  ;;  %v3141_v63 = vpop.f32.mrb[2].mxu0  ;;  %v4378_v54 = vld [vmem:[%s4984_s2] ss:$0 sm:$0xff] }
  0xfc   : > { %v3214_v2 = vpop.f32.mrb[3].mxu1  ;;  %v3142_v3 = vpop.f32.mrb[3].mxu0 }
  0xfd   : > { %v4335_v4 = vadd.f32 %v3214_v2, %v3213_v61  ;;  %v4337_v5 = vadd.f32 %v3142_v3, %v3141_v63  ;;  %v3927_v61 = vld [vmem:[%s4026_s13 + $0x218] ss:$36 sps:$4 sm:$0xff]   ;;  %v1717_v63 = vadd.f32 %v4331_v62, %v4378_v54 }
  0xfe   : > { %2157 = vmatmul.mubr.bf16.gmra.mrb[108].mxu0 %v3906_v58  ;;  %2254 = vmatmul.mubr.bf16.gmra.mrb[108].mxu1 %v3907_v59  ;;  %v3926_v59 = vld [vmem:[%s4026_s13 + $0x330] ss:$36 sps:$4 sm:$0xff]  }
  0xff   : > { %2261 = vmatprep.mubr.bf16.mxu1 %v3908_v0  ;;  %3610 = vmatprep.mubr.bf16.mxu0 %v3910_v1 }
 0x101   : > { %v3216_v6 = vpop.f32.mrb[4].mxu1  ;;  %v3144_v7 = vpop.f32.mrb[4].mxu0 }
 0x102   : > { %v3217_v8 = vpop.f32.mrb[5].mxu1  ;;  %v3145_v9 = vpop.f32.mrb[5].mxu0 }
 0x103   : > { %v4341_v12 = vadd.f32 %v3217_v8, %v3216_v6  ;;  %v3219_v13 = vpop.f32.mrb[6].mxu1  ;;  %v4343_v14 = vadd.f32 %v3145_v9, %v3144_v7  ;;  %v3147_v15 = vpop.f32.mrb[6].mxu0  ;;  %v3928_v6 = vld [vmem:[%s4026_s13 + $0x37c] ss:$36 sps:$4 sm:$0xff]  }
 0x104   : > { %v3220_v18 = vpop.f32.mrb[7].mxu1  ;;  %v3148_v19 = vpop.f32.mrb[7].mxu0  ;;  %v3930_v7 = vld [vmem:[%s4026_s13 + $0x260] ss:$36 sps:$4 sm:$0xff]  }
 0x105   : > { %v4347_v20 = vadd.f32 %v3220_v18, %v3219_v13  ;;  %v4349_v21 = vadd.f32 %v3148_v19, %v3147_v15 }
 0x106   : > { %2262 = vmatmul.mubr.bf16.gmra.mrb[112].mxu1 %v3911_v10  ;;  %3611 = vmatmul.mubr.bf16.vlgmr.msra.gmra.mrb[112].mxu0 %v3912_v11  ;;  %v1720_v10 = vadd.f32 %v4337_v5, %v4378_v54  ;;  %v1725_v5 = vadd.f32 %v4343_v14, %v4378_v54 }
 0x107   : > { %2269 = vmatprep.mubr.bf16.mxu1 %v3913_v16  ;;  %3614 = vmatprep.mubr.bf16.mxu0 %v3915_v17 }
 0x109   : > { %v3222_v22 = vpop.f32.mrb[8].mxu1  ;;  %v3150_v23 = vpop.f32.mrb[8].mxu0 }
 0x10a   : > { %v3223_v24 = vpop.f32.mrb[9].mxu1  ;;  %v3151_v25 = vpop.f32.mrb[9].mxu0 }
 0x10b   : > { %v4353_v28 = vadd.f32 %v3223_v24, %v3222_v22  ;;  %v3225_v29 = vpop.f32.mrb[10].mxu1  ;;  %v4355_v30 = vadd.f32 %v3151_v25, %v3150_v23  ;;  %v3153_v31 = vpop.f32.mrb[10].mxu0  ;;  %v3931_v22 = vld [vmem:[%s4026_s13 + $0x378] ss:$36 sps:$4 sm:$0xff]   ;;  %v3932_v23 = vld [vmem:[%s4026_s13 + $0x2a8] ss:$36 sps:$4 sm:$0xff]  }
 0x10c   : > { %v3226_v34 = vpop.f32.mrb[11].mxu1  ;;  %v3154_v35 = vpop.f32.mrb[11].mxu0 }
 0x10d   : > { %v4359_v36 = vadd.f32 %v3226_v34, %v3225_v29  ;;  %v4361_v37 = vadd.f32 %v3154_v35, %v3153_v31  ;;  %v3933_v29 = vld [vmem:[%s4026_s13 + $0x3c4] ss:$36 sps:$4 sm:$0xff]   ;;  %v3935_v31 = vld [vmem:[%s4026_s13 + $0x2f0] ss:$36 sps:$4 sm:$0xff]   ;;  %v1728_v34 = vadd.f32 %v4349_v21, %v4378_v54  ;;  %v1733_v21 = vadd.f32 %v4355_v30, %v4378_v54 }
 0x10e   : > { %2270 = vmatmul.mubr.bf16.gmra.mrb[116].mxu1 %v3916_v26  ;;  %3615 = vmatmul.mubr.bf16.gmra.mrb[116].mxu0 %v3917_v27 }
 0x10f   : > { %2277 = vmatprep.mubr.bf16.mxu1 %v3918_v32  ;;  %3618 = vmatprep.mubr.bf16.mxu0 %v3920_v33 }
 0x111   : > { %v3228_v38 = vpop.f32.mrb[12].mxu1  ;;  %v3156_v39 = vpop.f32.mrb[12].mxu0 }
 0x112   : > { %v3229_v40 = vpop.f32.mrb[13].mxu1  ;;  %v3157_v41 = vpop.f32.mrb[13].mxu0 }
 0x113   : > { %v4365_v44 = vadd.f32 %v3229_v40, %v3228_v38  ;;  %v3231_v45 = vpop.f32.mrb[14].mxu1  ;;  %v4367_v46 = vadd.f32 %v3157_v41, %v3156_v39  ;;  %v3159_v47 = vpop.f32.mrb[14].mxu0 }
 0x114   : > { %v3232_v50 = vpop.f32.mrb[15].mxu1  ;;  %v3160_v51 = vpop.f32.mrb[15].mxu0 }
 0x115   : > { %v4371_v52 = vadd.f32 %v3232_v50, %v3231_v45  ;;  %v4373_v53 = vadd.f32 %v3160_v51, %v3159_v47  ;;  %v3936_v45 = vld [vmem:[%s4026_s13 + $0x3c0] ss:$36 sps:$4 sm:$0xff]   ;;  %v3937_v47 = vld [vmem:[%s4026_s13 + $0x338] ss:$36 sps:$4 sm:$0xff]  }
 0x116   : > { %2278 = vmatmul.mubr.bf16.gmra.mrb[120].mxu1 %v3921_v42  ;;  %3619 = vmatmul.mubr.bf16.gmra.mrb[120].mxu0 %v3922_v43 }
 0x117   : > { %2285 = vmatprep.mubr.bf16.mxu1 %v3923_v48  ;;  %3622 = vmatprep.mubr.bf16.mxu0 %v3925_v49 }
 0x119   : > { %v3250_v55 = vpop.f32.mrb[16].mxu1  ;;  %v3162_v56 = vpop.f32.mrb[16].mxu0 }
 0x11a   : > { %v3251_v57 = vpop.f32.mrb[17].mxu1  ;;  %v3163_v58 = vpop.f32.mrb[17].mxu0 }
 0x11b   : > { %v3252_v0 = vadd.f32 %v3251_v57, %v3250_v55  ;;  %v3253_v1 = vpop.f32.mrb[18].mxu1  ;;  %v4384_v2 = vadd.f32 %v3163_v58, %v3162_v56  ;;  %v3165_v3 = vpop.f32.mrb[18].mxu0  ;;  %v3938_v55 = vld [vmem:[%s4026_s13 + $0x40c] ss:$36 sps:$4 sm:$0xff]   ;;  %v3940_v56 = vld [vmem:[%s4026_s13 + $0x380] ss:$36 sps:$4 sm:$0xff]  }
 0x11c   : > { %v3254_v8 = vpop.f32.mrb[19].mxu1  ;;  %v3166_v9 = vpop.f32.mrb[19].mxu0 }
 0x11d   : > { %v4390_v11 = vadd.f32 %v3252_v0, %v1717_v63  ;;  %v3255_v13 = vadd.f32 %v3254_v8, %v3253_v1  ;;  %v4392_v15 = vadd.f32 %v3166_v9, %v3165_v3  ;;  %v3941_v8 = vld [vmem:[%s4026_s13 + $0x408] ss:$36 sps:$4 sm:$0xff]  }
 0x11e   : > { %2286 = vmatmul.mubr.bf16.gmra.mrb[124].mxu1 %v3926_v59  ;;  %3623 = vmatmul.mubr.bf16.gmra.mrb[124].mxu0 %v3927_v61  ;;  %v1736_v59 = vadd.f32 %v4361_v37, %v4378_v54  ;;  %v3942_v9 = vld [vmem:[%s4026_s13 + $0x3c8] ss:$36 sps:$4 sm:$0xff]   ;;  %v1741_v37 = vadd.f32 %v4367_v46, %v4378_v54 }
 0x11f   : > { %v4394_v62 = vadd.f32 %v3255_v13, %v1720_v10  ;;  %2293 = vmatprep.mubr.bf16.mxu1 %v3928_v6  ;;  %3626 = vmatprep.mubr.bf16.mxu0 %v3930_v7 }
 0x121   : > { %v3256_v16 = vpop.f32.mrb[20].mxu1  ;;  %v3168_v17 = vpop.f32.mrb[20].mxu0 }
 0x122   : > { %v3257_v18 = vpop.f32.mrb[21].mxu1  ;;  %v3169_v19 = vpop.f32.mrb[21].mxu0 }
 0x123   : > { %v3258_v24 = vadd.f32 %v3257_v18, %v3256_v16  ;;  %v3259_v25 = vpop.f32.mrb[22].mxu1  ;;  %v4400_v26 = vadd.f32 %v3169_v19, %v3168_v17  ;;  %v3171_v27 = vpop.f32.mrb[22].mxu0  ;;  %v3943_v18 = vld [vmem:[%s4026_s13 + $0x454] ss:$36 sps:$4 sm:$0xff]  }
 0x124   : > { %v3260_v32 = vpop.f32.mrb[23].mxu1  ;;  %v3172_v33 = vpop.f32.mrb[23].mxu0  ;;  %v3945_v19 = vld [vmem:[%s4026_s13 + $0x410] ss:$36 sps:$4 sm:$0xff]  }
 0x125   : > { %v4406_v35 = vadd.f32 %v3258_v24, %v1725_v5  ;;  %v3261_v38 = vadd.f32 %v3260_v32, %v3259_v25  ;;  %v4408_v39 = vadd.f32 %v3172_v33, %v3171_v27  ;;  %v1744_v5 = vadd.f32 %v4373_v53, %v4378_v54 }
 0x126   : > { %2294 = vmatmul.mubr.bf16.gmra.mrb[128].mxu1 %v3931_v22  ;;  %3627 = vmatmul.mubr.bf16.gmra.mrb[128].mxu0 %v3932_v23  ;;  %v1749_v53 = vadd.f32 %v4384_v2, %v4378_v54 }
 0x127   : > { %v4410_v14 = vadd.f32 %v3261_v38, %v1728_v34  ;;  %2301 = vmatprep.mubr.bf16.mxu1 %v3933_v29  ;;  %3630 = vmatprep.mubr.bf16.mxu0 %v3935_v31  ;;  %v3946_v34 = vld [vmem:[%s4026_s13 + $0x450] ss:$36 sps:$4 sm:$0xff]   ;;  %v3947_v38 = vld [vmem:[%s4026_s13 + $0x458] ss:$36 sps:$4 sm:$0xff]   ;;  %s2900_s13 = sshll.u32 %s4988_s19, 3 }
 0x128   : > { %s4700_s11 = scalar_lea.vmem %s4985_s3, %s2900_s13 }
 0x129   : > { %v3262_v40 = vpop.f32.mrb[24].mxu1  ;;  %v3174_v41 = vpop.f32.mrb[24].mxu0 }
 0x12a   : > { %v3263_v42 = vpop.f32.mrb[25].mxu1  ;;  %v3175_v43 = vpop.f32.mrb[25].mxu0 }
 0x12b   : > { %v3264_v48 = vadd.f32 %v3263_v42, %v3262_v40  ;;  %v3265_v49 = vpop.f32.mrb[26].mxu1  ;;  %v4416_v50 = vadd.f32 %v3175_v43, %v3174_v41  ;;  %v3177_v51 = vpop.f32.mrb[26].mxu0 }
 0x12c   : > { %v3266_v57 = vpop.f32.mrb[27].mxu1  ;;  %v3178_v58 = vpop.f32.mrb[27].mxu0 }
 0x12d   : > { %v4422_v61 = vadd.f32 %v3264_v48, %v1733_v21  ;;  %v3267_v63 = vadd.f32 %v3266_v57, %v3265_v49  ;;  %v4424_v0 = vadd.f32 %v3178_v58, %v3177_v51  ;;  %v1752_v21 = vadd.f32 %v4392_v15, %v4378_v54 }
 0x12e   : > { %2302 = vmatmul.mubr.bf16.gmra.mrb[132].mxu1 %v3936_v45  ;;  %3631 = vmatmul.mubr.bf16.gmra.mrb[132].mxu0 %v3937_v47 }
 0x12f   : > { %v4426_v30 = vadd.f32 %v3267_v63, %v1736_v59  ;;  %2309 = vmatprep.mubr.bf16.mxu1 %v3938_v55  ;;  %3634 = vmatprep.mubr.bf16.mxu0 %v3940_v56  ;;  %v1757_v59 = vadd.f32 %v4400_v26, %v4378_v54 }
 0x131   : > { %v3268_v1 = vpop.f32.mrb[28].mxu1  ;;  %v3180_v3 = vpop.f32.mrb[28].mxu0 }
 0x132   : > { %v3269_v6 = vpop.f32.mrb[29].mxu1  ;;  %v3181_v7 = vpop.f32.mrb[29].mxu0 }
 0x133   : > { %v3270_v10 = vadd.f32 %v3269_v6, %v3268_v1  ;;  %v3271_v13 = vpop.f32.mrb[30].mxu1  ;;  %v4432_v16 = vadd.f32 %v3181_v7, %v3180_v3  ;;  %v3183_v17 = vpop.f32.mrb[30].mxu0 }
 0x134   : > { %v3272_v22 = vpop.f32.mrb[31].mxu1  ;;  %v3184_v23 = vpop.f32.mrb[31].mxu0 }
 0x135   : > { %v4438_v24 = vadd.f32 %v3270_v10, %v1741_v37  ;;  %v3273_v25 = vadd.f32 %v3272_v22, %v3271_v13  ;;  %v4440_v27 = vadd.f32 %v3184_v23, %v3183_v17  ;;  %v1765_v22 = vadd.f32 %v4416_v50, %v4378_v54 }
 0x136   : > { %2310 = vmatmul.mubr.bf16.gmra.mrb[136].mxu1 %v3941_v8  ;;  %3635 = vmatmul.mubr.bf16.gmra.mrb[136].mxu0 %v3942_v9  ;;  %v1760_v8 = vadd.f32 %v4408_v39, %v4378_v54 }
 0x137   : > { %v4442_v46 = vadd.f32 %v3273_v25, %v1744_v5  ;;  %2317 = vmatprep.mubr.bf16.mxu1 %v3943_v18  ;;  %3638 = vmatprep.mubr.bf16.mxu0 %v3945_v19 }
 0x139   : > { %v3274_v29 = vpop.f32.mrb[32].mxu1  ;;  %v3186_v31 = vpop.f32.mrb[32].mxu0 }
 0x13a   : > { %v3275_v32 = vpop.f32.mrb[33].mxu1  ;;  %v3187_v33 = vpop.f32.mrb[33].mxu0 }
 0x13b   : > { %v3276_v40 = vadd.f32 %v3275_v32, %v3274_v29  ;;  %v3277_v41 = vpop.f32.mrb[34].mxu1  ;;  %v4448_v42 = vadd.f32 %v3187_v33, %v3186_v31  ;;  %v3189_v43 = vpop.f32.mrb[34].mxu0  ;;  %v1768_v32 = vadd.f32 %v4424_v0, %v4378_v54 }
 0x13c   : > { %v3278_v45 = vpop.f32.mrb[35].mxu1  ;;  %v3190_v47 = vpop.f32.mrb[35].mxu0 }
 0x13d   : > { %v4452_v48 = vadd.f32 %v3276_v40, %v1749_v53  ;;  %v3279_v49 = vadd.f32 %v3278_v45, %v3277_v41  ;;  %v3191_v51 = vadd.f32 %v3190_v47, %v3189_v43  ;;  %v1773_v45 = vadd.f32 %v4432_v16, %v4378_v54 }
 0x13e   : > { %2318 = vmatmul.mubr.bf16.gmra.mrb[140].mxu1 %v3946_v34  ;;  %3639 = vmatmul.mubr.bf16.gmra.mrb[140].mxu0 %v3947_v38 }
 0x13f   : > { %v4454_v55 = vadd.f32 %v3279_v49, %v1752_v21 }
 0x141   : > { %v3280_v56 = vpop.f32.mrb[36].mxu1  ;;  %v3192_v2 = vpop.f32.mrb[36].mxu0 }
 0x142   : > { %v3281_v57 = vpop.f32.mrb[37].mxu1  ;;  %v3193_v58 = vpop.f32.mrb[37].mxu0 }
 0x143   : > { %v3282_v63 = vadd.f32 %v3281_v57, %v3280_v56  ;;  %v3283_v1 = vpop.f32.mrb[38].mxu1  ;;  %v4458_v3 = vadd.f32 %v3193_v58, %v3192_v2  ;;  %v3195_v15 = vpop.f32.mrb[38].mxu0  ;;  %v1776_v57 = vadd.f32 %v4440_v27, %v4378_v54  ;;  %v1784_v27 = vadd.f32 %v3191_v51, %v4378_v54 }
 0x144   : > { %v3284_v6 = vpop.f32.mrb[39].mxu1  ;;  %v3196_v7 = vpop.f32.mrb[39].mxu0 }
 0x145   : > { %v4462_v9 = vadd.f32 %v3282_v63, %v1757_v59  ;;  %v3285_v37 = vadd.f32 %v3284_v6, %v3283_v1  ;;  %v3197_v10 = vadd.f32 %v3196_v7, %v3195_v15  ;;  %v1789_v51 = vadd.f32 %v4458_v3, %v4378_v54 }
 0x147   : > { %v4464_v13 = vadd.f32 %v3285_v37, %v1760_v8  ;;  %v1781_v8 = vadd.f32 %v4448_v42, %v4378_v54 }
 0x149   : > { %v3286_v17 = vpop.f32.mrb[40].mxu1  ;;  %v3198_v18 = vpop.f32.mrb[40].mxu0 }
 0x14a   : > { %v3287_v19 = vpop.f32.mrb[41].mxu1  ;;  %v3199_v26 = vpop.f32.mrb[41].mxu0 }
 0x14b   : > { %v3288_v23 = vadd.f32 %v3287_v19, %v3286_v17  ;;  %v3289_v5 = vpop.f32.mrb[42].mxu1  ;;  %v4468_v25 = vadd.f32 %v3199_v26, %v3198_v18  ;;  %v3201_v29 = vpop.f32.mrb[42].mxu0 }
 0x14c   : > { %v3290_v31 = vpop.f32.mrb[43].mxu1  ;;  %v3202_v39 = vpop.f32.mrb[43].mxu0 }
 0x14d   : > { %v4472_v33 = vadd.f32 %v3288_v23, %v1765_v22  ;;  %v3291_v34 = vadd.f32 %v3290_v31, %v3289_v5  ;;  %v4474_v38 = vadd.f32 %v3202_v39, %v3201_v29 }
 0x14f   : > { %v4476_v53 = vadd.f32 %v3291_v34, %v1768_v32 }
 0x151   : > { %v3292_v40 = vpop.f32.mrb[44].mxu1  ;;  %v3204_v41 = vpop.f32.mrb[44].mxu0 }
 0x152   : > { %v3293_v50 = vpop.f32.mrb[45].mxu1  ;;  %v3205_v43 = vpop.f32.mrb[45].mxu0 }
 0x153   : > { %v3294_v47 = vadd.f32 %v3293_v50, %v3292_v40  ;;  %v3295_v21 = vpop.f32.mrb[46].mxu1  ;;  %v4480_v49 = vadd.f32 %v3205_v43, %v3204_v41  ;;  %v3207_v56 = vpop.f32.mrb[46].mxu0 }
 0x154   : > { %v3296_v0 = vpop.f32.mrb[47].mxu1  ;;  %v3208_v2 = vpop.f32.mrb[47].mxu0 }
 0x155   : > { %v4484_v58 = vadd.f32 %v3294_v47, %v1773_v45  ;;  %v3297_v59 = vadd.f32 %v3296_v0, %v3295_v21  ;;  %v4486_v63 = vadd.f32 %v3208_v2, %v3207_v56 }
 0x157   : > { %v4488_v1 = vadd.f32 %v3297_v59, %v1776_v57 }
 0x159   : > { %v3298_v15 = vpop.f32.mrb[48].mxu1  ;;  %v3362_v6 = vpop.f32.mrb[48].mxu0 }
 0x15a   : > { %v3299_v16 = vpop.f32.mrb[49].mxu1  ;;  %v3363_v7 = vpop.f32.mrb[49].mxu0 }
 0x15b   : > { %v3300_v37 = vadd.f32 %v3299_v16, %v3298_v15  ;;  %v3364_v17 = vadd.f32 %v3363_v7, %v3362_v6  ;;  %v3301_v18 = vpop.f32.mrb[50].mxu1  ;;  %v3365_v19 = vpop.f32.mrb[50].mxu0 }
 0x15c   : > { %v3302_v26 = vpop.f32.mrb[51].mxu1  ;;  %v3366_v22 = vpop.f32.mrb[51].mxu0 }
 0x15d   : > { %v4493_v23 = vadd.f32 %v3300_v37, %v1781_v8  ;;  %v4496_v5 = vadd.f32 %v3364_v17, %v4390_v11  ;;  %v3303_v29 = vadd.f32 %v3302_v26, %v3301_v18  ;;  %v3367_v31 = vadd.f32 %v3366_v22, %v3365_v19 }
 0x15e   : > { %v1792_v11 = vadd.f32 %v3197_v10, %v4378_v54  ;;  %v1797_v10 = vadd.f32 %v4468_v25, %v4378_v54 }
 0x15f   : > { %v4498_v39 = vadd.f32 %v3303_v29, %v1784_v27  ;;  %v4501_v32 = vadd.f32 %v3367_v31, %v4394_v62 }
 0x161   : > { %v3304_v42 = vpop.f32.mrb[52].mxu1  ;;  %v3368_v34 = vpop.f32.mrb[52].mxu0 }
 0x162   : > { %v3305_v40 = vpop.f32.mrb[53].mxu1  ;;  %v3369_v41 = vpop.f32.mrb[53].mxu0 }
 0x163   : > { %v3306_v50 = vadd.f32 %v3305_v40, %v3304_v42  ;;  %v3370_v43 = vadd.f32 %v3369_v41, %v3368_v34  ;;  %v3307_v45 = vpop.f32.mrb[54].mxu1  ;;  %v3371_v47 = vpop.f32.mrb[54].mxu0 }
 0x164   : > { %v3308_v21 = vpop.f32.mrb[55].mxu1  ;;  %v3372_v56 = vpop.f32.mrb[55].mxu0 }
 0x165   : > { %v4506_v0 = vadd.f32 %v3306_v50, %v1789_v51  ;;  %v4509_v62 = vadd.f32 %v3370_v43, %v4406_v35  ;;  %v3309_v2 = vadd.f32 %v3308_v21, %v3307_v45  ;;  %v3373_v57 = vadd.f32 %v3372_v56, %v3371_v47 }
 0x166   : > { %v1800_v35 = vadd.f32 %v4474_v38, %v4378_v54  ;;  %v1805_v38 = vadd.f32 %v4480_v49, %v4378_v54 }
 0x167   : > { %v4511_v59 = vadd.f32 %v3309_v2, %v1792_v11  ;;  %v4514_v15 = vadd.f32 %v3373_v57, %v4410_v14 }
 0x169   : > { %v3310_v3 = vpop.f32.mrb[56].mxu1  ;;  %v3374_v6 = vpop.f32.mrb[56].mxu0 }
 0x16a   : > { %v3311_v16 = vpop.f32.mrb[57].mxu1  ;;  %v3375_v7 = vpop.f32.mrb[57].mxu0 }
 0x16b   : > { %v3312_v8 = vadd.f32 %v3311_v16, %v3310_v3  ;;  %v3376_v37 = vadd.f32 %v3375_v7, %v3374_v6  ;;  %v3313_v17 = vpop.f32.mrb[58].mxu1  ;;  %v3377_v18 = vpop.f32.mrb[58].mxu0 }
 0x16c   : > { %v3314_v19 = vpop.f32.mrb[59].mxu1  ;;  %v3378_v27 = vpop.f32.mrb[59].mxu0 }
 0x16d   : > { %v4520_v26 = vadd.f32 %v3312_v8, %v1797_v10  ;;  %v4523_v14 = vadd.f32 %v3376_v37, %v4422_v61  ;;  %v3315_v22 = vadd.f32 %v3314_v19, %v3313_v17  ;;  %v3379_v29 = vadd.f32 %v3378_v27, %v3377_v18 }
 0x16e   : > { %v1808_v61 = vadd.f32 %v4486_v63, %v4378_v54  ;;  %v1813_v63 = vadd.f32 %v4329_v60, %v4378_v54 }
 0x16f   : > { %v4525_v31 = vadd.f32 %v3315_v22, %v1800_v35  ;;  %v4528_v25 = vadd.f32 %v3379_v29, %v4426_v30 }
 0x171   : > { %v3316_v42 = vpop.f32.mrb[60].mxu1  ;;  %v3380_v34 = vpop.f32.mrb[60].mxu0 }
 0x172   : > { %v3317_v40 = vpop.f32.mrb[61].mxu1  ;;  %v3381_v41 = vpop.f32.mrb[61].mxu0 }
 0x173   : > { %v3318_v51 = vadd.f32 %v3317_v40, %v3316_v42  ;;  %v3382_v50 = vadd.f32 %v3381_v41, %v3380_v34  ;;  %v3319_v43 = vpop.f32.mrb[62].mxu1  ;;  %v3383_v45 = vpop.f32.mrb[62].mxu0 }
 0x174   : > { %v3320_v47 = vpop.f32.mrb[63].mxu1  ;;  %v3384_v11 = vpop.f32.mrb[63].mxu0 }
 0x175   : > { %v4534_v21 = vadd.f32 %v3318_v51, %v1805_v38  ;;  %v4537_v30 = vadd.f32 %v3382_v50, %v4438_v24  ;;  %v3321_v56 = vadd.f32 %v3320_v47, %v3319_v43  ;;  %v3385_v2 = vadd.f32 %v3384_v11, %v3383_v45 }
 0x176   : > { %v1816_v24 = vadd.f32 %v4335_v4, %v4378_v54  ;;  %v1821_v4 = vadd.f32 %v4341_v12, %v4378_v54 }
 0x177   : > { %v4539_v57 = vadd.f32 %v3321_v56, %v1808_v61  ;;  %v4542_v49 = vadd.f32 %v3385_v2, %v4442_v46 }
 0x179   : > { %v3322_v3 = vpop.f32.mrb[64].mxu1  ;;  %v3386_v6 = vpop.f32.mrb[64].mxu0 }
 0x17a   : > { %v3323_v16 = vpop.f32.mrb[65].mxu1  ;;  %v3387_v7 = vpop.f32.mrb[65].mxu0 }
 0x17b   : > { %v3324_v10 = vadd.f32 %v3323_v16, %v3322_v3  ;;  %v3388_v8 = vadd.f32 %v3387_v7, %v3386_v6  ;;  %v3325_v37 = vpop.f32.mrb[66].mxu1  ;;  %v3389_v17 = vpop.f32.mrb[66].mxu0 }
 0x17c   : > { %v3326_v18 = vpop.f32.mrb[67].mxu1  ;;  %v3390_v35 = vpop.f32.mrb[67].mxu0 }
 0x17d   : > { %v4548_v19 = vadd.f32 %v3324_v10, %v1813_v63  ;;  %v4551_v46 = vadd.f32 %v3388_v8, %v4452_v48  ;;  %v3327_v27 = vadd.f32 %v3326_v18, %v3325_v37  ;;  %v3391_v22 = vadd.f32 %v3390_v35, %v3389_v17 }
 0x17e   : > { %v1824_v48 = vadd.f32 %v4347_v20, %v4378_v54  ;;  %v1829_v20 = vadd.f32 %v4353_v28, %v4378_v54 }
 0x17f   : > { %v4553_v29 = vadd.f32 %v3327_v27, %v1816_v24  ;;  %v4556_v60 = vadd.f32 %v3391_v22, %v4454_v55 }
 0x181   : > { %v3328_v42 = vpop.f32.mrb[68].mxu1  ;;  %v3392_v34 = vpop.f32.mrb[68].mxu0 }
 0x182   : > { %v3329_v40 = vpop.f32.mrb[69].mxu1  ;;  %v3393_v41 = vpop.f32.mrb[69].mxu0 }
 0x183   : > { %v3330_v38 = vadd.f32 %v3329_v40, %v3328_v42  ;;  %v3394_v51 = vadd.f32 %v3393_v41, %v3392_v34  ;;  %v3331_v50 = vpop.f32.mrb[70].mxu1  ;;  %v3395_v43 = vpop.f32.mrb[70].mxu0 }
 0x184   : > { %v3332_v45 = vpop.f32.mrb[71].mxu1  ;;  %v3396_v61 = vpop.f32.mrb[71].mxu0 }
 0x185   : > { %v4562_v47 = vadd.f32 %v3330_v38, %v1821_v4  ;;  %v4565_v55 = vadd.f32 %v3394_v51, %v4462_v9  ;;  %v3333_v11 = vadd.f32 %v3332_v45, %v3331_v50  ;;  %v3397_v56 = vadd.f32 %v3396_v61, %v3395_v43 }
 0x186   : > { %v1832_v9 = vadd.f32 %v4359_v36, %v4378_v54  ;;  %v1837_v36 = vadd.f32 %v4365_v44, %v4378_v54 }
 0x187   : > { %v4567_v2 = vadd.f32 %v3333_v11, %v1824_v48  ;;  %v4570_v12 = vadd.f32 %v3397_v56, %v4464_v13 }
 0x189   : > { %v3334_v3 = vpop.f32.mrb[72].mxu1  ;;  %v3398_v6 = vpop.f32.mrb[72].mxu0 }
 0x18a   : > { %v3335_v16 = vpop.f32.mrb[73].mxu1  ;;  %v3399_v7 = vpop.f32.mrb[73].mxu0 }
 0x18b   : > { %v3336_v63 = vadd.f32 %v3335_v16, %v3334_v3  ;;  %v3400_v10 = vadd.f32 %v3399_v7, %v3398_v6  ;;  %v3337_v8 = vpop.f32.mrb[74].mxu1  ;;  %v3401_v37 = vpop.f32.mrb[74].mxu0 }
 0x18c   : > { %v3338_v17 = vpop.f32.mrb[75].mxu1  ;;  %v3402_v24 = vpop.f32.mrb[75].mxu0 }
 0x18d   : > { %v4576_v18 = vadd.f32 %v3336_v63, %v1829_v20  ;;  %v4579_v13 = vadd.f32 %v3400_v10, %v4472_v33  ;;  %v3339_v35 = vadd.f32 %v3338_v17, %v3337_v8  ;;  %v3403_v27 = vadd.f32 %v3402_v24, %v3401_v37 }
 0x18e   : > { %v1840_v33 = vadd.f32 %v4371_v52, %v4378_v54 }
 0x18f   : > { %v4581_v22 = vadd.f32 %v3339_v35, %v1832_v9  ;;  %v4584_v28 = vadd.f32 %v3403_v27, %v4476_v53 }
 0x191   : > { %v3340_v42 = vpop.f32.mrb[76].mxu1  ;;  %v3404_v34 = vpop.f32.mrb[76].mxu0 }
 0x192   : > { %v3341_v40 = vpop.f32.mrb[77].mxu1  ;;  %v3405_v41 = vpop.f32.mrb[77].mxu0 }
 0x193   : > { %v3342_v4 = vadd.f32 %v3341_v40, %v3340_v42  ;;  %v3406_v38 = vadd.f32 %v3405_v41, %v3404_v34  ;;  %v3343_v51 = vpop.f32.mrb[78].mxu1  ;;  %v3407_v50 = vpop.f32.mrb[78].mxu0 }
 0x194   : > { %v3344_v43 = vpop.f32.mrb[79].mxu1  ;;  %v3408_v48 = vpop.f32.mrb[79].mxu0 }
 0x195   : > { %v4590_v45 = vadd.f32 %v3342_v4, %v1837_v36  ;;  %v4593_v53 = vadd.f32 %v3406_v38, %v4484_v58  ;;  %v3345_v61 = vadd.f32 %v3344_v43, %v3343_v51  ;;  %v3409_v11 = vadd.f32 %v3408_v48, %v3407_v50 }
 0x197   : > { %v4595_v56 = vadd.f32 %v3345_v61, %v1840_v33  ;;  %v4598_v44 = vadd.f32 %v3409_v11, %v4488_v1 }
 0x199   : > { %v3410_v3 = vpop.f32.mrb[80].mxu0  ;;  %v3474_v6 = vpop.f32.mrb[80].mxu1 }
 0x19a   : > { %v3411_v16 = vpop.f32.mrb[81].mxu0  ;;  %v3475_v7 = vpop.f32.mrb[81].mxu1 }
 0x19b   : > { %v3412_v20 = vadd.f32 %v3411_v16, %v3410_v3  ;;  %v3476_v52 = vadd.f32 %v3475_v7, %v3474_v6  ;;  %v3413_v54 = vpop.f32.mrb[82].mxu0  ;;  %v3477_v63 = vpop.f32.mrb[82].mxu1 }
 0x19c   : > { %v3414_v10 = vpop.f32.mrb[83].mxu0  ;;  %v3478_v8 = vpop.f32.mrb[83].mxu1 }
 0x19d   : > { %v4601_v58 = vadd.f32 %v3412_v20, %v4493_v23  ;;  %v3415_v37 = vadd.f32 %v3414_v10, %v3413_v54  ;;  %v3479_v9 = vadd.f32 %v3478_v8, %v3477_v63  ;;  %v4604_v17 = vadd.f32 %v3476_v52, %v4496_v5 }
 0x19f   : > { %v4607_v1 = vadd.f32 %v3415_v37, %v4498_v39  ;;  %v4610_v24 = vadd.f32 %v3479_v9, %v4501_v32 }
 0x1a1   : > { %v3416_v35 = vpop.f32.mrb[84].mxu0  ;;  %v3480_v27 = vpop.f32.mrb[84].mxu1 }
 0x1a2   : > { %v3417_v42 = vpop.f32.mrb[85].mxu0  ;;  %v3481_v34 = vpop.f32.mrb[85].mxu1 }
 0x1a3   : > { %v3418_v40 = vadd.f32 %v3417_v42, %v3416_v35  ;;  %v3482_v41 = vadd.f32 %v3481_v34, %v3480_v27  ;;  %v3419_v36 = vpop.f32.mrb[86].mxu0  ;;  %v3483_v23 = vpop.f32.mrb[86].mxu1 }
 0x1a4   : > { %v3420_v4 = vpop.f32.mrb[87].mxu0  ;;  %v3484_v38 = vpop.f32.mrb[87].mxu1 }
 0x1a5   : > { %v4613_v51 = vadd.f32 %v3418_v40, %v4506_v0  ;;  %v3421_v5 = vadd.f32 %v3420_v4, %v3419_v36  ;;  %v3485_v50 = vadd.f32 %v3484_v38, %v3483_v23  ;;  %v4616_v39 = vadd.f32 %v3482_v41, %v4509_v62 }
 0x1a7   : > { %v4619_v32 = vadd.f32 %v3421_v5, %v4511_v59  ;;  %v4622_v33 = vadd.f32 %v3485_v50, %v4514_v15 }
 0x1a9   : > { %v3422_v43 = vpop.f32.mrb[88].mxu0  ;;  %v3486_v48 = vpop.f32.mrb[88].mxu1 }
 0x1aa   : > { %v3423_v61 = vpop.f32.mrb[89].mxu0  ;;  %v3487_v11 = vpop.f32.mrb[89].mxu1 }
 0x1ab   : > { %v3424_v3 = vadd.f32 %v3423_v61, %v3422_v43  ;;  %v3488_v6 = vadd.f32 %v3487_v11, %v3486_v48  ;;  %v3425_v16 = vpop.f32.mrb[90].mxu0  ;;  %v3489_v0 = vpop.f32.mrb[90].mxu1 }
 0x1ac   : > { %v3426_v7 = vpop.f32.mrb[91].mxu0  ;;  %v3490_v20 = vpop.f32.mrb[91].mxu1 }
 0x1ad   : > { %v4625_v52 = vadd.f32 %v3424_v3, %v4520_v26  ;;  %v3427_v62 = vadd.f32 %v3426_v7, %v3425_v16  ;;  %v3491_v54 = vadd.f32 %v3490_v20, %v3489_v0  ;;  %v4628_v59 = vadd.f32 %v3488_v6, %v4523_v14 }
 0x1af   : > { %v4631_v15 = vadd.f32 %v3427_v62, %v4525_v31  ;;  %v4634_v63 = vadd.f32 %v3491_v54, %v4528_v25 }
 0x1b1   : > { %v3428_v10 = vpop.f32.mrb[92].mxu0  ;;  %v3492_v8 = vpop.f32.mrb[92].mxu1 }
 0x1b2   : > { %v3429_v37 = vpop.f32.mrb[93].mxu0  ;;  %v3493_v9 = vpop.f32.mrb[93].mxu1 }
 0x1b3   : > { %v3430_v35 = vadd.f32 %v3429_v37, %v3428_v10  ;;  %v3494_v27 = vadd.f32 %v3493_v9, %v3492_v8  ;;  %v3431_v42 = vpop.f32.mrb[94].mxu0  ;;  %v3495_v26 = vpop.f32.mrb[94].mxu1 }
 0x1b4   : > { %v3432_v34 = vpop.f32.mrb[95].mxu0  ;;  %v3496_v40 = vpop.f32.mrb[95].mxu1 }
 0x1b5   : > { %v4637_v41 = vadd.f32 %v3430_v35, %v4534_v21  ;;  %v3433_v14 = vadd.f32 %v3432_v34, %v3431_v42  ;;  %v3497_v36 = vadd.f32 %v3496_v40, %v3495_v26  ;;  %v4640_v31 = vadd.f32 %v3494_v27, %v4537_v30 }
 0x1b7   : > { %v4643_v25 = vadd.f32 %v3433_v14, %v4539_v57  ;;  %v4646_v23 = vadd.f32 %v3497_v36, %v4542_v49 }
 0x1b9   : > { %v3434_v4 = vpop.f32.mrb[96].mxu0  ;;  %v3498_v38 = vpop.f32.mrb[96].mxu1 }
 0x1ba   : > { %v3435_v5 = vpop.f32.mrb[97].mxu0  ;;  %v3499_v50 = vpop.f32.mrb[97].mxu1 }
 0x1bb   : > { %v3436_v43 = vadd.f32 %v3435_v5, %v3434_v4  ;;  %v3500_v48 = vadd.f32 %v3499_v50, %v3498_v38  ;;  %v3437_v61 = vpop.f32.mrb[98].mxu0  ;;  %v3501_v21 = vpop.f32.mrb[98].mxu1 }
 0x1bc   : > { %v3438_v11 = vpop.f32.mrb[99].mxu0  ;;  %v3502_v3 = vpop.f32.mrb[99].mxu1 }
 0x1bd   : > { %v4649_v6 = vadd.f32 %v3436_v43, %v4548_v19  ;;  %v3439_v30 = vadd.f32 %v3438_v11, %v3437_v61  ;;  %v3503_v16 = vadd.f32 %v3502_v3, %v3501_v21  ;;  %v4652_v57 = vadd.f32 %v3500_v48, %v4551_v46 }
 0x1bf   : > { %v4655_v49 = vadd.f32 %v3439_v30, %v4553_v29  ;;  %v4658_v0 = vadd.f32 %v3503_v16, %v4556_v60 }
 0x1c1   : > { %v3440_v7 = vpop.f32.mrb[100].mxu0  ;;  %v3504_v20 = vpop.f32.mrb[100].mxu1 }
 0x1c2   : > { %v3441_v62 = vpop.f32.mrb[101].mxu0  ;;  %v3505_v54 = vpop.f32.mrb[101].mxu1 }
 0x1c3   : > { %v3442_v10 = vadd.f32 %v3441_v62, %v3440_v7  ;;  %v3506_v8 = vadd.f32 %v3505_v54, %v3504_v20  ;;  %v3443_v37 = vpop.f32.mrb[102].mxu0  ;;  %v3507_v19 = vpop.f32.mrb[102].mxu1 }
 0x1c4   : > { %v3444_v9 = vpop.f32.mrb[103].mxu0  ;;  %v3508_v35 = vpop.f32.mrb[103].mxu1 }
 0x1c5   : > { %v4661_v27 = vadd.f32 %v3442_v10, %v4562_v47  ;;  %v3445_v46 = vadd.f32 %v3444_v9, %v3443_v37  ;;  %v3509_v42 = vadd.f32 %v3508_v35, %v3507_v19  ;;  %v4664_v29 = vadd.f32 %v3506_v8, %v4565_v55 }
 0x1c7   : > { %v4667_v60 = vadd.f32 %v3445_v46, %v4567_v2  ;;  %v4670_v26 = vadd.f32 %v3509_v42, %v4570_v12 }
 0x1c9   : > { %v3446_v34 = vpop.f32.mrb[104].mxu0  ;;  %v3510_v40 = vpop.f32.mrb[104].mxu1 }
 0x1ca   : > { %v3447_v14 = vpop.f32.mrb[105].mxu0  ;;  %v3511_v36 = vpop.f32.mrb[105].mxu1 }
 0x1cb   : > { %v3448_v4 = vadd.f32 %v3447_v14, %v3446_v34  ;;  %v3512_v38 = vadd.f32 %v3511_v36, %v3510_v40  ;;  %v3449_v5 = vpop.f32.mrb[106].mxu0  ;;  %v3513_v47 = vpop.f32.mrb[106].mxu1 }
 0x1cc   : > { %v3450_v50 = vpop.f32.mrb[107].mxu0  ;;  %v3514_v43 = vpop.f32.mrb[107].mxu1 }
 0x1cd   : > { %v4673_v48 = vadd.f32 %v3448_v4, %v4576_v18  ;;  %v3451_v55 = vadd.f32 %v3450_v50, %v3449_v5  ;;  %v3515_v61 = vadd.f32 %v3514_v43, %v3513_v47  ;;  %v4676_v2 = vadd.f32 %v3512_v38, %v4579_v13 }
 0x1cf   : > { %v4679_v12 = vadd.f32 %v3451_v55, %v4581_v22  ;;  %v4682_v21 = vadd.f32 %v3515_v61, %v4584_v28 }
 0x1d1   : > { %v3452_v11 = vpop.f32.mrb[108].mxu0  ;;  %v3516_v3 = vpop.f32.mrb[108].mxu1 }
 0x1d2   : > { %v3453_v30 = vpop.f32.mrb[109].mxu0  ;;  %v3517_v16 = vpop.f32.mrb[109].mxu1 }
 0x1d3   : > { %v3454_v7 = vadd.f32 %v3453_v30, %v3452_v11  ;;  %v3518_v20 = vadd.f32 %v3517_v16, %v3516_v3  ;;  %v3455_v18 = vpop.f32.mrb[110].mxu0  ;;  %v3519_v62 = vpop.f32.mrb[110].mxu1 }
 0x1d4   : > { %v3456_v54 = vpop.f32.mrb[111].mxu0  ;;  %v3520_v10 = vpop.f32.mrb[111].mxu1 }
 0x1d5   : > { %v4685_v13 = vadd.f32 %v3454_v7, %v4590_v45  ;;  %v3457_v8 = vadd.f32 %v3456_v54, %v3455_v18  ;;  %v3521_v22 = vadd.f32 %v3520_v10, %v3519_v62  ;;  %v4688_v37 = vadd.f32 %v3518_v20, %v4593_v53 }
 0x1d7   : > { %v4692_v28 = vadd.f32 %v3457_v8, %v4595_v56  ;;  %v4695_v19 = vadd.f32 %v3521_v22, %v4598_v44 }
 0x1d9   : > { %v3522_v9 = vpop.f32.mrb[112].mxu1  ;;  %v3612_v45 = vpop.f32.mrb[112].mxu0 }
 0x1da   : > { %v4703_v53 = vadd.f32 %v3612_v45, %v4616_v39  ;;  %v3523_v35 = vpop.f32.mrb[113].mxu1  ;;  %v2360_v56 = vpop.f32.mrb[113].mxu0 }
 0x1db   : > { %v3524_v46 = vadd.f32 %v3523_v35, %v3522_v9  ;;  %v4706_v44 = vadd.f32 %v2360_v56, %v4604_v17  ;;  %v3525_v42 = vpop.f32.mrb[114].mxu1  ;;  %v3613_v34 = vpop.f32.mrb[114].mxu0 }
 0x1dc   : > { %2489 = vst [vmem:[%s4700_s11 + $0x10] sm:$0xff] %v4703_v53  ;;  %v4711_v40 = vadd.f32 %v3613_v34, %v4622_v33  ;;  %v3526_v14 = vpop.f32.mrb[115].mxu1  ;;  %v2363_v36 = vpop.f32.mrb[115].mxu0 }
 0x1dd   : > { %2487 = vst [vmem:[%s4700_s11] sm:$0xff] %v4706_v44  ;;  %v3527_v39 = vadd.f32 %v3526_v14, %v3525_v42  ;;  %v4716_v4 = vadd.f32 %v2363_v36, %v4610_v24  ;;  %v4719_v38 = vadd.f32 %v3524_v46, %v4601_v58 }
 0x1de   : > { %2490 = vst [vmem:[%s4700_s11 + $0x18] sm:$0xff] %v4711_v40 }
 0x1df   : > { %2488 = vst [vmem:[%s4700_s11 + $0x8] sm:$0xff] %v4716_v4  ;;  %v4726_v17 = vadd.f32 %v3527_v39, %v4607_v1 }
 0x1e1   : > { %v3528_v33 = vpop.f32.mrb[116].mxu1  ;;  %v3616_v5 = vpop.f32.mrb[116].mxu0 }
 0x1e2   : > { %v4729_v47 = vadd.f32 %v3616_v5, %v4640_v31  ;;  %v3529_v24 = vpop.f32.mrb[117].mxu1  ;;  %v2376_v50 = vpop.f32.mrb[117].mxu0 }
 0x1e3   : > { %v3530_v43 = vadd.f32 %v3529_v24, %v3528_v33  ;;  %v4732_v58 = vadd.f32 %v2376_v50, %v4628_v59  ;;  %v3531_v55 = vpop.f32.mrb[118].mxu1  ;;  %v3617_v61 = vpop.f32.mrb[118].mxu0 }
 0x1e4   : > { %2493 = vst [vmem:[%s4700_s11 + $0x30] sm:$0xff] %v4729_v47  ;;  %v4737_v1 = vadd.f32 %v3617_v61, %v4646_v23  ;;  %v3532_v11 = vpop.f32.mrb[119].mxu1  ;;  %v2379_v3 = vpop.f32.mrb[119].mxu0 }
 0x1e5   : > { %2491 = vst [vmem:[%s4700_s11 + $0x20] sm:$0xff] %v4732_v58  ;;  %v3533_v31 = vadd.f32 %v3532_v11, %v3531_v55  ;;  %v4742_v30 = vadd.f32 %v2379_v3, %v4634_v63  ;;  %v2272_v16 = vadd.f32 %v3530_v43, %v4613_v51 }
 0x1e6   : > { %2494 = vst [vmem:[%s4700_s11 + $0x38] sm:$0xff] %v4737_v1 }
 0x1e7   : > { %2492 = vst [vmem:[%s4700_s11 + $0x28] sm:$0xff] %v4742_v30  ;;  %v2275_v59 = vadd.f32 %v3533_v31, %v4619_v32 }
 0x1e9   : > { %v3534_v23 = vpop.f32.mrb[120].mxu1  ;;  %v3620_v7 = vpop.f32.mrb[120].mxu0 }
 0x1ea   : > { %v4751_v20 = vadd.f32 %v3620_v7, %v4664_v29  ;;  %v3535_v18 = vpop.f32.mrb[121].mxu1  ;;  %v2392_v62 = vpop.f32.mrb[121].mxu0 }
 0x1eb   : > { %v3536_v63 = vadd.f32 %v3535_v18, %v3534_v23  ;;  %v4754_v54 = vadd.f32 %v2392_v62, %v4652_v57  ;;  %v3537_v51 = vpop.f32.mrb[122].mxu1  ;;  %v3621_v10 = vpop.f32.mrb[122].mxu0 }
 0x1ec   : > { %2497 = vst [vmem:[%s4700_s11 + $0x50] sm:$0xff] %v4751_v20  ;;  %v4759_v8 = vadd.f32 %v3621_v10, %v4670_v26  ;;  %v3538_v32 = vpop.f32.mrb[123].mxu1  ;;  %v2395_v22 = vpop.f32.mrb[123].mxu0 }
 0x1ed   : > { %2495 = vst [vmem:[%s4700_s11 + $0x40] sm:$0xff] %v4754_v54  ;;  %v3539_v29 = vadd.f32 %v3538_v32, %v3537_v51  ;;  %v4764_v9 = vadd.f32 %v2395_v22, %v4658_v0  ;;  %v2280_v45 = vadd.f32 %v3536_v63, %v4625_v52 }
 0x1ee   : > { %2498 = vst [vmem:[%s4700_s11 + $0x58] sm:$0xff] %v4759_v8 }
 0x1ef   : > { %2496 = vst [vmem:[%s4700_s11 + $0x48] sm:$0xff] %v4764_v9  ;;  %v2283_v57 = vadd.f32 %v3539_v29, %v4631_v15 }
 0x1f1   : > { %v3540_v26 = vpop.f32.mrb[124].mxu1  ;;  %v3624_v35 = vpop.f32.mrb[124].mxu0 }
 0x1f2   : > { %v4773_v56 = vadd.f32 %v3624_v35, %v4688_v37  ;;  %v3541_v46 = vpop.f32.mrb[125].mxu1  ;;  %v2408_v42 = vpop.f32.mrb[125].mxu0 }
 0x1f3   : > { %v3542_v0 = vadd.f32 %v3541_v46, %v3540_v26  ;;  %v4776_v34 = vadd.f32 %v2408_v42, %v4676_v2  ;;  %v3543_v52 = vpop.f32.mrb[126].mxu1  ;;  %v3625_v14 = vpop.f32.mrb[126].mxu0 }
 0x1f4   : > { %2501 = vst [vmem:[%s4700_s11 + $0x70] sm:$0xff] %v4773_v56  ;;  %v4781_v36 = vadd.f32 %v3625_v14, %v4695_v19  ;;  %v3544_v15 = vpop.f32.mrb[127].mxu1  ;;  %v2411_v39 = vpop.f32.mrb[127].mxu0 }
 0x1f5   : > { %2499 = vst [vmem:[%s4700_s11 + $0x60] sm:$0xff] %v4776_v34  ;;  %v3545_v37 = vadd.f32 %v3544_v15, %v3543_v52  ;;  %v4786_v33 = vadd.f32 %v2411_v39, %v4682_v21  ;;  %v2288_v5 = vadd.f32 %v3542_v0, %v4637_v41 }
 0x1f6   : > { %2502 = vst [vmem:[%s4700_s11 + $0x78] sm:$0xff] %v4781_v36 }
 0x1f7   : > { %2500 = vst [vmem:[%s4700_s11 + $0x68] sm:$0xff] %v4786_v33  ;;  %v2291_v2 = vadd.f32 %v3545_v37, %v4643_v25 }
 0x1f9   : > { %v3546_v19 = vpop.f32.mrb[128].mxu1  ;;  %v3628_v24 = vpop.f32.mrb[128].mxu0 }
 0x1fa   : > { %v4794_v50 = vadd.f32 %v3628_v24, %v2272_v16  ;;  %v3547_v43 = vpop.f32.mrb[129].mxu1  ;;  %v2424_v55 = vpop.f32.mrb[129].mxu0 }
 0x1fb   : > { %v3548_v61 = vadd.f32 %v3547_v43, %v3546_v19  ;;  %v4797_v21 = vadd.f32 %v2424_v55, %v4719_v38  ;;  %v3549_v41 = vpop.f32.mrb[130].mxu1  ;;  %v3629_v11 = vpop.f32.mrb[130].mxu0 }
 0x1fc   : > { %2505 = vst [vmem:[%s4700_s11 + $0x90] sm:$0xff] %v4794_v50  ;;  %v4801_v3 = vadd.f32 %v3629_v11, %v2275_v59  ;;  %v3550_v31 = vpop.f32.mrb[131].mxu1  ;;  %v2427_v25 = vpop.f32.mrb[131].mxu0 }
 0x1fd   : > { %2503 = vst [vmem:[%s4700_s11 + $0x80] sm:$0xff] %v4797_v21  ;;  %v3551_v16 = vadd.f32 %v3550_v31, %v3549_v41  ;;  %v4806_v23 = vadd.f32 %v2427_v25, %v4726_v17  ;;  %v2296_v7 = vadd.f32 %v3548_v61, %v4649_v6 }
 0x1fe   : > { %2506 = vst [vmem:[%s4700_s11 + $0x98] sm:$0xff] %v4801_v3 }
 0x1ff   : > { %2504 = vst [vmem:[%s4700_s11 + $0x88] sm:$0xff] %v4806_v23  ;;  %v2299_v38 = vadd.f32 %v3551_v16, %v4655_v49 }
 0x201   : > { %v3552_v59 = vpop.f32.mrb[132].mxu1  ;;  %v3632_v18 = vpop.f32.mrb[132].mxu0 }
 0x202   : > { %v4814_v62 = vadd.f32 %v3632_v18, %v2288_v5  ;;  %v3553_v63 = vpop.f32.mrb[133].mxu1  ;;  %v2440_v51 = vpop.f32.mrb[133].mxu0 }
 0x203   : > { %v3554_v10 = vadd.f32 %v3553_v63, %v3552_v59  ;;  %v4816_v17 = vadd.f32 %v2440_v51, %v2280_v45  ;;  %v3555_v32 = vpop.f32.mrb[134].mxu1  ;;  %v3633_v6 = vpop.f32.mrb[134].mxu0 }
 0x204   : > { %2509 = vst [vmem:[%s4700_s11 + $0xb0] sm:$0xff] %v4814_v62  ;;  %v4820_v22 = vadd.f32 %v3633_v6, %v2291_v2  ;;  %v3556_v29 = vpop.f32.mrb[135].mxu1  ;;  %v2443_v26 = vpop.f32.mrb[135].mxu0 }
 0x205   : > { %2507 = vst [vmem:[%s4700_s11 + $0xa0] sm:$0xff] %v4816_v17  ;;  %v3557_v49 = vadd.f32 %v3556_v29, %v3555_v32  ;;  %v4824_v35 = vadd.f32 %v2443_v26, %v2283_v57  ;;  %v2304_v46 = vadd.f32 %v3554_v10, %v4661_v27 }
 0x206   : > { %2510 = vst [vmem:[%s4700_s11 + $0xb8] sm:$0xff] %v4820_v22 }
 0x207   : > { %2508 = vst [vmem:[%s4700_s11 + $0xa8] sm:$0xff] %v4824_v35  ;;  %v2307_v45 = vadd.f32 %v3557_v49, %v4667_v60 }
 0x209   : > { %v3558_v42 = vpop.f32.mrb[136].mxu1  ;;  %v3636_v0 = vpop.f32.mrb[136].mxu0 }
 0x20a   : > { %v4832_v52 = vadd.f32 %v3636_v0, %v2304_v46  ;;  %v3559_v14 = vpop.f32.mrb[137].mxu1  ;;  %v2456_v15 = vpop.f32.mrb[137].mxu0 }
 0x20b   : > { %v3560_v39 = vadd.f32 %v3559_v14, %v3558_v42  ;;  %v4834_v57 = vadd.f32 %v2456_v15, %v2296_v7  ;;  %v3561_v37 = vpop.f32.mrb[138].mxu1  ;;  %v3637_v27 = vpop.f32.mrb[138].mxu0 }
 0x20c   : > { %2513 = vst [vmem:[%s4700_s11 + $0xd0] sm:$0xff] %v4832_v52  ;;  %v4838_v5 = vadd.f32 %v3637_v27, %v2307_v45  ;;  %v3562_v2 = vpop.f32.mrb[139].mxu1  ;;  %v2459_v19 = vpop.f32.mrb[139].mxu0 }
 0x20d   : > { %2511 = vst [vmem:[%s4700_s11 + $0xc0] sm:$0xff] %v4834_v57  ;;  %v3563_v60 = vadd.f32 %v3562_v2, %v3561_v37  ;;  %v4842_v24 = vadd.f32 %v2459_v19, %v2299_v38  ;;  %v2312_v43 = vadd.f32 %v3560_v39, %v4673_v48 }
 0x20e   : > { %2514 = vst [vmem:[%s4700_s11 + $0xd8] sm:$0xff] %v4838_v5 }
 0x20f   : > { %2512 = vst [vmem:[%s4700_s11 + $0xc8] sm:$0xff] %v4842_v24  ;;  %v2315_v55 = vadd.f32 %v3563_v60, %v4679_v12 }
 0x211   : > { %v3564_v61 = vpop.f32.mrb[140].mxu1  ;;  %v3640_v41 = vpop.f32.mrb[140].mxu0 }
 0x212   : > { %v3565_v11 = vpop.f32.mrb[141].mxu1  ;;  %v2472_v31 = vpop.f32.mrb[141].mxu0 }
 0x213   : > { %v3566_v25 = vadd.f32 %v3565_v11, %v3564_v61  ;;  %v4850_v16 = vadd.f32 %v2472_v31, %v2312_v43  ;;  %v3567_v7 = vpop.f32.mrb[142].mxu1  ;;  %v3641_v38 = vpop.f32.mrb[142].mxu0 }
 0x214   : > { %v3568_v59 = vpop.f32.mrb[143].mxu1  ;;  %v2475_v48 = vpop.f32.mrb[143].mxu0 }
 0x215   : > { %v2320_v18 = vadd.f32 %v3566_v25, %v4685_v13  ;;  %2515 = vst [vmem:[%s4700_s11 + $0xe0] sm:$0xff] %v4850_v16  ;;  %v3569_v63 = vadd.f32 %v3568_v59, %v3567_v7  ;;  %v4855_v12 = vadd.f32 %v2475_v48, %v2315_v55  ;;  %2522 = sbr.rel (%p3118_p4) target bundleno = 540 (0x21c), region = 36  ;;  %v3956_v13 = vmov (!%p3118_p4), 0.0  }
 0x216   : > { %2523 = vst [vmem:[%s4986_s4] sm:$0x3] (!%p3118_p4), %v3956_v13 }
 0x217   : > { %v4857_v51 = vadd.f32 %v3640_v41, %v2320_v18  ;;  %v2323_v10 = vadd.f32 %v3569_v63, %v4692_v28  ;;  %2516 = vst [vmem:[%s4700_s11 + $0xe8] sm:$0xff] %v4855_v12 }
 0x219   : > { %2517 = vst [vmem:[%s4700_s11 + $0xf0] sm:$0xff] %v4857_v51  ;;  %v4864_v32 = vadd.f32 %v3641_v38, %v2323_v10 }
 0x21b   : > { %2518 = vst [vmem:[%s4700_s11 + $0xf8] sm:$0xff] %v4864_v32 }
 0x21c PF: > { %v2525_v6 = vlaneseq  ;;  %s3119_s14 = sshll.u32 %s3988_s16, 8 }
 0x21d   : > { %v4876_v26 = vstv %s3119_s14 }
 0x21e   : > { %v4872_v28 = vshrl.u32 %v2525_v6, 7 }
 0x220   : > { %v2527_v29 = vadd.s32 8, %v4872_v28  ;;  %v2528_v49 = vadd.s32 16, %v4872_v28  ;;  %v2529_v46 = vadd.s32 24, %v4872_v28  ;;  %v2559_v45 = vadd.s32 %v4876_v26, %v4872_v28 }
 0x221   : > { %v2530_v0 = vadd.s32 32, %v4872_v28  ;;  %v2531_v15 = vadd.s32 40, %v4872_v28  ;;  %v2532_v37 = vadd.s32 48, %v4872_v28  ;;  %v2533_v60 = vadd.s32 56, %v4872_v28 }
 0x222   : > { %v2560_v42 = vadd.s32 %v4876_v26, %v2527_v29  ;;  %v2561_v14 = vadd.s32 %v4876_v26, %v2528_v49  ;;  %v2562_v39 = vadd.s32 %v4876_v26, %v2529_v46  ;;  %vm2591_vm0 = vcmp.lt.s32.totalorder %v2559_v45, 512 }
 0x223   : > { %v2563_v27 = vadd.s32 %v4876_v26, %v2530_v0  ;;  %v2687_v2 = vsel %vm2591_vm0, %v4706_v44, 0.0  ;;  %v2564_v43 = vadd.s32 %v4876_v26, %v2531_v15  ;;  %v2534_v61 = vadd.s32 64, %v4872_v28 }
 0x224   : > { %vm2592_vm1 = vcmp.lt.s32.totalorder %v2560_v42, 512  ;;  %vm2593_vm2 = vcmp.lt.s32.totalorder %v2561_v14, 512  ;;  %vm2594_vm3 = vcmp.lt.s32.totalorder %v2562_v39, 512  ;;  %v2565_v11 = vadd.s32 %v4876_v26, %v2532_v37 }
 0x225   : > { %v2688_v19 = vsel %vm2592_vm1, %v4716_v4, 0.0  ;;  %v2689_v41 = vsel %vm2593_vm2, %v4703_v53, 0.0  ;;  %vm2595_vm4 = vcmp.lt.s32.totalorder %v2563_v27, 512  ;;  %v2690_v25 = vsel %vm2594_vm3, %v4711_v40, 0.0 }
 0x226   : > { %v2719_v55 = vadd.f32 %v2688_v19, %v2687_v2  ;;  %v2535_v44 = vadd.s32 72, %v4872_v28  ;;  %v2566_v4 = vadd.s32 %v4876_v26, %v2533_v60  ;;  %vm2596_vm5 = vcmp.lt.s32.totalorder %v2564_v43, 512 }
 0x227   : > { %v2536_v38 = vadd.s32 80, %v4872_v28  ;;  %v2567_v59 = vadd.s32 %v4876_v26, %v2534_v61  ;;  %v2691_v48 = vsel %vm2595_vm4, %v4732_v58, 0.0  ;;  %vm2597_vm6 = vcmp.lt.s32.totalorder %v2565_v11, 512 }
 0x228   : > { %v2720_v31 = vadd.f32 %v2719_v55, %v2689_v41  ;;  %v2756_v18 = vmul.f32 %v2687_v2, %v2687_v2  ;;  %v2757_v63 = vmul.f32 %v2688_v19, %v2688_v19  ;;  %v2537_v10 = vadd.s32 88, %v4872_v28 }
 0x229   : > { %v2692_v40 = vsel %vm2596_vm5, %v4742_v30, 0.0  ;;  %v2568_v13 = vadd.s32 %v4876_v26, %v2535_v44  ;;  %vm2598_vm7 = vcmp.lt.s32.totalorder %v2566_v4, 512  ;;  %v2758_v29 = vmul.f32 %v2689_v41, %v2689_v41 }
 0x22a   : > { %v2721_v7 = vadd.f32 %v2720_v31, %v2690_v25  ;;  %v2538_v49 = vadd.s32 96, %v4872_v28  ;;  %v2569_v46 = vadd.s32 %v4876_v26, %v2536_v38  ;;  %v2693_v45 = vsel %vm2597_vm6, %v4729_v47, 0.0 }
 0x22b   : > { %vm2599_vm8 = vcmp.lt.s32.totalorder %v2567_v59, 512  ;;  %v2759_v42 = vmul.f32 %v2690_v25, %v2690_v25  ;;  %v2788_v0 = vadd.f32 %v2757_v63, %v2756_v18  ;;  %v2539_v14 = vadd.s32 104, %v4872_v28 }
 0x22c   : > { %v2722_v53 = vadd.f32 %v2721_v7, %v2691_v48  ;;  %v2570_v15 = vadd.s32 %v4876_v26, %v2537_v10  ;;  %v2694_v30 = vsel %vm2598_vm7, %v4737_v1, 0.0  ;;  %vm2600_vm9 = vcmp.lt.s32.totalorder %v2568_v13, 512 }
 0x22d   : > { %v2760_v37 = vmul.f32 %v2691_v48, %v2691_v48  ;;  %v2789_v27 = vadd.f32 %v2788_v0, %v2758_v29  ;;  %v2540_v2 = vadd.s32 112, %v4872_v28  ;;  %v2571_v19 = vadd.s32 %v4876_v26, %v2538_v49 }
 0x22e   : > { %v2723_v6 = vadd.f32 %v2722_v53, %v2692_v40  ;;  %v2695_v47 = vsel %vm2599_vm8, %v4754_v54, 0.0  ;;  %vm2601_vm10 = vcmp.lt.s32.totalorder %v2569_v46, 512  ;;  %v2761_v43 = vmul.f32 %v2692_v40, %v2692_v40 }
 0x22f   : > { %v2790_v55 = vadd.f32 %v2789_v27, %v2759_v42  ;;  %v2541_v61 = vadd.s32 120, %v4872_v28  ;;  %v2572_v41 = vadd.s32 %v4876_v26, %v2539_v14  ;;  %v2696_v1 = vsel %vm2600_vm9, %v4764_v9, 0.0 }
 0x230   : > { %v2724_v58 = vadd.f32 %v2723_v6, %v2693_v45  ;;  %vm2602_vm11 = vcmp.lt.s32.totalorder %v2570_v15, 512  ;;  %v2762_v31 = vmul.f32 %v2693_v45, %v2693_v45  ;;  %v2542_v44 = vadd.s32 128, %v4872_v28 }
 0x231   : > { %v2791_v25 = vadd.f32 %v2790_v55, %v2760_v37  ;;  %v2573_v4 = vadd.s32 %v4876_v26, %v2540_v2  ;;  %v2697_v54 = vsel %vm2601_vm10, %v4751_v20, 0.0  ;;  %vm2603_vm12 = vcmp.lt.s32.totalorder %v2571_v19, 512 }
 0x232   : > { %v2725_v39 = vadd.f32 %v2724_v58, %v2694_v30  ;;  %v2763_v38 = vmul.f32 %v2694_v30, %v2694_v30  ;;  %v2543_v48 = vadd.s32 136, %v4872_v28  ;;  %v2574_v53 = vadd.s32 %v4876_v26, %v2541_v61 }
 0x233   : > { %v2792_v59 = vadd.f32 %v2791_v25, %v2761_v43  ;;  %v2698_v9 = vsel %vm2602_vm11, %v4759_v8, 0.0  ;;  %vm2604_vm13 = vcmp.lt.s32.totalorder %v2572_v41, 512  ;;  %v2764_v63 = vmul.f32 %v2695_v47, %v2695_v47 }
 0x234   : > { %v2726_v60 = vadd.f32 %v2725_v39, %v2695_v47  ;;  %v2544_v40 = vadd.s32 144, %v4872_v28  ;;  %v2575_v13 = vadd.s32 %v4876_v26, %v2542_v44  ;;  %v2699_v20 = vsel %vm2603_vm12, %v4776_v34, 0.0 }
 0x235   : > { %v2793_v10 = vadd.f32 %v2792_v59, %v2762_v31  ;;  %vm2605_vm14 = vcmp.lt.s32.totalorder %v2573_v4, 512  ;;  %v2765_v29 = vmul.f32 %v2696_v1, %v2696_v1  ;;  %v2545_v46 = vadd.s32 152, %v4872_v28 }
 0x236   : > { %v2727_v11 = vadd.f32 %v2726_v60, %v2696_v1  ;;  %v2576_v45 = vadd.s32 %v4876_v26, %v2543_v48  ;;  %v2700_v8 = vsel %vm2604_vm13, %v4786_v33, 0.0  ;;  %vm2606_vm15 = vcmp.lt.s32.totalorder %v2574_v53, 512 }
 0x237   : > { %v2794_v49 = vadd.f32 %v2793_v10, %v2763_v38  ;;  %v2766_v42 = vmul.f32 %v2697_v54, %v2697_v54  ;;  %v2546_v14 = vadd.s32 160, %v4872_v28  ;;  %v2577_v15 = vadd.s32 %v4876_v26, %v2544_v40 }
 0x238   : > { %v2728_v7 = vadd.f32 %v2727_v11, %v2697_v54  ;;  %v2701_v34 = vsel %vm2605_vm14, %v4773_v56, 0.0  ;;  %vm2607_vm0 = vcmp.lt.s32.totalorder %v2575_v13, 512  ;;  %v2767_v39 = vmul.f32 %v2698_v9, %v2698_v9 }
 0x239   : > { %v2795_v0 = vadd.f32 %v2794_v49, %v2764_v63  ;;  %v2547_v27 = vadd.s32 168, %v4872_v28  ;;  %v2578_v2 = vadd.s32 %v4876_v26, %v2545_v46  ;;  %v2702_v33 = vsel %vm2606_vm15, %v4781_v36, 0.0 }
 0x23a   : > { %v2729_v18 = vadd.f32 %v2728_v7, %v2698_v9  ;;  %vm2608_vm1 = vcmp.lt.s32.totalorder %v2576_v45, 512  ;;  %v2768_v47 = vmul.f32 %v2699_v20, %v2699_v20  ;;  %v2548_v43 = vadd.s32 176, %v4872_v28 }
 0x23b   : > { %v2796_v37 = vadd.f32 %v2795_v0, %v2765_v29  ;;  %v2579_v55 = vadd.s32 %v4876_v26, %v2546_v14  ;;  %v2703_v56 = vsel %vm2607_vm0, %v4797_v21, 0.0  ;;  %vm2609_vm2 = vcmp.lt.s32.totalorder %v2577_v15, 512 }
 0x23c   : > { %v2730_v6 = vadd.f32 %v2729_v18, %v2699_v20  ;;  %v2769_v41 = vmul.f32 %v2700_v8, %v2700_v8  ;;  %v2549_v11 = vadd.s32 184, %v4872_v28  ;;  %v2580_v31 = vadd.s32 %v4876_v26, %v2547_v27 }
 0x23d   : > { %v2797_v60 = vadd.f32 %v2796_v37, %v2766_v42  ;;  %v2704_v36 = vsel %vm2608_vm1, %v4806_v23, 0.0  ;;  %vm2610_vm3 = vcmp.lt.s32.totalorder %v2578_v2, 512  ;;  %v2770_v44 = vmul.f32 %v2701_v34, %v2701_v34 }
 0x23e   : > { %v2731_v58 = vadd.f32 %v2730_v6, %v2700_v8  ;;  %v2550_v54 = vadd.s32 192, %v4872_v28  ;;  %v2581_v7 = vadd.s32 %v4876_v26, %v2548_v43  ;;  %v2705_v21 = vsel %vm2609_vm2, %v4794_v50, 0.0 }
 0x23f   : > { %v2798_v1 = vadd.f32 %v2797_v60, %v2767_v39  ;;  %vm2611_vm4 = vcmp.lt.s32.totalorder %v2579_v55, 512  ;;  %v2771_v59 = vmul.f32 %v2702_v33, %v2702_v33  ;;  %v2551_v53 = vadd.s32 200, %v4872_v28 }
 0x240   : > { %v2732_v30 = vadd.f32 %v2731_v58, %v2701_v34  ;;  %v2582_v9 = vadd.s32 %v4876_v26, %v2549_v11  ;;  %v2706_v23 = vsel %vm2610_vm3, %v4801_v3, 0.0  ;;  %vm2612_vm5 = vcmp.lt.s32.totalorder %v2580_v31, 512 }
 0x241   : > { %v2799_v4 = vadd.f32 %v2798_v1, %v2768_v47  ;;  %v2772_v63 = vmul.f32 %v2703_v56, %v2703_v56  ;;  %v2552_v40 = vadd.s32 208, %v4872_v28  ;;  %v2583_v13 = vadd.s32 %v4876_v26, %v2550_v54 }
 0x242   : > { %v2733_v19 = vadd.f32 %v2732_v30, %v2702_v33  ;;  %v2707_v50 = vsel %vm2611_vm4, %v4816_v17, 0.0  ;;  %vm2613_vm6 = vcmp.lt.s32.totalorder %v2581_v7, 512  ;;  %v2773_v6 = vmul.f32 %v2704_v36, %v2704_v36 }
 0x243   : > { %v2800_v48 = vadd.f32 %v2799_v4, %v2769_v41  ;;  %v2553_v49 = vadd.s32 216, %v4872_v28  ;;  %v2584_v46 = vadd.s32 %v4876_v26, %v2551_v53  ;;  %v2708_v3 = vsel %vm2612_vm5, %v4824_v35, 0.0 }
 0x244   : > { %v2734_v61 = vadd.f32 %v2733_v19, %v2703_v56  ;;  %vm2614_vm7 = vcmp.lt.s32.totalorder %v2582_v9, 512  ;;  %v2774_v8 = vmul.f32 %v2705_v21, %v2705_v21  ;;  %v2554_v42 = vadd.s32 224, %v4872_v28 }
 0x245   : > { %v2801_v10 = vadd.f32 %v2800_v48, %v2770_v44  ;;  %v2585_v0 = vadd.s32 %v4876_v26, %v2552_v40  ;;  %v2709_v17 = vsel %vm2613_vm6, %v4814_v62, 0.0  ;;  %vm2615_vm8 = vcmp.lt.s32.totalorder %v2583_v13, 512 }
 0x246   : > { %v2735_v25 = vadd.f32 %v2734_v61, %v2704_v36  ;;  %v2775_v15 = vmul.f32 %v2706_v23, %v2706_v23  ;;  %v2555_v30 = vadd.s32 232, %v4872_v28  ;;  %v2586_v39 = vadd.s32 %v4876_v26, %v2553_v49 }
 0x247   : > { %v2802_v29 = vadd.f32 %v2801_v10, %v2771_v59  ;;  %v2710_v35 = vsel %vm2614_vm7, %v4820_v22, 0.0  ;;  %vm2616_vm9 = vcmp.lt.s32.totalorder %v2584_v46, 512  ;;  %v2776_v27 = vmul.f32 %v2707_v50, %v2707_v50 }
 0x248   : > { %v2736_v38 = vadd.f32 %v2735_v25, %v2705_v21  ;;  %v2556_v33 = vadd.s32 240, %v4872_v28  ;;  %v2587_v19 = vadd.s32 %v4876_v26, %v2554_v42  ;;  %v2711_v62 = vsel %vm2615_vm8, %v4834_v57, 0.0 }
 0x249   : > { %v2803_v58 = vadd.f32 %v2802_v29, %v2772_v63  ;;  %vm2617_vm10 = vcmp.lt.s32.totalorder %v2585_v0, 512  ;;  %v2777_v60 = vmul.f32 %v2708_v3, %v2708_v3  ;;  %v2557_v55 = vadd.s32 248, %v4872_v28 }
 0x24a   : > { %v2737_v18 = vadd.f32 %v2736_v38, %v2706_v23  ;;  %v2588_v56 = vadd.s32 %v4876_v26, %v2555_v30  ;;  %v2712_v22 = vsel %vm2616_vm9, %v4842_v24, 0.0  ;;  %vm2618_vm11 = vcmp.lt.s32.totalorder %v2586_v39, 512  ;;  %v2827_v30 = vld [vmem:[%s4986_s4] sm:$0x3] }
 0x24b   : > { %v2804_v34 = vadd.f32 %v2803_v58, %v2773_v6  ;;  %v2778_v41 = vmul.f32 %v2709_v17, %v2709_v17  ;;  %v2589_v11 = vadd.s32 %v4876_v26, %v2556_v33  ;;  %v2713_v31 = vsel %vm2617_vm10, %v4832_v52, 0.0 }
 0x24c   : > { %v2738_v20 = vadd.f32 %v2737_v18, %v2707_v50  ;;  %vm2619_vm12 = vcmp.lt.s32.totalorder %v2587_v19, 512  ;;  %v2779_v36 = vmul.f32 %v2710_v35, %v2710_v35  ;;  %v2590_v44 = vadd.s32 %v4876_v26, %v2557_v55 }
 0x24d   : > { %v2805_v2 = vadd.f32 %v2804_v34, %v2774_v8  ;;  %v2714_v28 = vsel %vm2618_vm11, %v4838_v5, 0.0  ;;  %vm2620_vm13 = vcmp.lt.s32.totalorder %v2588_v56, 512  ;;  %v2780_v54 = vmul.f32 %v2711_v62, %v2711_v62 }
 0x24e   : > { %v2739_v45 = vadd.f32 %v2738_v20, %v2708_v3  ;;  %v2715_v7 = vsel %vm2619_vm12, %v4850_v16, 0.0  ;;  %vm2621_vm14 = vcmp.lt.s32.totalorder %v2589_v11, 512  ;;  %v2781_v38 = vmul.f32 %v2712_v22, %v2712_v22 }
 0x24f   : > { %v2806_v43 = vadd.f32 %v2805_v2, %v2775_v15  ;;  %v2716_v52 = vsel %vm2620_vm13, %v4855_v12, 0.0  ;;  %vm2622_vm15 = vcmp.lt.s32.totalorder %v2590_v44, 512  ;;  %v2782_v53 = vmul.f32 %v2713_v31, %v2713_v31 }
 0x250   : > { %v2740_v14 = vadd.f32 %v2739_v45, %v2709_v17  ;;  %v2717_v26 = vsel %vm2621_vm14, %v4857_v51, 0.0  ;;  %v2783_v5 = vmul.f32 %v2714_v28, %v2714_v28  ;;  %v2718_v63 = vsel %vm2622_vm15, %v4864_v32, 0.0 }
 0x251   : > { %v2807_v1 = vadd.f32 %v2806_v43, %v2776_v27  ;;  %v2784_v40 = vmul.f32 %v2715_v7, %v2715_v7  ;;  %v2785_v50 = vmul.f32 %v2716_v52, %v2716_v52  ;;  %v2786_v29 = vmul.f32 %v2717_v26, %v2717_v26 }
 0x252   : > { %v2741_v37 = vadd.f32 %v2740_v14, %v2710_v35  ;;  %v2787_v49 = vmul.f32 %v2718_v63, %v2718_v63  ;;  %vm2825_vm0 = vcmask 1040384  }
 0x253   : > { %v2808_v25 = vadd.f32 %v2807_v1, %v2777_v60 }
 0x254   : > { %v2742_v47 = vadd.f32 %v2741_v37, %v2711_v62 }
 0x255   : > { %v2809_v24 = vadd.f32 %v2808_v25, %v2778_v41 }
 0x256   : > { %v2743_v61 = vadd.f32 %v2742_v47, %v2712_v22 }
 0x257   : > { %v2810_v59 = vadd.f32 %v2809_v24, %v2779_v36 }
 0x258   : > { %v2744_v57 = vadd.f32 %v2743_v61, %v2713_v31 }
 0x259   : > { %v2811_v9 = vadd.f32 %v2810_v59, %v2780_v54 }
 0x25a   : > { %v2745_v4 = vadd.f32 %v2744_v57, %v2714_v28 }
 0x25b   : > { %v2812_v18 = vadd.f32 %v2811_v9, %v2781_v38 }
 0x25c   : > { %v2746_v21 = vadd.f32 %v2745_v4, %v2715_v7 }
 0x25d   : > { %v2813_v16 = vadd.f32 %v2812_v18, %v2782_v53 }
 0x25e   : > { %v2747_v48 = vadd.f32 %v2746_v21, %v2716_v52 }
 0x25f   : > { %v2814_v20 = vadd.f32 %v2813_v16, %v2783_v5 }
 0x260   : > { %v2748_v23 = vadd.f32 %v2747_v48, %v2717_v26 }
 0x261   : > { %v2815_v12 = vadd.f32 %v2814_v20, %v2784_v40 }
 0x262   : > { %v2749_v10 = vadd.f32 %v2748_v23, %v2718_v63 }
 0x263   : > { %v2816_v46 = vadd.f32 %v2815_v12, %v2785_v50 }
 0x264   : > { %v2750_v13 = vrot.slane %v2749_v10, 4 }
 0x265   : > { %v2817_v45 = vadd.f32 %v2816_v46, %v2786_v29 }
 0x266   : > { %v2751_v6 = vadd.f32 %v2750_v13, %v2749_v10 }
 0x267   : > { %v2818_v8 = vadd.f32 %v2817_v45, %v2787_v49 }
 0x268   : > { %v2752_v3 = vrot.slane %v2751_v6, 2 }
 0x269   : > { %v2819_v58 = vrot.slane %v2818_v8, 4 }
 0x26a   : > { %v2753_v51 = vadd.f32 %v2752_v3, %v2751_v6 }
 0x26b   : > { %v2820_v42 = vadd.f32 %v2819_v58, %v2818_v8 }
 0x26c   : > { %v2754_v0 = vrot.slane %v2753_v51, 1 }
 0x26d   : > { %v2821_v17 = vrot.slane %v2820_v42, 2 }
 0x26e   : > { %v2755_v14 = vadd.f32 %v2754_v0, %v2753_v51 }
 0x26f   : > { %v2822_v32 = vadd.f32 %v2821_v17, %v2820_v42 }
 0x271   : > { %v2823_v15 = vrot.slane %v2822_v32, 1 }
 0x273   : > { %v2824_v34 = vadd.f32 %v2823_v15, %v2822_v32 }
 0x275   : > { %v2826_v39 = vsel %vm2825_vm0, %v2755_v14, %v2824_v34 }
 0x276   : > { %v2828_v35 = vadd.f32 %v2827_v30, %v2826_v39 }
 0x278   : > { %2829 = vst [vmem:[%s4986_s4] sm:$0x3] %v2828_v35 }
 0x279 PF: > { %s15_s15 = sadd.s32 1, %s3954_s15  }
 0x27a   : > { %p12_p5 = scmp.ge.s32.totalorder %s15_s15, 4  }
 0x27c   :  { %14 = sbr.rel (!%p12_p5) target bundleno = 1 (0x1), region = 74 }

</bundles_post_ra>
